<compile_context>
chip_gen: v7x
topology: tpu7x:2x2x1
jax: 0.10.0
libtpu: 0.0.40
codegen_flags: <defaults>
</compile_context>

<pallas_src>
import functools

import jax
import jax.numpy as jnp
from jax.experimental import pallas as pl
from jax.experimental.pallas import tpu as pltpu


def _round_up(v, m):
    return (v + m - 1) // m * m


@functools.lru_cache(maxsize=1)
def _vmem_capacity_bytes():
    """Physical VMEM per core (64 MiB on v7x, 128 MiB on v5e/v6e)."""
    try:
        cap = int(pltpu.get_tpu_info().vmem_capacity_bytes)
    except Exception:
        cap = 64 * 1024 * 1024
    return max(32 * 1024 * 1024, min(cap, 128 * 1024 * 1024))


def _vmem_limit_bytes():
    return min(int(_vmem_capacity_bytes() * 0.75), 96 * 1024 * 1024)


def _fusion_budget_bytes():
    # Headroom below the scoped limit for compiler temporaries (im2col load,
    # f32 matmul result, DMA bookkeeping).
    return int(_vmem_capacity_bytes() * 0.6)


# ----------------------------------------------------------------------------
# Kernel A (fallback for stages too large to fuse): one 3x3 conv + folded-BN
# affine + optional ReLU, row-tiled, aligned im2col slab, single dot per tile.
# ----------------------------------------------------------------------------
def _conv3x3_kernel(x_ref, w_ref, s_ref, b_ref, o_ref, xpad_ref, slab_ref, *,
                    H, W, tr, cin, cpad, relu):
    # x_ref   : (1, H, W, cin)        bf16, one batch element
    # w_ref   : (9*cpad, tc)          bf16, one Cout tile (tap-major, lane-aligned)
    # s_ref/b_ref : (1, tc)           f32 folded-BN scale / bias
    # o_ref   : (1, tr, W, tc)        one row band of the output
    # xpad_ref: (H+2, W+2, cin)       bf16 halo'd image (built once per (j,i))
    # slab_ref: (tr, W, 9*cpad)       bf16 im2col slab
    # NOTE: relies on r being the innermost, sequential ("arbitrary") grid axis.
    r = pl.program_id(2)
    tc = o_ref.shape[-1]

    @pl.when(r == 0)
    def _init():
        # Zero ONLY the halo ring; the interior is overwritten right below.
        xpad_ref[0:1, :, :] = jnp.zeros((1, W + 2, cin), xpad_ref.dtype)
        xpad_ref[H + 1:H + 2, :, :] = jnp.zeros((1, W + 2, cin), xpad_ref.dtype)
        xpad_ref[:, 0:1, :] = jnp.zeros((H + 2, 1, cin), xpad_ref.dtype)
        xpad_ref[:, W + 1:W + 2, :] = jnp.zeros((H + 2, 1, cin), xpad_ref.dtype)
        xpad_ref[1:H + 1, 1:W + 1, :] = x_ref[0]
        if cin != cpad:
            # Padding lanes multiply zero weight rows; keep them finite (zero).
            slab_ref[...] = jnp.zeros(slab_ref.shape, slab_ref.dtype)

    row0 = r * tr
    for dy in range(3):
        for dx in range(3):
            k0 = (dy * 3 + dx) * cpad      # 128-lane aligned tap offset
            slab_ref[:, :, k0:k0 + cin] = xpad_ref[pl.ds(row0 + dy, tr),
                                                   pl.ds(dx, W), :]
    y = jnp.dot(slab_ref[...].reshape(tr * W, 9 * cpad), w_ref[...],
                preferred_element_type=jnp.float32)
    y = y * s_ref[...] + b_ref[...]
    if relu:
        y = jnp.maximum(y, 0.0)
    o_ref[0] = y.reshape(tr, W, tc).astype(o_ref.dtype)


def conv3x3_bn_act(x, w, scale, bias, relu):
    """x: (N,H,W,Cin); w: (3,3,Cin,Cout) f32; scale,bias: (Cout,) f32 -> bf16 NHWC."""
    x = x.astype(jnp.bfloat16)
    N, H, W, Cin = x.shape
    Cout = w.shape[-1]

    # Stem hygiene: pad a tiny Cin up to 8 inert zero channels.
    if Cin < 8:
        pc = 8 - Cin
        x = jnp.pad(x, ((0, 0), (0, 0), (0, 0), (0, pc)))
        w = jnp.pad(w, ((0, 0), (0, 0), (0, pc), (0, 0)))
        Cin = 8

    # Tap blocks are padded to a 128-lane multiple so every slab store is aligned.
    cpad = _round_up(Cin, 128)
    if cpad != Cin:
        w = jnp.pad(w, ((0, 0), (0, 0), (0, cpad - Cin), (0, 0)))

    # Lane-dense output stores: pad ANY Cout < 128 (or non-multiple) up to 128.
    Cout_p = _round_up(Cout, 128)
    if Cout_p != Cout:
        w = jnp.pad(w, ((0, 0), (0, 0), (0, 0), (0, Cout_p - Cout)))
        scale = jnp.pad(scale, (0, Cout_p - Cout))
        bias = jnp.pad(bias, (0, Cout_p - Cout))
    tc = 128  # TODO(synk): tc=256 on v6e for Cout>=256 to better fill the 256-deep MXU.

    # Row tile: big enough to feed the MXU, small enough to keep the slab modest.
    tr = H
    while tr % 2 == 0 and (tr * W > 1024 or tr * W * 9 * cpad * 2 > 4 * 2**20):
        tr //= 2

    w2d = w.reshape(9 * cpad, Cout_p).astype(jnp.bfloat16)
    s2 = scale.reshape(1, Cout_p).astype(jnp.float32)
    b2 = bias.reshape(1, Cout_p).astype(jnp.float32)

    kernel = functools.partial(_conv3x3_kernel, H=H, W=W, tr=tr,
                               cin=Cin, cpad=cpad, relu=relu)
    out = pl.pallas_call(
        kernel,
        out_shape=jax.ShapeDtypeStruct((N, H, W, Cout_p), jnp.bfloat16),
        # NOTE: with Cout_p//tc > 1 the halo rebuild repeats per Cout tile; fine
        # for this fallback path (Cout_p//tc == 1 in the SegNet config).
        grid=(Cout_p // tc, N, H // tr),
        in_specs=[
            pl.BlockSpec((1, H, W, Cin), lambda j, i, r: (i, 0, 0, 0)),
            pl.BlockSpec((9 * cpad, tc), lambda j, i, r: (0, j)),
            pl.BlockSpec((1, tc), lambda j, i, r: (0, j)),
            pl.BlockSpec((1, tc), lambda j, i, r: (0, j)),
        ],
        out_specs=pl.BlockSpec((1, tr, W, tc), lambda j, i, r: (i, r, 0, j)),
        scratch_shapes=[pltpu.VMEM((H + 2, W + 2, Cin), jnp.bfloat16),
                        pltpu.VMEM((tr, W, 9 * cpad), jnp.bfloat16)],
        compiler_params=pltpu.CompilerParams(
            dimension_semantics=("parallel", "parallel", "arbitrary"),
            vmem_limit_bytes=_vmem_limit_bytes(),
        ),
    )(x, w2d, s2, b2)

    if Cout_p != Cout:
        out = out[..., :Cout]
    return out


# ----------------------------------------------------------------------------
# Kernel B: a whole stage (2-3 convs) fused in ONE pallas_call.
# Batch folded into the matmul M dim; padded intermediates + im2col slab in VMEM.
# ----------------------------------------------------------------------------
def _make_fused_stage_kernel(H, W, layer_meta):
    # layer_meta: [(cin, cpad, cout, relu), ...]  (all static Python ints/bools)
    L = len(layer_meta)
    needs_slab_zero = any(cin != cpad for (cin, cpad, _, _) in layer_meta)

    def kernel(*refs):
        x_ref = refs[0]
        o_ref = refs[1 + 3 * L]
        ping = refs[2 + 3 * L]
        pong = refs[3 + 3 * L]
        slab = refs[4 + 3 * L]
        n = x_ref.shape[0]
        M = n * H * W
        cm = ping.shape[-1]

        if needs_slab_zero:
            # Padding lanes of the slab multiply zero weight rows; keep finite.
            slab[...] = jnp.zeros(slab.shape, slab.dtype)

        # Zero ONLY the halo ring of both padded buffers (interiors always
        # overwritten; re-done every grid step so megacore splits stay correct).
        zrow = jnp.zeros((n, 1, W + 2, cm), ping.dtype)
        zcol = jnp.zeros((n, H + 2, 1, cm), ping.dtype)
        for buf in (ping, pong):
            buf[:, 0:1, :, :] = zrow
            buf[:, H + 1:H + 2, :, :] = zrow
            buf[:, :, 0:1, :] = zcol
            buf[:, :, W + 1:W + 2, :] = zcol

        c0 = layer_meta[0][0]
        ping[:, 1:H + 1, 1:W + 1, :c0] = x_ref[...]

        src, dst = ping, pong
        for l, (cin, cpad, cout, relu) in enumerate(layer_meta):
            w_ref = refs[1 + 3 * l]   # (9*cpad, cout) bf16
            s_ref = refs[2 + 3 * l]   # (1, cout)      f32
            b_ref = refs[3 + 3 * l]   # (1, cout)      f32
            # im2col: fold all 9 taps into K (lane-aligned tap blocks).
            for dy in range(3):
                for dx in range(3):
                    k0 = (dy * 3 + dx) * cpad
                    slab[:, :, :, k0:k0 + cin] = src[:, dy:dy + H, dx:dx + W, :cin]
            K = 9 * cpad
            y = jnp.dot(slab[:, :, :, :K].reshape(M, K), w_ref[...],
                        preferred_element_type=jnp.float32)
            y = y * s_ref[...] + b_ref[...]
            if relu:
                y = jnp.maximum(y, 0.0)
            if l == L - 1:
                o_ref[...] = y.reshape(n, H, W, cout).astype(o_ref.dtype)
            else:
                dst[:, 1:H + 1, 1:W + 1, :cout] = (
                    y.reshape(n, H, W, cout).astype(dst.dtype))
                src, dst = dst, src

    return kernel


def fused_stage(x, layers, batch_grid=False):
    """Run all conv+BN(+ReLU) layers of one stage in a single pallas_call."""
    x = x.astype(jnp.bfloat16)
    N, H, W, Cin0 = x.shape
    layers = list(layers)

    # Stem hygiene: pad a tiny Cin up to 8 inert zero channels.
    if Cin0 < 8:
        pc = 8 - Cin0
        x = jnp.pad(x, ((0, 0), (0, 0), (0, 0), (0, pc)))
        w0, s0, b0, r0 = layers[0]
        layers[0] = (jnp.pad(w0, ((0, 0), (0, 0), (0, pc), (0, 0))), s0, b0, r0)
        Cin0 = 8

    L = len(layers)
    metas = []
    flat_args = [x]
    cmax = Cin0
    cpad_max = 128
    prev_cout = Cin0
    true_cout_last = layers[-1][0].shape[3]

    for li, (w, s, b, relu) in enumerate(layers):
        cin, cout = w.shape[2], w.shape[3]
        # Stale-channel guard: each layer must consume exactly what the previous produced.
        assert cin == prev_cout, (
            "fused stage needs layer cin == previous cout "
            "(layer %d: cin=%d prev=%d)" % (li, cin, prev_cout))
        cpad = _round_up(cin, 128)
        if cpad != cin:
            w = jnp.pad(w, ((0, 0), (0, 0), (0, cpad - cin), (0, 0)))
        cout_p = cout
        if li == L - 1 and cout < 64:
            # Lane-dense final store for the tiny logits layer.
            cout_p = 128
            w = jnp.pad(w, ((0, 0), (0, 0), (0, 0), (0, cout_p - cout)))
            s = jnp.pad(s, (0, cout_p - cout))
            b = jnp.pad(b, (0, cout_p - cout))
        metas.append((cin, cpad, cout_p, relu))
        flat_args += [w.reshape(9 * cpad, cout_p).astype(jnp.bfloat16),
                      s.reshape(1, cout_p).astype(jnp.float32),
                      b.reshape(1, cout_p).astype(jnp.float32)]
        cmax = max(cmax, cout_p)
        cpad_max = max(cpad_max, cpad)
        prev_cout = cout

    cout_last_p = metas[-1][2]
    G = N if (batch_grid and N > 1) else 1
    nb = N // G

    in_specs = [pl.BlockSpec((nb, H, W, Cin0), lambda i: (i, 0, 0, 0))]
    for (cin, cpad, cout_p, _) in metas:
        in_specs += [pl.BlockSpec((9 * cpad, cout_p), lambda i: (0, 0)),
                     pl.BlockSpec((1, cout_p), lambda i: (0, 0)),
                     pl.BlockSpec((1, cout_p), lambda i: (0, 0))]

    kernel = _make_fused_stage_kernel(H, W, metas)
    out = pl.pallas_call(
        kernel,
        out_shape=jax.ShapeDtypeStruct((N, H, W, cout_last_p), jnp.bfloat16),
        grid=(G,),
        in_specs=in_specs,
        out_specs=pl.BlockSpec((nb, H, W, cout_last_p), lambda i: (i, 0, 0, 0)),
        scratch_shapes=[pltpu.VMEM((nb, H + 2, W + 2, cmax), jnp.bfloat16),
                        pltpu.VMEM((nb, H + 2, W + 2, cmax), jnp.bfloat16),
                        pltpu.VMEM((nb, H, W, 9 * cpad_max), jnp.bfloat16)],
        compiler_params=pltpu.CompilerParams(
            dimension_semantics=("parallel",) if G > 1 else ("arbitrary",),
            vmem_limit_bytes=_vmem_limit_bytes(),
        ),
    )(*flat_args)

    if cout_last_p != true_cout_last:
        out = out[..., :true_cout_last]
    return out


def _fused_stage_vmem_estimate(x_shape, layers, batch_grid):
    """Rough VMEM footprint (bytes) of fused_stage for the fusion gate."""
    N, H, W, Cin0 = x_shape
    Cin0 = max(Cin0, 8)
    nb = 1 if (batch_grid and N > 1) else N
    L = len(layers)
    cmax, cpad_max = Cin0, 128
    w_bytes = sb_bytes = 0
    cout_last_p = Cin0
    for li, (w, _, _, _) in enumerate(layers):
        cin, cout = max(w.shape[2], 8), w.shape[3]
        cpad = _round_up(cin, 128)
        cout_p = 128 if (li == L - 1 and cout < 64) else cout
        w_bytes += 9 * cpad * cout_p * 2
        sb_bytes += 2 * cout_p * 4
        cmax = max(cmax, cout_p)
        cpad_max = max(cpad_max, cpad)
        cout_last_p = cout_p
    x_bytes = nb * H * W * Cin0 * 2
    out_bytes = nb * H * W * cout_last_p * 2
    ping_bytes = nb * (H + 2) * (W + 2) * cmax * 2
    slab_bytes = nb * H * W * 9 * cpad_max * 2
    # inputs/outputs double-buffered by the pipeline; scratch single-buffered.
    return 2 * (x_bytes + w_bytes + sb_bytes + out_bytes) + 2 * ping_bytes + slab_bytes


def run_stage(x, layers):
    N, H, W, _ = x.shape
    # Batch grid (and megacore split on v7x) only for big-spatial stages where
    # weights are small; weight-heavy deep stages keep a single-copy weight DMA.
    batch_grid = (H * W >= 256) and (N > 1)
    if _fused_stage_vmem_estimate(x.shape, layers, batch_grid) <= _fusion_budget_bytes():
        return fused_stage(x, layers, batch_grid=batch_grid)
    for (w, s, b, relu) in layers:
        x = conv3x3_bn_act(x, w, s, b, relu)
    return x


# ----------------------------------------------------------------------------
# max_pool2d(kernel=2, stride=2, return_indices) / max_unpool2d  (JAX glue)
# Window-local indices (0..3 = dy*2+dx); self-consistent pool/unpool pair
# matching F.max_pool2d / F.max_unpool2d placement semantics.
# ----------------------------------------------------------------------------
def maxpool2x2(x):  # NHWC
    a = x[:, 0::2, 0::2, :]
    b = x[:, 0::2, 1::2, :]
    c = x[:, 1::2, 0::2, :]
    d = x[:, 1::2, 1::2, :]
    mab = jnp.maximum(a, b)
    iab = jnp.where(a >= b, jnp.int32(0), jnp.int32(1))
    mcd = jnp.maximum(c, d)
    icd = jnp.where(c >= d, jnp.int32(2), jnp.int32(3))
    out = jnp.maximum(mab, mcd)
    idx = jnp.where(mab >= mcd, iab, icd)
    return out, idx


def maxunpool2x2(x, idx):  # NHWC
    N, h, w, C = x.shape
    z = jnp.zeros_like(x)
    q00 = jnp.where(idx == 0, x, z)
    q01 = jnp.where(idx == 1, x, z)
    q10 = jnp.where(idx == 2, x, z)
    q11 = jnp.where(idx == 3, x, z)
    top = jnp.stack([q00, q01], axis=3).reshape(N, h, 2 * w, C)
    bot = jnp.stack([q10, q11], axis=3).reshape(N, h, 2 * w, C)
    return jnp.stack([top, bot], axis=2).reshape(N, 2 * h, 2 * w, C)


# ----------------------------------------------------------------------------
# Deterministic parameter construction (Conv + BatchNorm folded, eval mode)
# ----------------------------------------------------------------------------
def _make_layer(key, cin, cout, has_bn):
    kw, kb, kg, kbeta, km, kv = jax.random.split(key, 6)
    w = jax.random.normal(kw, (3, 3, cin, cout), jnp.float32) * 0.05
    conv_b = jax.random.normal(kb, (cout,), jnp.float32) * 0.05
    if has_bn:
        gamma = 1.0 + 0.1 * jax.random.normal(kg, (cout,), jnp.float32)
        beta = 0.1 * jax.random.normal(kbeta, (cout,), jnp.float32)
        mean = 0.1 * jax.random.normal(km, (cout,), jnp.float32)
        var = jnp.abs(jax.random.normal(kv, (cout,), jnp.float32)) + 0.5
        scale = gamma / jnp.sqrt(var + 1e-5)
        bias = scale * (conv_b - mean) + beta
    else:
        scale = jnp.ones((cout,), jnp.float32)
        bias = conv_b
    return w, scale, bias


def build_segnet_params(img_ch, output_ch, seed=0):
    key = jax.random.PRNGKey(seed)

    enc_cfg = [
        [(img_ch, 64, True, True), (64, 64, True, True)],
        [(64, 128, True, True), (128, 128, True, True)],
        [(128, 256, True, True), (256, 256, True, True), (256, 256, True, True)],
        [(256, 512, True, True), (512, 512, True, True), (512, 512, True, True)],
        [(512, 512, True, True), (512, 512, True, True), (512, 512, True, True)],
    ]
    dec_cfg = [
        [(512, 512, True, True), (512, 512, True, True), (512, 512, True, False)],  # deco1: BN, no ReLU
        [(512, 512, True, True), (512, 512, True, True), (512, 256, True, True)],
        [(256, 256, True, True), (256, 256, True, True), (256, 128, True, True)],
        [(128, 128, True, True), (128, 64, True, True)],
        [(64, 64, True, True), (64, output_ch, False, False)],                      # last: no BN, no ReLU
    ]

    def build(cfg):
        nonlocal key
        stages = []
        for stage in cfg:
            layers = []
            for (cin, cout, has_bn, relu) in stage:
                key, sub = jax.random.split(key)
                w, s, b = _make_layer(sub, cin, cout, has_bn)
                layers.append((w, s, b, relu))
            stages.append(layers)
        return stages

    return build(enc_cfg), build(dec_cfg)


# ----------------------------------------------------------------------------
# Full forward pass (matches segnet.forward)
# ----------------------------------------------------------------------------
def segnet_forward(x_nchw, enc_params, dec_params):
    x = jnp.transpose(x_nchw, (0, 2, 3, 1)).astype(jnp.bfloat16)  # NCHW -> NHWC
    ids = []
    for stage in enc_params:
        x = run_stage(x, stage)
        x, idx = maxpool2x2(x)
        ids.append(idx)
    n_stages = len(ids)
    for k, stage in enumerate(dec_params):
        x = maxunpool2x2(x, ids[n_stages - 1 - k])
        x = run_stage(x, stage)
    return jnp.transpose(x, (0, 3, 1, 2)).astype(jnp.float32)  # NHWC -> NCHW


# ----------------------------------------------------------------------------
# Reference (plain XLA) for numerics checks of the kernels.
# ----------------------------------------------------------------------------
def _conv_ref(x, w, scale, bias, relu):
    xf = x.astype(jnp.float32)
    wf = w.astype(jnp.bfloat16).astype(jnp.float32)   # match kernel's bf16 operands
    y = jax.lax.conv_general_dilated(
        xf, wf, (1, 1), "SAME",
        dimension_numbers=("NHWC", "HWIO", "NHWC"))
    y = y * scale.reshape(1, 1, 1, -1) + bias.reshape(1, 1, 1, -1)
    if relu:
        y = jnp.maximum(y, 0.0)
    return y


if __name__ == "__main__":
    img_ch, output_ch = 3, 2
    N, H, W = 2, 32, 32  # 5 pooling stages -> 1x1 at the bottleneck

    enc_params, dec_params = build_segnet_params(img_ch, output_ch, seed=0)

    key = jax.random.PRNGKey(0)
    x = jax.random.normal(key, (N, img_ch, H, W), jnp.float32)

    # --- smoke + loose numerics check: fallback per-layer kernel ---
    k1, k2 = jax.random.split(key)
    xs = jax.random.normal(k1, (2, 16, 16, 32), jnp.float32).astype(jnp.bfloat16)
    ws = 0.05 * jax.random.normal(k2, (3, 3, 32, 64), jnp.float32)
    ss = jnp.full((64,), 1.1, jnp.float32)
    bs = jnp.full((64,), 0.05, jnp.float32)
    got = conv3x3_bn_act(xs, ws, ss, bs, True)
    want = _conv_ref(xs, ws, ss, bs, True)
    assert got.shape == (2, 16, 16, 64), got.shape
    err = float(jnp.max(jnp.abs(got.astype(jnp.float32) - want)))
    assert err < 0.1, "conv3x3 kernel mismatch: %g" % err

    # --- smoke + loose numerics check: fused-stage kernel (batch grid path) ---
    k3, k4, k5 = jax.random.split(k2, 3)
    xf = jax.random.normal(k3, (2, 16, 16, 16), jnp.float32).astype(jnp.bfloat16)
    w1 = 0.05 * jax.random.normal(k4, (3, 3, 16, 32), jnp.float32)
    w2 = 0.05 * jax.random.normal(k5, (3, 3, 32, 48), jnp.float32)
    s1t = jnp.full((32,), 0.9, jnp.float32); b1t = jnp.full((32,), 0.02, jnp.float32)
    s2t = jnp.full((48,), 1.05, jnp.float32); b2t = jnp.full((48,), -0.01, jnp.float32)
    gotf = fused_stage(xf, [(w1, s1t, b1t, True), (w2, s2t, b2t, False)],
                       batch_grid=True)
    r1 = _conv_ref(xf, w1, s1t, b1t, True).astype(jnp.bfloat16)
    wantf = _conv_ref(r1, w2, s2t, b2t, False)
    assert gotf.shape == (2, 16, 16, 48), gotf.shape
    errf = float(jnp.max(jnp.abs(gotf.astype(jnp.float32) - wantf)))
    assert errf < 0.1, "fused stage mismatch: %g" % errf

    # --- full SegNet forward ---
    fwd = jax.jit(lambda xx: segnet_forward(xx, enc_params, dec_params))
    out = fwd(x)
    jax.block_until_ready(out)

    assert out.shape == (N, output_ch, H, W), out.shape
    assert out.dtype == jnp.float32
    print("KERNEL_OK")
</pallas_src>

<mosaic_0001>
module attributes {stable_mosaic.version = 11 : i64} {
  func.func @_conv3x3_kernel(%arg0: i32, %arg1: i32, %arg2: i32, %arg3: memref<1x16x16x32xbf16, #tpu.memory_space<vmem>>, %arg4: memref<1152x128xbf16, #tpu.memory_space<vmem>>, %arg5: memref<1x128xf32, #tpu.memory_space<vmem>>, %arg6: memref<1x128xf32, #tpu.memory_space<vmem>>, %arg7: memref<1x16x16x128xbf16, #tpu.memory_space<vmem>>, %arg8: memref<18x18x32xbf16, #tpu.memory_space<vmem>>, %arg9: memref<16x16x1152xbf16, #tpu.memory_space<vmem>>) attributes {dimension_semantics = [#tpu.dimension_semantics<parallel>, #tpu.dimension_semantics<parallel>, #tpu.dimension_semantics<arbitrary>], iteration_bounds = array<i64: 1, 2, 1>, scalar_prefetch = 0 : i64, scratch_operands = 2 : i64, tpu.core_type = #tpu.core_type<tc>, window_params = [{transform_indices = @transform_0, window_bounds = array<i64: 1, 16, 16, 32>}, {transform_indices = @transform_1, window_bounds = array<i64: 1152, 128>}, {transform_indices = @transform_2, window_bounds = array<i64: 1, 128>}, {transform_indices = @transform_3, window_bounds = array<i64: 1, 128>}, {transform_indices = @transform_4, window_bounds = array<i64: 1, 16, 16, 128>}]} {
    %c0_i32 = arith.constant 0 : i32
    %0 = arith.cmpi eq, %arg2, %c0_i32 : i32
    %1 = arith.extui %0 : i1 to i32
    %c0_i32_0 = arith.constant 0 : i32
    %2 = arith.cmpi ne, %1, %c0_i32_0 : i32
    scf.if %2 {
      %cst_56 = arith.constant 0.000000e+00 : bf16
      %57 = vector.broadcast %cst_56 : bf16 to vector<1x18x32xbf16>
      %c0_57 = arith.constant 0 : index
      %c0_58 = arith.constant 0 : index
      %c0_59 = arith.constant 0 : index
      %58 = vector.load %arg8[%c0_57, %c0_58, %c0_59] : memref<18x18x32xbf16, #tpu.memory_space<vmem>>, vector<1x18x32xbf16>
      tpu.vector_store %arg8[%c0_57, %c0_58, %c0_59], %57 {strides = array<i32>} : memref<18x18x32xbf16, #tpu.memory_space<vmem>>, vector<1x18x32xbf16>,
      %cst_60 = arith.constant 0.000000e+00 : bf16
      %59 = vector.broadcast %cst_60 : bf16 to vector<1x18x32xbf16>
      %c17 = arith.constant 17 : index
      %c0_61 = arith.constant 0 : index
      %c0_62 = arith.constant 0 : index
      %60 = vector.load %arg8[%c17, %c0_61, %c0_62] : memref<18x18x32xbf16, #tpu.memory_space<vmem>>, vector<1x18x32xbf16>
      tpu.vector_store %arg8[%c17, %c0_61, %c0_62], %59 {strides = array<i32>} : memref<18x18x32xbf16, #tpu.memory_space<vmem>>, vector<1x18x32xbf16>,
      %cst_63 = arith.constant 0.000000e+00 : bf16
      %61 = vector.broadcast %cst_63 : bf16 to vector<18x1x32xbf16>
      %c0_64 = arith.constant 0 : index
      %c0_65 = arith.constant 0 : index
      %c0_66 = arith.constant 0 : index
      %62 = vector.load %arg8[%c0_64, %c0_65, %c0_66] : memref<18x18x32xbf16, #tpu.memory_space<vmem>>, vector<18x1x32xbf16>
      tpu.vector_store %arg8[%c0_64, %c0_65, %c0_66], %61 {strides = array<i32>} : memref<18x18x32xbf16, #tpu.memory_space<vmem>>, vector<18x1x32xbf16>,
      %cst_67 = arith.constant 0.000000e+00 : bf16
      %63 = vector.broadcast %cst_67 : bf16 to vector<18x1x32xbf16>
      %c0_68 = arith.constant 0 : index
      %c17_69 = arith.constant 17 : index
      %c0_70 = arith.constant 0 : index
      %64 = vector.load %arg8[%c0_68, %c17_69, %c0_70] : memref<18x18x32xbf16, #tpu.memory_space<vmem>>, vector<18x1x32xbf16>
      tpu.vector_store %arg8[%c0_68, %c17_69, %c0_70], %63 {strides = array<i32>} : memref<18x18x32xbf16, #tpu.memory_space<vmem>>, vector<18x1x32xbf16>,
      %c0_71 = arith.constant 0 : index
      %c0_72 = arith.constant 0 : index
      %c0_73 = arith.constant 0 : index
      %c0_74 = arith.constant 0 : index
      %65 = vector.load %arg3[%c0_71, %c0_72, %c0_73, %c0_74] : memref<1x16x16x32xbf16, #tpu.memory_space<vmem>>, vector<1x16x16x32xbf16>
      %66 = vector.shape_cast %65 : vector<1x16x16x32xbf16> to vector<16x16x32xbf16>
      %c1_75 = arith.constant 1 : index
      %c1_76 = arith.constant 1 : index
      %c0_77 = arith.constant 0 : index
      %67 = vector.load %arg8[%c1_75, %c1_76, %c0_77] : memref<18x18x32xbf16, #tpu.memory_space<vmem>>, vector<16x16x32xbf16>
      tpu.vector_store %arg8[%c1_75, %c1_76, %c0_77], %66 {strides = array<i32>} : memref<18x18x32xbf16, #tpu.memory_space<vmem>>, vector<16x16x32xbf16>,
      %cst_78 = arith.constant 0.000000e+00 : bf16
      %68 = vector.broadcast %cst_78 : bf16 to vector<16x16x1152xbf16>
      %c0_79 = arith.constant 0 : index
      %c0_80 = arith.constant 0 : index
      %c0_81 = arith.constant 0 : index
      %69 = vector.load %arg9[%c0_79, %c0_80, %c0_81] : memref<16x16x1152xbf16, #tpu.memory_space<vmem>>, vector<16x16x1152xbf16>
      tpu.vector_store %arg9[%c0_79, %c0_80, %c0_81], %68 {strides = array<i32>} : memref<16x16x1152xbf16, #tpu.memory_space<vmem>>, vector<16x16x1152xbf16>,
    } else {
    }
    %c16_i32 = arith.constant 16 : i32
    %3 = arith.muli %arg2, %c16_i32 : i32
    %c0_i32_1 = arith.constant 0 : i32
    %4 = arith.addi %3, %c0_i32_1 : i32
    %5 = arith.index_cast %4 : i32 to index
    %c0 = arith.constant 0 : index
    %c0_2 = arith.constant 0 : index
    %6 = vector.load %arg8[%5, %c0, %c0_2] : memref<18x18x32xbf16, #tpu.memory_space<vmem>>, vector<16x16x32xbf16>
    %c0_3 = arith.constant 0 : index
    %c0_4 = arith.constant 0 : index
    %c0_5 = arith.constant 0 : index
    %7 = vector.load %arg9[%c0_3, %c0_4, %c0_5] : memref<16x16x1152xbf16, #tpu.memory_space<vmem>>, vector<16x16x32xbf16>
    tpu.vector_store %arg9[%c0_3, %c0_4, %c0_5], %6 {strides = array<i32>} : memref<16x16x1152xbf16, #tpu.memory_space<vmem>>, vector<16x16x32xbf16>,
    %c0_i32_6 = arith.constant 0 : i32
    %8 = arith.addi %3, %c0_i32_6 : i32
    %9 = arith.index_cast %8 : i32 to index
    %c1 = arith.constant 1 : index
    %c0_7 = arith.constant 0 : index
    %10 = vector.load %arg8[%9, %c1, %c0_7] : memref<18x18x32xbf16, #tpu.memory_space<vmem>>, vector<16x16x32xbf16>
    %c0_8 = arith.constant 0 : index
    %c0_9 = arith.constant 0 : index
    %c128 = arith.constant 128 : index
    %11 = vector.load %arg9[%c0_8, %c0_9, %c128] : memref<16x16x1152xbf16, #tpu.memory_space<vmem>>, vector<16x16x32xbf16>
    tpu.vector_store %arg9[%c0_8, %c0_9, %c128], %10 {strides = array<i32>} : memref<16x16x1152xbf16, #tpu.memory_space<vmem>>, vector<16x16x32xbf16>,
    %c0_i32_10 = arith.constant 0 : i32
    %12 = arith.addi %3, %c0_i32_10 : i32
    %13 = arith.index_cast %12 : i32 to index
    %c2 = arith.constant 2 : index
    %c0_11 = arith.constant 0 : index
    %14 = vector.load %arg8[%13, %c2, %c0_11] : memref<18x18x32xbf16, #tpu.memory_space<vmem>>, vector<16x16x32xbf16>
    %c0_12 = arith.constant 0 : index
    %c0_13 = arith.constant 0 : index
    %c256 = arith.constant 256 : index
    %15 = vector.load %arg9[%c0_12, %c0_13, %c256] : memref<16x16x1152xbf16, #tpu.memory_space<vmem>>, vector<16x16x32xbf16>
    tpu.vector_store %arg9[%c0_12, %c0_13, %c256], %14 {strides = array<i32>} : memref<16x16x1152xbf16, #tpu.memory_space<vmem>>, vector<16x16x32xbf16>,
    %c1_i32 = arith.constant 1 : i32
    %16 = arith.addi %3, %c1_i32 : i32
    %17 = arith.index_cast %16 : i32 to index
    %c0_14 = arith.constant 0 : index
    %c0_15 = arith.constant 0 : index
    %18 = vector.load %arg8[%17, %c0_14, %c0_15] : memref<18x18x32xbf16, #tpu.memory_space<vmem>>, vector<16x16x32xbf16>
    %c0_16 = arith.constant 0 : index
    %c0_17 = arith.constant 0 : index
    %c384 = arith.constant 384 : index
    %19 = vector.load %arg9[%c0_16, %c0_17, %c384] : memref<16x16x1152xbf16, #tpu.memory_space<vmem>>, vector<16x16x32xbf16>
    tpu.vector_store %arg9[%c0_16, %c0_17, %c384], %18 {strides = array<i32>} : memref<16x16x1152xbf16, #tpu.memory_space<vmem>>, vector<16x16x32xbf16>,
    %c1_i32_18 = arith.constant 1 : i32
    %20 = arith.addi %3, %c1_i32_18 : i32
    %21 = arith.index_cast %20 : i32 to index
    %c1_19 = arith.constant 1 : index
    %c0_20 = arith.constant 0 : index
    %22 = vector.load %arg8[%21, %c1_19, %c0_20] : memref<18x18x32xbf16, #tpu.memory_space<vmem>>, vector<16x16x32xbf16>
    %c0_21 = arith.constant 0 : index
    %c0_22 = arith.constant 0 : index
    %c512 = arith.constant 512 : index
    %23 = vector.load %arg9[%c0_21, %c0_22, %c512] : memref<16x16x1152xbf16, #tpu.memory_space<vmem>>, vector<16x16x32xbf16>
    tpu.vector_store %arg9[%c0_21, %c0_22, %c512], %22 {strides = array<i32>} : memref<16x16x1152xbf16, #tpu.memory_space<vmem>>, vector<16x16x32xbf16>,
    %c1_i32_23 = arith.constant 1 : i32
    %24 = arith.addi %3, %c1_i32_23 : i32
    %25 = arith.index_cast %24 : i32 to index
    %c2_24 = arith.constant 2 : index
    %c0_25 = arith.constant 0 : index
    %26 = vector.load %arg8[%25, %c2_24, %c0_25] : memref<18x18x32xbf16, #tpu.memory_space<vmem>>, vector<16x16x32xbf16>
    %c0_26 = arith.constant 0 : index
    %c0_27 = arith.constant 0 : index
    %c640 = arith.constant 640 : index
    %27 = vector.load %arg9[%c0_26, %c0_27, %c640] : memref<16x16x1152xbf16, #tpu.memory_space<vmem>>, vector<16x16x32xbf16>
    tpu.vector_store %arg9[%c0_26, %c0_27, %c640], %26 {strides = array<i32>} : memref<16x16x1152xbf16, #tpu.memory_space<vmem>>, vector<16x16x32xbf16>,
    %c2_i32 = arith.constant 2 : i32
    %28 = arith.addi %3, %c2_i32 : i32
    %29 = arith.index_cast %28 : i32 to index
    %c0_28 = arith.constant 0 : index
    %c0_29 = arith.constant 0 : index
    %30 = vector.load %arg8[%29, %c0_28, %c0_29] : memref<18x18x32xbf16, #tpu.memory_space<vmem>>, vector<16x16x32xbf16>
    %c0_30 = arith.constant 0 : index
    %c0_31 = arith.constant 0 : index
    %c768 = arith.constant 768 : index
    %31 = vector.load %arg9[%c0_30, %c0_31, %c768] : memref<16x16x1152xbf16, #tpu.memory_space<vmem>>, vector<16x16x32xbf16>
    tpu.vector_store %arg9[%c0_30, %c0_31, %c768], %30 {strides = array<i32>} : memref<16x16x1152xbf16, #tpu.memory_space<vmem>>, vector<16x16x32xbf16>,
    %c2_i32_32 = arith.constant 2 : i32
    %32 = arith.addi %3, %c2_i32_32 : i32
    %33 = arith.index_cast %32 : i32 to index
    %c1_33 = arith.constant 1 : index
    %c0_34 = arith.constant 0 : index
    %34 = vector.load %arg8[%33, %c1_33, %c0_34] : memref<18x18x32xbf16, #tpu.memory_space<vmem>>, vector<16x16x32xbf16>
    %c0_35 = arith.constant 0 : index
    %c0_36 = arith.constant 0 : index
    %c896 = arith.constant 896 : index
    %35 = vector.load %arg9[%c0_35, %c0_36, %c896] : memref<16x16x1152xbf16, #tpu.memory_space<vmem>>, vector<16x16x32xbf16>
    tpu.vector_store %arg9[%c0_35, %c0_36, %c896], %34 {strides = array<i32>} : memref<16x16x1152xbf16, #tpu.memory_space<vmem>>, vector<16x16x32xbf16>,
    %c2_i32_37 = arith.constant 2 : i32
    %36 = arith.addi %3, %c2_i32_37 : i32
    %37 = arith.index_cast %36 : i32 to index
    %c2_38 = arith.constant 2 : index
    %c0_39 = arith.constant 0 : index
    %38 = vector.load %arg8[%37, %c2_38, %c0_39] : memref<18x18x32xbf16, #tpu.memory_space<vmem>>, vector<16x16x32xbf16>
    %c0_40 = arith.constant 0 : index
    %c0_41 = arith.constant 0 : index
    %c1024 = arith.constant 1024 : index
    %39 = vector.load %arg9[%c0_40, %c0_41, %c1024] : memref<16x16x1152xbf16, #tpu.memory_space<vmem>>, vector<16x16x32xbf16>
    tpu.vector_store %arg9[%c0_40, %c0_41, %c1024], %38 {strides = array<i32>} : memref<16x16x1152xbf16, #tpu.memory_space<vmem>>, vector<16x16x32xbf16>,
    %c0_42 = arith.constant 0 : index
    %c0_43 = arith.constant 0 : index
    %c0_44 = arith.constant 0 : index
    %40 = vector.load %arg9[%c0_42, %c0_43, %c0_44] : memref<16x16x1152xbf16, #tpu.memory_space<vmem>>, vector<16x16x1152xbf16>
    %41 = vector.shape_cast %40 : vector<16x16x1152xbf16> to vector<256x1152xbf16>
    %c0_45 = arith.constant 0 : index
    %c0_46 = arith.constant 0 : index
    %42 = vector.load %arg4[%c0_45, %c0_46] : memref<1152x128xbf16, #tpu.memory_space<vmem>>, vector<1152x128xbf16>
    %cst = arith.constant dense<0.000000e+00> : vector<256x128xf32>
    %43 = tpu.matmul %41, %42, %cst {dimension_numbers = #tpu.dot_dimension_numbers<[1], [0], [0], [1], [0, 0, 1, 1], [], []>} : vector<256x1152xbf16>, vector<1152x128xbf16>, vector<256x128xf32> -> vector<256x128xf32>
    %c0_47 = arith.constant 0 : index
    %c0_48 = arith.constant 0 : index
    %44 = vector.load %arg5[%c0_47, %c0_48] : memref<1x128xf32, #tpu.memory_space<vmem>>, vector<1x128xf32>
    %45 = vector.broadcast %44 : vector<1x128xf32> to vector<256x128xf32>
    %46 = arith.mulf %43, %45 : vector<256x128xf32>
    %c0_49 = arith.constant 0 : index
    %c0_50 = arith.constant 0 : index
    %47 = vector.load %arg6[%c0_49, %c0_50] : memref<1x128xf32, #tpu.memory_space<vmem>>, vector<1x128xf32>
    %48 = vector.broadcast %47 : vector<1x128xf32> to vector<256x128xf32>
    %49 = arith.addf %46, %48 : vector<256x128xf32>
    %cst_51 = arith.constant 0.000000e+00 : f32
    %50 = vector.broadcast %cst_51 : f32 to vector<256x128xf32>
    %51 = arith.maximumf %49, %50 : vector<256x128xf32>
    %52 = vector.shape_cast %51 : vector<256x128xf32> to vector<16x16x128xf32>
    %53 = arith.truncf %52 : vector<16x16x128xf32> to vector<16x16x128xbf16>
    %c0_52 = arith.constant 0 : index
    %c0_53 = arith.constant 0 : index
    %c0_54 = arith.constant 0 : index
    %c0_55 = arith.constant 0 : index
    %54 = vector.load %arg7[%c0_52, %c0_53, %c0_54, %c0_55] : memref<1x16x16x128xbf16, #tpu.memory_space<vmem>>, vector<1x16x16x128xbf16>
    %55 = vector.shape_cast %54 : vector<1x16x16x128xbf16> to vector<16x16x128xbf16>
    %56 = vector.shape_cast %53 : vector<16x16x128xbf16> to vector<1x16x16x128xbf16>
    tpu.vector_store %arg7[%c0_52, %c0_53, %c0_54, %c0_55], %56 {strides = array<i32>} : memref<1x16x16x128xbf16, #tpu.memory_space<vmem>>, vector<1x16x16x128xbf16>,
    return
  }
  func.func @transform_0(%arg0: i32, %arg1: i32, %arg2: i32) -> (i32, i32, i32, i32) {
    %c0_i32 = arith.constant 0 : i32
    %c0_i32_0 = arith.constant 0 : i32
    %c0_i32_1 = arith.constant 0 : i32
    %c0_i32_2 = arith.constant 0 : i32
    return %arg1, %c0_i32, %c0_i32_0, %c0_i32_1 : i32, i32, i32, i32
  }
  func.func @transform_1(%arg0: i32, %arg1: i32, %arg2: i32) -> (i32, i32) {
    %c0_i32 = arith.constant 0 : i32
    %c0_i32_0 = arith.constant 0 : i32
    return %c0_i32, %arg0 : i32, i32
  }
  func.func @transform_2(%arg0: i32, %arg1: i32, %arg2: i32) -> (i32, i32) {
    %c0_i32 = arith.constant 0 : i32
    %c0_i32_0 = arith.constant 0 : i32
    return %c0_i32, %arg0 : i32, i32
  }
  func.func @transform_3(%arg0: i32, %arg1: i32, %arg2: i32) -> (i32, i32) {
    %c0_i32 = arith.constant 0 : i32
    %c0_i32_0 = arith.constant 0 : i32
    return %c0_i32, %arg0 : i32, i32
  }
  func.func @transform_4(%arg0: i32, %arg1: i32, %arg2: i32) -> (i32, i32, i32, i32) {
    %c0_i32 = arith.constant 0 : i32
    %c0_i32_0 = arith.constant 0 : i32
    return %arg1, %arg2, %c0_i32, %arg0 : i32, i32, i32, i32
  }
}

</mosaic_0001>

<bundles_post_ra>
// kernel: tpu_custom_call.1
= control target key start
LH: loop header
LB: loop body
LE: loop exit
PB: predicated region body
PF: predicated region fallthrough
CT: control target
= control target key end

     0   :  { %9 = vsyncpa [#allocation5], 0  ;;  %s8600_s0 = inlined_call_operand.hbm [shape: bf16[2,16,16,32], index: 0, kind: input, shape index: {}]   ;;  %s8601_s1 = inlined_call_operand.hbm [shape: bf16[1152,128], index: 1, kind: input, shape index: {}]   ;;  %s8602_s2 = inlined_call_operand.vmem [shape: f32[1,128], index: 2, kind: input, shape index: {}]   ;;  %s8603_s3 = inlined_call_operand.vmem [shape: f32[1,128], index: 3, kind: input, shape index: {}]   ;;  %s8604_s4 = inlined_call_operand.hbm [shape: bf16[2,16,16,128], index: 4, kind: output, shape index: {}]  }
   0x1   :  { %11 = vsyncpa [#allocation5 + $0x1], 0 }
   0x2   :  { %12 = vsyncpa [#allocation8], 0 }
   0x3   :  { %13 = vsyncpa [#allocation6], 0 }
   0x4   :  { %15 = vsyncpa [#allocation6 + $0x1], 0  ;;  %s7247_s15 = smov 0   ;;  %s7249_s16 = smov 0  }
   0x5   :  { %s7251_s17 = smov 0   ;;  %s7253_s18 = smov 0  }
   0x6   :  { %s7255_s19 = smov 0   ;;  %s7257_s20 = smov 0  }
   0x7 LB: > { %s5392_s21 = sadd.s32 4294967295, %s7212_s20   ;;  %s5393_s22 = sadd.s32 4294967294, %s7212_s20   ;;  %s7212_s20 = sphi %s7257_s20, %s21_s20   ;;  %s7208_s19 = sphi %s7255_s19, %s8636_s19   ;;  %s7204_s18 = sphi %s7253_s18, %s8635_s18   ;;  %s7200_s17 = sphi %s7251_s17, %s8634_s17   ;;  %s7196_s16 = sphi %s7249_s16, %s8633_s16   ;;  %s7192_s15 = sphi %s7247_s15, %s8632_s15  }
   0x8   : > { %p60_p0 = scmp.ne.s32.totalorder %s7196_s16, %s7192_s15  ;;  %p7281_p1 = scmp.eq.s32.totalorder %s5392_s21, 0 }
   0x9   : > { %p7285_p2 = scmp.eq.s32.totalorder %s5392_s21, 1  ;;  %p172_p3 = scmp.eq.s32.totalorder %s5393_s22, 1 }
   0xa   : > { %s8609_s23 = scalar_select %p7281_p1, 1, 0 }
   0xb   : > { %s8610_s24 = scalar_select %p7285_p2, 1, 0 }
   0xc   : > { %p7291_p4 = por %p7281_p1, %p60_p0  ;;  %p5394_p5 = scmp.ge.s32.totalorder %s7212_s20, 1 }
   0xd   : > { %p7296_p6 = por %p172_p3, %p60_p0  ;;  %p179_p7 = scmp.lt.s32.totalorder %s7212_s20, 3 }
   0xe   : > { %s8611_s25 = scalar_select %p7291_p4, 1, 0 }
   0xf   : > { %s8612_s26 = scalar_select %p7296_p6, 1, 0 }
  0x10   : > { %p7301_p8 = pnand %p5394_p5, %p179_p7  ;;  %s7214_s28 = smov [#allocation7]  }
  0x11   : > { %s193_s29 = sshll.u32 %s7214_s28, 4  ;;  %s36_s5 = sadd.s32 1, %s7208_s19  ;;  %s194_s29 = int_to_ptr.vmem [resolvable:$true] %s193_s29 }
  0x12   : > { %s8613_s27 = scalar_select %p7301_p8, 1, 0 }
  0x13   : > { %p6686_p9 = pneg %p7301_p8  ;;  %s7068_s8 = scalar_lea.hbm %s8601_s1, 9216 }
  0x14   : > { %p7069_p12 = scmp.ne.s32.totalorder %s8601_s1, %s7068_s8  ;;  %p7075_p5 = scmp.lt.u32.totalorder %s7068_s8, %s8601_s1 }
  0x15   : > { %p7310_p11 = pnand %p6686_p9, %p7281_p1 }
  0x17   : > { %p7070_p13 = pneg %p7310_p11 }
  0x19   : > { %p7071_p0 = pnand %p7070_p13, %p7069_p12 }
  0x1b   : > { %p7072_p3 = pneg %p7071_p0 }
  0x1d   : > { %p7077_p7 = pnand %p7075_p5, %p7072_p3 }
  0x1f   : > { %7080 = shalt.err (!%p7077_p7)
}
  0x20   : > { %s7081_s13 = scalar_lea.vmem %s194_s29, 9216  ;;  %p7089_p1 = scmp.lt.s32.totalorder %s194_s29, %s194_s29 }
  0x21   : > { %p7082_p9 = scmp.ne.s32.totalorder %s194_s29, %s7081_s13  ;;  %p7090_p4 = scmp.lt.s32.totalorder %s7081_s13, %s7081_s13 }
  0x23   : > { %p7084_p10 = pnand %p7082_p9, %p7070_p13  ;;  %p7091_p8 = por %p7090_p4, %p7089_p1 }
  0x25   : > { %p7085_p6 = pneg %p7084_p10 }
  0x27   : > { %p7092_p2 = pnand %p7091_p8, %p7085_p6 }
  0x29   : > { %7095 = shalt.err (!%p7092_p2)
}
  0x2a   : > { %s7215_s14 = smov 64   ;;  %s7216_s21 = smov 4  }
  0x2b   : > { %6689 = dma.hbm_to_vmem [thread:$0]  (!%p7310_p11), %s8601_s1, 9216, %s194_s29, [#allocation8], %s7215_s14, %s7215_s14, %s7216_s21  }
  0x2c   : > { %p38_p1 = scmp.ge.s32.totalorder %s36_s5, 2  ;;  %s47_s6 = sadd.s32 1, %s7200_s17 }
  0x2d   : > { %p54_p2 = scmp.ne.s32.totalorder %s7200_s17, %s7196_s16  ;;  %p55_p4 = scmp.eq.s32.totalorder %s7212_s20, 0 }
  0x2e   : > { %s8638_s5 = smov (%p38_p1, %s36_s5), 0  ;;  %p8616_p8 = scmp.ne.s32.totalorder %s8610_s24, 0 }
  0x2f   : > { %p7340_p6 = por %p55_p4, %p54_p2  ;;  %s44_s8 = ssub.s32 %s7208_s19, %s8638_s5 }
  0x30   : > { %p7346_p10 = por %p8616_p8, %p54_p2  ;;  %p6699_p12 = scmp.lt.s32.totalorder %s7212_s20, 2 }
  0x31   : > { %p45_p11 = scmp.eq.s32.totalorder %s44_s8, 0  ;;  %s219_s29 = sand.u32 1, %s7200_s17  }
  0x32   : > { %s5399_s9 = sshll.u32 %s219_s29, 7  ;;  %s6013_s11 = sshll.u32 %s7208_s19, 11 }
  0x33   : > { %s7355_s10 = scalar_select %p45_p11, %s7200_s17, %s47_s6  }
  0x34   : > { %s7361_s22 = scalar_lea.hbm %s8600_s0, %s6013_s11  ;;  %s223_s24 = scalar_lea.vmem [#allocation4], %s5399_s9 }
  0x35   : > { %s230_s28 = sshll.u32 %s223_s24, 4  ;;  %p7367_p13 = pnand %p6699_p12, %p7340_p6  ;;  %s7363_s28 = int_to_ptr.vmem [resolvable:$true] %s230_s28 }
  0x36   : > { %s7371_s6 = scalar_lea.sflag [#allocation5], %s219_s29  ;;  %s7096_s12 = scalar_lea.hbm %s7361_s22, 2048 }
  0x37   : > { %p7097_p0 = scmp.ne.s32.totalorder %s7361_s22, %s7096_s12  ;;  %p7098_p3 = pneg %p7367_p13 }
  0x38   : > { %s7101_s7 = scalar_lea.hbm %s8600_s0, 4096  ;;  %p7102_p9 = scmp.lt.u32.totalorder %s7361_s22, %s8600_s0 }
  0x39   : > { %p7099_p5 = pnand %p7098_p3, %p7097_p0  ;;  %p7103_p1 = scmp.lt.u32.totalorder %s7101_s7, %s7096_s12 }
  0x3a   : > { %p7105_p4 = scmp.lt.u32.totalorder %s7096_s12, %s7361_s22 }
  0x3b   : > { %p7100_p7 = pneg %p7099_p5  ;;  %p7104_p2 = por %p7103_p1, %p7102_p9 }
  0x3d   : > { %p7106_p6 = por %p7105_p4, %p7104_p2 }
  0x3f   : > { %p7107_p8 = pnand %p7106_p6, %p7100_p7 }
  0x41   : > { %7110 = shalt.err (!%p7107_p8)
}
  0x42   : > { %s7111_s29 = scalar_lea.vmem %s7363_s28, 2048  ;;  %s7217_s9 = smov [#allocation4]  }
  0x43   : > { %p7112_p12 = scmp.ne.s32.totalorder %s7363_s28, %s7111_s29  ;;  %s7116_s11 = sshll.u32 %s7217_s9, 4  ;;  %s7117_s11 = int_to_ptr.vmem [resolvable:$false] %s7116_s11 }
  0x44   : > { %s7118_s13 = scalar_lea.vmem %s7117_s11, 4096  ;;  %p7119_p5 = scmp.lt.s32.totalorder %s7363_s28, %s7117_s11 }
  0x45   : > { %p7114_p11 = pnand %p7112_p12, %p7098_p3  ;;  %p7120_p9 = scmp.lt.s32.totalorder %s7118_s13, %s7111_s29 }
  0x47   : > { %p7115_p0 = pneg %p7114_p11  ;;  %p7121_p1 = por %p7120_p9, %p7119_p5 }
  0x49   : > { %p7122_p2 = pnand %p7121_p1, %p7115_p0 }
  0x4b   : > { %7125 = shalt.err (!%p7122_p2)
}
  0x4c   : > { %6693 = dma.hbm_to_vmem [thread:$0]  (!%p7367_p13), %s7361_s22, 2048, %s7363_s28, %s7371_s6, %s7215_s14, %s7215_s14, %s7216_s21  }
  0x4d   : > { %p8619_p3 = scmp.ne.s32.totalorder %s8613_s27, 0 }
  0x4e   : > { %s7405_s12 = sand.u32 (!%p8619_p3), 1, %s7196_s16   ;;  %p8620_p7 = scmp.ne.s32.totalorder (!%p8619_p3), %s8611_s25, 0 }
  0x4f   : > { %242 = sbr.rel (%p8619_p3) target bundleno = 797 (0x31d), region = 36  ;;  %s5403_s7 = sshll.u32 (!%p8619_p3), %s7405_s12, 7 }
  0x50   : > { %s245_s24 = scalar_lea.sflag (!%p8619_p3), [#allocation5], %s7405_s12  ;;  %s7411_s8 = scalar_lea.vmem (!%p8619_p3), [#allocation4], %s5403_s7 }
  0x56   : > { %7179 = dma.done.wait (%p8620_p7), %s245_s24, 2048  }
  0x57   : > { %7181 = vsyncadd (%p8620_p7), %s245_s24, 4294965248  ;;  %p8621_p13 = scmp.ne.s32.totalorder %s8609_s23, 0 }
  0x59   : > { %7183 = dma.done.wait (%p8621_p13), [#allocation8], 9216  }
  0x5a   : > { %7185 = vsyncadd (%p8621_p13), [#allocation8], 4294958080  ;;  %vm295_vm0 = vcmask 257024   ;;  %vm298_vm1 = vcmask 253952   ;;  %v7218_v0 = vmov 0   ;;  %v6756_v1 = vld [vmem:[#allocation7 + $0x40] sm:$0xff]  }
  0x5b   : > { %296 = vst.msk [vmem:[#allocation2] sm:$0xf] %vm295_vm0, %v7218_v0  ;;  %297 = vst.msk [vmem:[#allocation2 + $0x4] sm:$0xf] %vm295_vm0, %v7218_v0  ;;  %v6757_v2 = vld [vmem:[#allocation7] sm:$0xff]   ;;  %6142 = vmatprep.subr.bf16.mxu0 %v6756_v1  ;;  %6662 = vmatprep.subr.bf16.mxu1 %v6756_v1  ;;  %v6758_v3 = vld [vmem:[#allocation7 + $0x48] sm:$0xff]  }
  0x5c   : > { %299 = vst.msk [vmem:[#allocation2 + $0x8] sm:$0x1] %vm298_vm1, %v7218_v0  ;;  %887 = vst [vmem:[#allocation3 + $0x8] sm:$0xff] %v7218_v0  ;;  %6143 = vmatpush3.bf16.msra.mxu0 %v6757_v2  ;;  %6670 = vmatpush3.bf16.msra.mxu1 %v6757_v2  ;;  %v6759_v4 = vld [vmem:[#allocation7 + $0x8] sm:$0xff]   ;;  %v6760_v5 = vld [vmem:[#allocation7 + $0x50] sm:$0xff]   ;;  %vm1162_vm10 = vcmask 261120  }
  0x5d   : > { %301 = vst.msk [vmem:[#allocation2 + $0xcc] sm:$0xf] %vm295_vm0, %v7218_v0  ;;  %302 = vst.msk [vmem:[#allocation2 + $0xd0] sm:$0xf] %vm295_vm0, %v7218_v0  ;;  %6144 = vmatprep.subr.bf16.mxu0 %v6758_v3  ;;  %6663 = vmatprep.subr.bf16.mxu1 %v6758_v3  ;;  %vm305_vm2 = vsmask.f32 256 }
  0x5e   : > { %303 = vst.msk [vmem:[#allocation2 + $0xd4] sm:$0x1] %vm298_vm1, %v7218_v0  ;;  %886 = vst [vmem:[#allocation3] sm:$0xff] %v7218_v0  ;;  %v6761_v6 = vld [vmem:[#allocation7 + $0x10] sm:$0xff]   ;;  %v6762_v7 = vld [vmem:[#allocation7 + $0x58] sm:$0xff]   ;;  %vm1756_vm11 = vcmask 1046528  }
  0x5f   : > { %888 = vst [vmem:[#allocation3 + $0x10] sm:$0xff] %v7218_v0  ;;  %889 = vst [vmem:[#allocation3 + $0x18] sm:$0xff] %v7218_v0  ;;  %vm361_vm4 = vsmask.f32 7938  ;;  %v6763_v9 = vld [vmem:[#allocation7 + $0x18] sm:$0xff]   ;;  %v6764_v10 = vld [vmem:[#allocation7 + $0x60] sm:$0xff]  }
  0x60   : > { %890 = vst [vmem:[#allocation3 + $0x20] sm:$0xff] %v7218_v0  ;;  %891 = vst [vmem:[#allocation3 + $0x28] sm:$0xff] %v7218_v0  ;;  %6145 = vmatpush3.bf16.msra.mxu0 %v6759_v4  ;;  %6671 = vmatpush3.bf16.msra.mxu1 %v6759_v4  ;;  %vm449_vm6 = vsmask.f32 4368  ;;  %v6765_v12 = vld [vmem:[#allocation7 + $0x20] sm:$0xff]   ;;  %v6766_v13 = vld [vmem:[#allocation7 + $0x68] sm:$0xff]  }
  0x61   : > { %892 = vst [vmem:[#allocation3 + $0x30] sm:$0xff] %v7218_v0  ;;  %893 = vst [vmem:[#allocation3 + $0x38] sm:$0xff] %v7218_v0  ;;  %6146 = vmatprep.subr.bf16.mxu0 %v6760_v5  ;;  %6664 = vmatprep.subr.bf16.mxu1 %v6760_v5  ;;  %v343_v18 = vld [vmem:[#allocation2 + $0x90] sm:$0x1]  ;;  %v6767_v19 = vld [vmem:[#allocation7 + $0x28] sm:$0xff]   ;;  %s8442_s21 = scalar_lea.vmem [#allocation9], %s5403_s7 }
  0x62   : > { %894 = vst [vmem:[#allocation3 + $0x40] sm:$0xff] %v7218_v0  ;;  %895 = vst [vmem:[#allocation3 + $0x48] sm:$0xff] %v7218_v0  ;;  %v307_v14 = vld [vmem:[#allocation2] sm:$0x1]  ;;  %v399_v21 = vld [vmem:[#allocation2 + $0x98] sm:$0x1] }
  0x63   : > { %896 = vst [vmem:[#allocation3 + $0x50] sm:$0xff] %v7218_v0  ;;  %897 = vst [vmem:[#allocation3 + $0x58] sm:$0xff] %v7218_v0  ;;  %v363_v15 = vld [vmem:[#allocation2 + $0x8] sm:$0x1]  ;;  %v439_v22 = vld [vmem:[%s7411_s8 + $0x58] sm:$0xf] }
  0x64   : > { %898 = vst [vmem:[#allocation3 + $0x60] sm:$0xff] %v7218_v0  ;;  %899 = vst [vmem:[#allocation3 + $0x68] sm:$0xff] %v7218_v0  ;;  %6147 = vmatpush3.bf16.msra.mxu0 %v6761_v6  ;;  %6672 = vmatpush3.bf16.msra.mxu1 %v6761_v6  ;;  %v6768_v23 = vld [vmem:[#allocation7 + $0x70] sm:$0xff]   ;;  %v440_v25 = vld [vmem:[%s7411_s8 + $0x5c] sm:$0xf]  ;;  %v639_v26 = vshrl.u32 %v439_v22, 16 }
  0x65   : > { %900 = vst [vmem:[#allocation3 + $0x70] sm:$0xff] %v7218_v0  ;;  %901 = vst [vmem:[#allocation3 + $0x78] sm:$0xff] %v7218_v0  ;;  %6148 = vmatprep.subr.bf16.mxu0 %v6762_v7  ;;  %6665 = vmatprep.subr.bf16.mxu1 %v6762_v7  ;;  %v642_v27 = vshll.u32 %v439_v22, 16  ;;  %v647_v28 = vshrl.u32 %v440_v25, 16  ;;  %v650_v29 = vshll.u32 %v440_v25, 16  ;;  %v6769_v34 = vld [vmem:[#allocation7 + $0x30] sm:$0xff]  }
  0x66   : > { %902 = vst [vmem:[#allocation3 + $0x80] sm:$0xff] %v7218_v0  ;;  %903 = vst [vmem:[#allocation3 + $0x88] sm:$0xff] %v7218_v0  ;;  %v641_v31 = vrot.slane %v639_v26, 7  ;;  %vm1355_vm8 = vsmask.f32 7424  ;;  %v6770_v36 = vld [vmem:[#allocation7 + $0x78] sm:$0xff]  }
  0x67   : > { %904 = vst [vmem:[#allocation3 + $0x90] sm:$0xff] %v7218_v0  ;;  %905 = vst [vmem:[#allocation3 + $0x98] sm:$0xff] %v7218_v0  ;;  %v649_v33 = vrot.slane %v647_v28, 7  ;;  %v6771_v40 = vld [vmem:[#allocation7 + $0x38] sm:$0xff]   ;;  %v6777_v45 = vld [vmem:[#allocation7 + $0xc0] sm:$0xff]   ;;  %s6046_s22 = sshll.u32 %s7204_s18, 11 }
  0x68   : > { %906 = vst [vmem:[#allocation3 + $0xa0] sm:$0xff] %v7218_v0  ;;  %907 = vst [vmem:[#allocation3 + $0xa8] sm:$0xff] %v7218_v0  ;;  %6149 = vmatpush3.bf16.msra.mxu0 %v6763_v9  ;;  %6673 = vmatpush3.bf16.msra.mxu1 %v6763_v9  ;;  %v645_v35 = vrot.slane %v641_v31, 4  ;;  %v644_v37 = vor.u32 %v642_v27, %v641_v31  ;;  %v6781_v53 = vld [vmem:[#allocation7 + $0x140] sm:$0xff]   ;;  %v310_v55 = vld [vmem:[#allocation2 + $0xc] sm:$0x1]  ;;  %s8548_s9 = scalar_lea.hbm %s8604_s4, %s6046_s22 }
  0x69   : > { %908 = vst [vmem:[#allocation3 + $0xb0] sm:$0xff] %v7218_v0  ;;  %909 = vst [vmem:[#allocation3 + $0xb8] sm:$0xff] %v7218_v0  ;;  %6150 = vmatprep.subr.bf16.mxu0 %v6764_v10  ;;  %6666 = vmatprep.subr.bf16.mxu1 %v6764_v10  ;;  %v652_v38 = vor.u32 %v650_v29, %v649_v33  ;;  %v654_v39 = vrot.slane %v649_v33, 4  ;;  %v366_v56 = vld [vmem:[#allocation2 + $0x14] sm:$0x1]  ;;  %v6783_v26 = vld [vmem:[#allocation7 + $0x100] sm:$0xff]  }
  0x6a   : > { %910 = vst [vmem:[#allocation3 + $0xc0] sm:$0xff] %v7218_v0  ;;  %911 = vst [vmem:[#allocation3 + $0xc8] sm:$0xff] %v7218_v0  ;;  %v417_v60 = vld [vmem:[%s7411_s8] sm:$0xf]  ;;  %v418_v62 = vld [vmem:[%s7411_s8 + $0x4] sm:$0xf] }
  0x6b   : > { %912 = vst [vmem:[#allocation3 + $0xd0] sm:$0xff] %v7218_v0  ;;  %913 = vst [vmem:[#allocation3 + $0xd8] sm:$0xff] %v7218_v0  ;;  %v452_v63 = vshrl.u32 %v417_v60, 16  ;;  %v346_v1 = vld [vmem:[#allocation2 + $0x9c] sm:$0x1]  ;;  %v460_v2 = vshrl.u32 %v418_v62, 16 }
  0x6c   : > { %914 = vst [vmem:[#allocation3 + $0xe0] sm:$0xff] %v7218_v0  ;;  %915 = vst [vmem:[#allocation3 + $0xe8] sm:$0xff] %v7218_v0  ;;  %6151 = vmatpush3.bf16.msra.mxu0 %v6765_v12  ;;  %6674 = vmatpush3.bf16.msra.mxu1 %v6765_v12  ;;  %v463_v3 = vshll.u32 %v418_v62, 16  ;;  %v402_v5 = vld [vmem:[#allocation2 + $0xa4] sm:$0x1]  ;;  %s5258_s28 = sshll.u32 %s8442_s21, 4  ;;  %s8550_s28 = int_to_ptr.vmem [resolvable:$true] %s5258_s28 }
  0x6d   : > { %916 = vst [vmem:[#allocation3 + $0xf0] sm:$0xff] %v7218_v0  ;;  %917 = vst [vmem:[#allocation3 + $0xf8] sm:$0xff] %v7218_v0  ;;  %6152 = vmatprep.subr.bf16.mxu0 %v6766_v13  ;;  %6667 = vmatprep.subr.bf16.mxu1 %v6766_v13  ;;  %v454_v7 = vrot.slane %v452_v63, 7  ;;  %v441_v10 = vld [vmem:[%s7411_s8 + $0x60] sm:$0xf]  ;;  %v462_v13 = vrot.slane %v460_v2, 7 }
  0x6e   : > { %918 = vst [vmem:[#allocation3 + $0x100] sm:$0xff] %v7218_v0  ;;  %919 = vst [vmem:[#allocation3 + $0x108] sm:$0xff] %v7218_v0  ;;  %v442_v12 = vld [vmem:[%s7411_s8 + $0x64] sm:$0xf]  ;;  %s5241_s11 = scalar_lea.sflag [#allocation6], %s7405_s12  ;;  %s7126_s13 = scalar_lea.vmem %s8550_s28, 2048 }
  0x6f   : > { %920 = vst [vmem:[#allocation3 + $0x110] sm:$0xff] %v7218_v0  ;;  %921 = vst [vmem:[#allocation3 + $0x118] sm:$0xff] %v7218_v0  ;;  %p7127_p4 = scmp.ne.s32.totalorder %s8550_s28, %s7126_s13  ;;  %s7219_s18 = smov [#allocation9]  }
  0x70   : > { %922 = vst [vmem:[#allocation3 + $0x120] sm:$0xff] %v7218_v0  ;;  %923 = vst [vmem:[#allocation3 + $0x128] sm:$0xff] %v7218_v0  ;;  %6153 = vmatpush3.bf16.msra.mxu0 %v6767_v19  ;;  %6675 = vmatpush3.bf16.msra.mxu1 %v6767_v19  ;;  %s7130_s7 = sshll.u32 %s7219_s18, 4  ;;  %s7131_s7 = int_to_ptr.vmem [resolvable:$false] %s7130_s7 }
  0x71   : > { %924 = vst [vmem:[#allocation3 + $0x130] sm:$0xff] %v7218_v0  ;;  %925 = vst [vmem:[#allocation3 + $0x138] sm:$0xff] %v7218_v0  ;;  %6154 = vmatprep.subr.bf16.mxu0 %v6768_v23  ;;  %6668 = vmatprep.subr.bf16.mxu1 %v6768_v23  ;;  %p7128_p6 = pnand %p7127_p4, %p7346_p10  ;;  %s7132_s24 = scalar_lea.vmem %s7131_s7, 4096 }
  0x72   : > { %926 = vst [vmem:[#allocation3 + $0x140] sm:$0xff] %v7218_v0  ;;  %927 = vst [vmem:[#allocation3 + $0x148] sm:$0xff] %v7218_v0  ;;  %p7133_p12 = scmp.lt.s32.totalorder %s8550_s28, %s7131_s7  ;;  %p7134_p11 = scmp.lt.s32.totalorder %s7132_s24, %s7126_s13 }
  0x73   : > { %928 = vst [vmem:[#allocation3 + $0x150] sm:$0xff] %v7218_v0  ;;  %929 = vst [vmem:[#allocation3 + $0x158] sm:$0xff] %v7218_v0  ;;  %p7129_p8 = pneg %p7128_p6 }
  0x74   : > { %930 = vst [vmem:[#allocation3 + $0x160] sm:$0xff] %v7218_v0  ;;  %931 = vst [vmem:[#allocation3 + $0x168] sm:$0xff] %v7218_v0  ;;  %6155 = vmatpush3.bf16.msra.mxu0 %v6769_v34  ;;  %6676 = vmatpush3.bf16.msra.mxu1 %v6769_v34  ;;  %p7135_p0 = por %p7134_p11, %p7133_p12 }
  0x75   : > { %932 = vst [vmem:[#allocation3 + $0x170] sm:$0xff] %v7218_v0  ;;  %933 = vst [vmem:[#allocation3 + $0x178] sm:$0xff] %v7218_v0  ;;  %6156 = vmatprep.subr.bf16.mxu0 %v6770_v36  ;;  %6669 = vmatprep.subr.bf16.mxu1 %v6770_v36 }
  0x76   : > { %934 = vst [vmem:[#allocation3 + $0x180] sm:$0xff] %v7218_v0  ;;  %935 = vst [vmem:[#allocation3 + $0x188] sm:$0xff] %v7218_v0  ;;  %p7136_p5 = pnand %p7135_p0, %p7129_p8 }
  0x77   : > { %936 = vst [vmem:[#allocation3 + $0x190] sm:$0xff] %v7218_v0  ;;  %937 = vst [vmem:[#allocation3 + $0x198] sm:$0xff] %v7218_v0 }
  0x78   : > { %938 = vst [vmem:[#allocation3 + $0x1a0] sm:$0xff] %v7218_v0  ;;  %939 = vst [vmem:[#allocation3 + $0x1a8] sm:$0xff] %v7218_v0  ;;  %6157 = vmatpush3.bf16.msra.mxu0 %v6771_v40  ;;  %6677 = vmatpush3.bf16.msra.mxu1 %v6771_v40 }
  0x79   : > { %940 = vst [vmem:[#allocation3 + $0x1b0] sm:$0xff] %v7218_v0  ;;  %941 = vst [vmem:[#allocation3 + $0x1b8] sm:$0xff] %v7218_v0  ;;  %6254 = vmatprep.subr.bf16.mxu1 %v6777_v45  ;;  %6366 = vmatprep.subr.bf16.mxu0 %v6781_v53 }
  0x7a   : > { %942 = vst [vmem:[#allocation3 + $0x1c0] sm:$0xff] %v7218_v0  ;;  %943 = vst [vmem:[#allocation3 + $0x1c8] sm:$0xff] %v7218_v0 }
  0x7b   : > { %944 = vst [vmem:[#allocation3 + $0x1d0] sm:$0xff] %v7218_v0  ;;  %945 = vst [vmem:[#allocation3 + $0x1d8] sm:$0xff] %v7218_v0 }
  0x7c   : > { %946 = vst [vmem:[#allocation3 + $0x1e0] sm:$0xff] %v7218_v0  ;;  %947 = vst [vmem:[#allocation3 + $0x1e8] sm:$0xff] %v7218_v0 }
  0x7d   : > { %948 = vst [vmem:[#allocation3 + $0x1f0] sm:$0xff] %v7218_v0  ;;  %949 = vst [vmem:[#allocation3 + $0x1f8] sm:$0xff] %v7218_v0 }
  0x7e   : > { %950 = vst [vmem:[#allocation3 + $0x200] sm:$0xff] %v7218_v0  ;;  %951 = vst [vmem:[#allocation3 + $0x208] sm:$0xff] %v7218_v0 }
  0x7f   : > { %952 = vst [vmem:[#allocation3 + $0x210] sm:$0xff] %v7218_v0  ;;  %953 = vst [vmem:[#allocation3 + $0x218] sm:$0xff] %v7218_v0 }
  0x80   : > { %954 = vst [vmem:[#allocation3 + $0x220] sm:$0xff] %v7218_v0  ;;  %955 = vst [vmem:[#allocation3 + $0x228] sm:$0xff] %v7218_v0 }
  0x81   : > { %956 = vst [vmem:[#allocation3 + $0x230] sm:$0xff] %v7218_v0  ;;  %957 = vst [vmem:[#allocation3 + $0x238] sm:$0xff] %v7218_v0 }
  0x82   : > { %958 = vst [vmem:[#allocation3 + $0x240] sm:$0xff] %v7218_v0  ;;  %959 = vst [vmem:[#allocation3 + $0x248] sm:$0xff] %v7218_v0 }
  0x83   : > { %960 = vst [vmem:[#allocation3 + $0x250] sm:$0xff] %v7218_v0  ;;  %961 = vst [vmem:[#allocation3 + $0x258] sm:$0xff] %v7218_v0 }
  0x84   : > { %962 = vst [vmem:[#allocation3 + $0x260] sm:$0xff] %v7218_v0  ;;  %963 = vst [vmem:[#allocation3 + $0x268] sm:$0xff] %v7218_v0 }
  0x85   : > { %964 = vst [vmem:[#allocation3 + $0x270] sm:$0xff] %v7218_v0  ;;  %965 = vst [vmem:[#allocation3 + $0x278] sm:$0xff] %v7218_v0 }
  0x86   : > { %966 = vst [vmem:[#allocation3 + $0x280] sm:$0xff] %v7218_v0  ;;  %967 = vst [vmem:[#allocation3 + $0x288] sm:$0xff] %v7218_v0 }
  0x87   : > { %968 = vst [vmem:[#allocation3 + $0x290] sm:$0xff] %v7218_v0  ;;  %969 = vst [vmem:[#allocation3 + $0x298] sm:$0xff] %v7218_v0 }
  0x88   : > { %970 = vst [vmem:[#allocation3 + $0x2a0] sm:$0xff] %v7218_v0  ;;  %971 = vst [vmem:[#allocation3 + $0x2a8] sm:$0xff] %v7218_v0 }
  0x89   : > { %972 = vst [vmem:[#allocation3 + $0x2b0] sm:$0xff] %v7218_v0  ;;  %973 = vst [vmem:[#allocation3 + $0x2b8] sm:$0xff] %v7218_v0 }
  0x8a   : > { %974 = vst [vmem:[#allocation3 + $0x2c0] sm:$0xff] %v7218_v0  ;;  %975 = vst [vmem:[#allocation3 + $0x2c8] sm:$0xff] %v7218_v0 }
  0x8b   : > { %976 = vst [vmem:[#allocation3 + $0x2d0] sm:$0xff] %v7218_v0  ;;  %977 = vst [vmem:[#allocation3 + $0x2d8] sm:$0xff] %v7218_v0 }
  0x8c   : > { %978 = vst [vmem:[#allocation3 + $0x2e0] sm:$0xff] %v7218_v0  ;;  %979 = vst [vmem:[#allocation3 + $0x2e8] sm:$0xff] %v7218_v0 }
  0x8d   : > { %980 = vst [vmem:[#allocation3 + $0x2f0] sm:$0xff] %v7218_v0  ;;  %981 = vst [vmem:[#allocation3 + $0x2f8] sm:$0xff] %v7218_v0 }
  0x8e   : > { %982 = vst [vmem:[#allocation3 + $0x300] sm:$0xff] %v7218_v0  ;;  %983 = vst [vmem:[#allocation3 + $0x308] sm:$0xff] %v7218_v0 }
  0x8f   : > { %984 = vst [vmem:[#allocation3 + $0x310] sm:$0xff] %v7218_v0  ;;  %985 = vst [vmem:[#allocation3 + $0x318] sm:$0xff] %v7218_v0 }
  0x90   : > { %986 = vst [vmem:[#allocation3 + $0x320] sm:$0xff] %v7218_v0  ;;  %987 = vst [vmem:[#allocation3 + $0x328] sm:$0xff] %v7218_v0 }
  0x91   : > { %988 = vst [vmem:[#allocation3 + $0x330] sm:$0xff] %v7218_v0  ;;  %989 = vst [vmem:[#allocation3 + $0x338] sm:$0xff] %v7218_v0 }
  0x92   : > { %990 = vst [vmem:[#allocation3 + $0x340] sm:$0xff] %v7218_v0  ;;  %991 = vst [vmem:[#allocation3 + $0x348] sm:$0xff] %v7218_v0 }
  0x93   : > { %992 = vst [vmem:[#allocation3 + $0x350] sm:$0xff] %v7218_v0  ;;  %993 = vst [vmem:[#allocation3 + $0x358] sm:$0xff] %v7218_v0 }
  0x94   : > { %994 = vst [vmem:[#allocation3 + $0x360] sm:$0xff] %v7218_v0  ;;  %995 = vst [vmem:[#allocation3 + $0x368] sm:$0xff] %v7218_v0 }
  0x95   : > { %996 = vst [vmem:[#allocation3 + $0x370] sm:$0xff] %v7218_v0  ;;  %997 = vst [vmem:[#allocation3 + $0x378] sm:$0xff] %v7218_v0 }
  0x96   : > { %998 = vst [vmem:[#allocation3 + $0x380] sm:$0xff] %v7218_v0  ;;  %999 = vst [vmem:[#allocation3 + $0x388] sm:$0xff] %v7218_v0 }
  0x97   : > { %1000 = vst [vmem:[#allocation3 + $0x390] sm:$0xff] %v7218_v0  ;;  %1001 = vst [vmem:[#allocation3 + $0x398] sm:$0xff] %v7218_v0 }
  0x98   : > { %1002 = vst [vmem:[#allocation3 + $0x3a0] sm:$0xff] %v7218_v0  ;;  %1003 = vst [vmem:[#allocation3 + $0x3a8] sm:$0xff] %v7218_v0 }
  0x99   : > { %1004 = vst [vmem:[#allocation3 + $0x3b0] sm:$0xff] %v7218_v0  ;;  %1005 = vst [vmem:[#allocation3 + $0x3b8] sm:$0xff] %v7218_v0 }
  0x9a   : > { %1006 = vst [vmem:[#allocation3 + $0x3c0] sm:$0xff] %v7218_v0  ;;  %1007 = vst [vmem:[#allocation3 + $0x3c8] sm:$0xff] %v7218_v0 }
  0x9b   : > { %1008 = vst [vmem:[#allocation3 + $0x3d0] sm:$0xff] %v7218_v0  ;;  %1009 = vst [vmem:[#allocation3 + $0x3d8] sm:$0xff] %v7218_v0 }
  0x9c   : > { %1010 = vst [vmem:[#allocation3 + $0x3e0] sm:$0xff] %v7218_v0  ;;  %1011 = vst [vmem:[#allocation3 + $0x3e8] sm:$0xff] %v7218_v0 }
  0x9d   : > { %1012 = vst [vmem:[#allocation3 + $0x3f0] sm:$0xff] %v7218_v0  ;;  %1013 = vst [vmem:[#allocation3 + $0x3f8] sm:$0xff] %v7218_v0 }
  0x9e   : > { %1014 = vst [vmem:[#allocation3 + $0x400] sm:$0xff] %v7218_v0  ;;  %1015 = vst [vmem:[#allocation3 + $0x408] sm:$0xff] %v7218_v0 }
  0x9f   : > { %1016 = vst [vmem:[#allocation3 + $0x410] sm:$0xff] %v7218_v0  ;;  %1017 = vst [vmem:[#allocation3 + $0x418] sm:$0xff] %v7218_v0 }
  0xa0   : > { %1018 = vst [vmem:[#allocation3 + $0x420] sm:$0xff] %v7218_v0  ;;  %1019 = vst [vmem:[#allocation3 + $0x428] sm:$0xff] %v7218_v0 }
  0xa1   : > { %1020 = vst [vmem:[#allocation3 + $0x430] sm:$0xff] %v7218_v0  ;;  %1021 = vst [vmem:[#allocation3 + $0x438] sm:$0xff] %v7218_v0 }
  0xa2   : > { %1022 = vst [vmem:[#allocation3 + $0x440] sm:$0xff] %v7218_v0  ;;  %1023 = vst [vmem:[#allocation3 + $0x448] sm:$0xff] %v7218_v0 }
  0xa3   : > { %1024 = vst [vmem:[#allocation3 + $0x450] sm:$0xff] %v7218_v0  ;;  %1025 = vst [vmem:[#allocation3 + $0x458] sm:$0xff] %v7218_v0 }
  0xa4   : > { %1026 = vst [vmem:[#allocation3 + $0x460] sm:$0xff] %v7218_v0  ;;  %1027 = vst [vmem:[#allocation3 + $0x468] sm:$0xff] %v7218_v0 }
  0xa5   : > { %1028 = vst [vmem:[#allocation3 + $0x470] sm:$0xff] %v7218_v0  ;;  %1029 = vst [vmem:[#allocation3 + $0x478] sm:$0xff] %v7218_v0  ;;  %v455_v0 = vshll.u32 %v417_v60, 16 }
  0xa6   : > { %vm7579_vm3 = vmand %vm298_vm1, %vm305_vm2 }
  0xa7   : > { %vm7585_vm5 = vmand %vm298_vm1, %vm361_vm4  ;;  %v308_v16 = vsel %vm7579_vm3, 0, %v307_v14  ;;  %v344_v20 = vsel %vm7579_vm3, 0, %v343_v18  ;;  %v311_v58 = vsel %vm7579_vm3, 0, %v310_v55  ;;  %v347_v4 = vsel %vm7579_vm3, 0, %v346_v1  ;;  %v369_v55 = vld [vmem:[#allocation2 + $0x20] sm:$0x1] }
  0xa8   : > { %v364_v17 = vsel %vm7585_vm5, 0, %v363_v15  ;;  %309 = vst [vmem:[#allocation2] sm:$0x1] %v308_v16  ;;  %345 = vst [vmem:[#allocation2 + $0x90] sm:$0x1] %v344_v20  ;;  %v400_v24 = vsel %vm7585_vm5, 0, %v399_v21  ;;  %v457_v15 = vor.u32 %v455_v0, %v454_v7  ;;  %v465_v20 = vor.u32 %v463_v3, %v462_v13 }
  0xa9   : > { %365 = vst [vmem:[#allocation2 + $0x8] sm:$0x1] %v364_v17  ;;  %401 = vst [vmem:[#allocation2 + $0x98] sm:$0x1] %v400_v24  ;;  %v367_v59 = vsel %vm7585_vm5, 0, %v366_v56  ;;  %v403_v9 = vsel %vm7585_vm5, 0, %v402_v5 }
  0xaa   : > { %vm7601_vm7 = vmand %vm295_vm0, %vm361_vm4  ;;  %312 = vst [vmem:[#allocation2 + $0xc] sm:$0x1] %v311_v58  ;;  %v656_v14 = vshrl.u32 %v441_v10, 16  ;;  %v458_v16 = vrot.slane %v454_v7, 4  ;;  %v659_v17 = vshll.u32 %v441_v10, 16  ;;  %v664_v18 = vshrl.u32 %v442_v12, 16 }
  0xab   : > { %vm7607_vm9 = vmor %vm305_vm2, %vm449_vm6  ;;  %368 = vst [vmem:[#allocation2 + $0x14] sm:$0x1] %v367_v59  ;;  %v467_v21 = vrot.slane %v462_v13, 4  ;;  %v419_v56 = vld [vmem:[%s7411_s8 + $0x8] sm:$0xf]  ;;  %v370_v58 = vsel %vm7585_vm5, 0, %v369_v55 }
  0xac   : > { %v653_v44 = vsel %vm7607_vm9, %v645_v35, %v652_v38  ;;  %348 = vst [vmem:[#allocation2 + $0x9c] sm:$0x1] %v347_v4  ;;  %404 = vst [vmem:[#allocation2 + $0xa4] sm:$0x1] %v403_v9  ;;  %v466_v27 = vsel %vm7607_vm9, %v458_v16, %v465_v20  ;;  %v658_v35 = vrot.slane %v656_v14, 7  ;;  %v666_v38 = vrot.slane %v664_v18, 7 }
  0xad   : > { %854 = vst.msk [vmem:[#allocation2 + $0x94] sm:$0xf] %vm295_vm0, %v653_v44  ;;  %777 = vst.msk [vmem:[#allocation2 + $0x10] sm:$0xf] %vm295_vm0, %v466_v27  ;;  %v420_v59 = vld [vmem:[%s7411_s8 + $0xc] sm:$0xf] }
  0xae   : > { %v662_v44 = vrot.slane %v658_v35, 4  ;;  %v469_v60 = vshrl.u32 %v419_v56, 16  ;;  %371 = vst [vmem:[#allocation2 + $0x20] sm:$0x1] %v370_v58  ;;  %v477_v62 = vshrl.u32 %v420_v59, 16  ;;  %v6779_v4 = vld [vmem:[#allocation7 + $0x80] sm:$0xff]  }
  0xaf   : > { %v6772_v41 = vld [vmem:[#allocation2] sm:$0xff]   ;;  %v851_v48 = vld [vmem:[#allocation2 + $0x90] sm:$0xf]  ;;  %v349_v9 = vld [vmem:[#allocation2 + $0xa8] sm:$0x1] }
  0xb0   : > { %v6773_v42 = vld [vmem:[#allocation2 + $0x8] ss:$0 sps:$4 sm:$0x11]   ;;  %v6774_v43 = vld [vmem:[#allocation2] sm:$0xff]   ;;  %v1357_v46 = vshrl.u32 %v6772_v41, 16  ;;  %v1359_v47 = vshll.u32 %v6772_v41, 16  ;;  %v852_v51 = vsel %vm7601_vm7, %v644_v37, %v851_v48 }
  0xb1   : > { %v855_v49 = vld [vmem:[#allocation2 + $0x98] sm:$0x1]  ;;  %v1364_v50 = vshll.u32 %v6773_v42, 16  ;;  %1163 = vst.msk [vmem:[#allocation3] sm:$0xff] %vm1162_vm10, %v6774_v43  ;;  %853 = vst [vmem:[#allocation2 + $0x90] sm:$0xf] %v852_v51  ;;  %v661_v43 = vor.u32 %v659_v17, %v658_v35 }
  0xb2   : > { %v856_v52 = vsel %vm7579_vm3, %v654_v39, %v855_v49  ;;  %v1361_v54 = vrot.slane %v1359_v47, 1  ;;  %v774_v28 = vld [vmem:[#allocation2 + $0xc] sm:$0xf]  ;;  %v778_v29 = vld [vmem:[#allocation2 + $0x14] sm:$0x1]  ;;  %v667_v39 = vshll.u32 %v442_v12, 16 }
  0xb3   : > { %857 = vst [vmem:[#allocation2 + $0x98] sm:$0x1] %v856_v52  ;;  %v1366_v57 = vrot.slane %v1364_v50, 1  ;;  %v775_v33 = vsel %vm7601_vm7, %v457_v15, %v774_v28  ;;  %v779_v34 = vsel %vm7579_vm3, %v467_v21, %v778_v29  ;;  %v858_v40 = vld [vmem:[#allocation2 + $0x9c] sm:$0xf]  ;;  %v671_v49 = vrot.slane %v666_v38, 4 }
  0xb4   : > { %v1362_v61 = vor.u32 %v1361_v54, %v1357_v46  ;;  %776 = vst [vmem:[#allocation2 + $0xc] sm:$0xf] %v775_v33  ;;  %780 = vst [vmem:[#allocation2 + $0x14] sm:$0x1] %v779_v34  ;;  %v862_v45 = vld [vmem:[#allocation2 + $0xa4] sm:$0x1]  ;;  %v669_v48 = vor.u32 %v667_v39, %v666_v38  ;;  %v859_v50 = vsel %vm7601_vm7, %v661_v43, %v858_v40 }
  0xb5   : > { %v6800_v46 = vld [vmem:[#allocation7 + $0x148] sm:$0xff]   ;;  %860 = vst [vmem:[#allocation2 + $0x9c] sm:$0xf] %v859_v50  ;;  %v863_v53 = vsel %vm7579_vm3, %v671_v49, %v862_v45  ;;  %v313_v54 = vld [vmem:[#allocation2 + $0x18] sm:$0x1]  ;;  %v471_v0 = vrot.slane %v469_v60, 7 }
  0xb6   : > { %v1367_v6 = vsel %vm1355_vm8, %v1362_v61, %v1366_v57  ;;  %v670_v52 = vsel %vm7607_vm9, %v662_v44, %v669_v48  ;;  %864 = vst [vmem:[#allocation2 + $0xa4] sm:$0x1] %v863_v53  ;;  %v314_v57 = vsel %vm7579_vm3, 0, %v313_v54  ;;  %v472_v61 = vshll.u32 %v419_v56, 16  ;;  %v6803_v10 = vld [vmem:[#allocation7 + $0x108] sm:$0xff]   ;;  %v6789_v39 = vld [vmem:[#allocation7 + $0xd0] sm:$0xff]  }
  0xb7   : > { %1564 = vst.msk [vmem:[#allocation3 + $0x8] sm:$0xff] %vm1162_vm10, %v1367_v6  ;;  %315 = vst [vmem:[#allocation2 + $0x18] sm:$0x1] %v314_v57  ;;  %v475_v7 = vrot.slane %v471_v0, 4  ;;  %v6780_v12 = vld [vmem:[#allocation7 + $0xc8] sm:$0xff]   ;;  %v479_v14 = vrot.slane %v477_v62, 7 }
  0xb8   : > { %v6775_v19 = vld [vmem:[#allocation2 + $0x90] sm:$0xff]   ;;  %v3445_v36 = vld [vmem:[#allocation3] sm:$0xff]  ;;  %861 = vst.msk [vmem:[#allocation2 + $0xa0] sm:$0xf] %vm295_vm0, %v670_v52  ;;  %v480_v15 = vshll.u32 %v420_v59, 16  ;;  %v350_v16 = vsel %vm7579_vm3, 0, %v349_v9 }
  0xb9   : > { %v6778_v23 = vld [vmem:[#allocation2 + $0x90] sm:$0xff]   ;;  %v1501_v24 = vshrl.u32 %v6775_v19, 16  ;;  %v1503_v25 = vshll.u32 %v6775_v19, 16  ;;  %351 = vst [vmem:[#allocation2 + $0xa8] sm:$0x1] %v350_v16  ;;  %v6791_v50 = vld [vmem:[#allocation7 + $0x90] sm:$0xff]  }
  0xba   : > { %v6776_v22 = vld [vmem:[#allocation2 + $0x98] ss:$0 sps:$4 sm:$0x11]   ;;  %1175 = vst.msk [vmem:[#allocation3 + $0x360] sm:$0xff] %vm1162_vm10, %v6778_v23  ;;  %v405_v17 = vld [vmem:[#allocation2 + $0xb0] sm:$0x1]  ;;  %v482_v23 = vor.u32 %v480_v15, %v479_v14 }
  0xbb   : > { %v1508_v31 = vshll.u32 %v6776_v22, 16  ;;  %v1505_v37 = vrot.slane %v1503_v25, 1  ;;  %v6784_v63 = vld [vmem:[#allocation2 + $0xc] sm:$0xff]   ;;  %v6785_v1 = vld [vmem:[#allocation2 + $0x14] ss:$0 sps:$4 sm:$0x11]   ;;  %v474_v22 = vor.u32 %v472_v61, %v471_v0 }
  0xbc   : > { %v6786_v2 = vld [vmem:[#allocation2 + $0xc] sm:$0xff]   ;;  %v1369_v5 = vshrl.u32 %v6784_v63, 16  ;;  %v1371_v6 = vshll.u32 %v6784_v63, 16  ;;  %v1376_v13 = vshll.u32 %v6785_v1, 16  ;;  %v406_v19 = vsel %vm7585_vm5, 0, %v405_v17  ;;  %v6804_v16 = vld [vmem:[#allocation7 + $0xe8] sm:$0xff]  }
  0xbd   : > { %v1510_v42 = vrot.slane %v1508_v31, 1  ;;  %v1506_v47 = vor.u32 %v1505_v37, %v1501_v24  ;;  %1164 = vst.msk [vmem:[#allocation3 + $0x48] sm:$0xff] %vm1162_vm10, %v6786_v2  ;;  %407 = vst [vmem:[#allocation2 + $0xb0] sm:$0x1] %v406_v19  ;;  %v6782_v24 = vld [vmem:[#allocation7 + $0x88] sm:$0xff]   ;;  %v483_v29 = vsel %vm7607_vm9, %v475_v7, %v482_v23  ;;  %v484_v31 = vrot.slane %v479_v14, 4 }
  0xbe   : > { %v3446_v41 = vld [vmem:[#allocation3 + $0x8] sm:$0xff]  ;;  %v1373_v18 = vrot.slane %v1371_v6, 1  ;;  %v1378_v21 = vrot.slane %v1376_v13, 1  ;;  %v781_v33 = vld [vmem:[#allocation2 + $0x18] sm:$0xf]  ;;  %v6792_v54 = vld [vmem:[#allocation7 + $0xd8] sm:$0xff]  }
  0xbf   : > { %4197 = vmatprep.mubr.bf16.mxu0 %v3446_v41  ;;  %v1511_v51 = vsel %vm1355_vm8, %v1506_v47, %v1510_v42  ;;  %v6788_v27 = vld [vmem:[#allocation2 + $0xa4] ss:$0 sps:$4 sm:$0x11]   ;;  %v6790_v28 = vld [vmem:[#allocation2 + $0x9c] sm:$0xff]   ;;  %784 = vst.msk [vmem:[#allocation2 + $0x1c] sm:$0xf] %vm295_vm0, %v483_v29  ;;  %v782_v41 = vsel %vm7601_vm7, %v474_v22, %v781_v33 }
  0xc0   : > { %4198 = vmatmul.mubr.bf16.vlgmr.msra.gmra.mrb[0].mxu0 %v3445_v36  ;;  %1576 = vst.msk [vmem:[#allocation3 + $0x368] sm:$0xff] %vm1162_vm10, %v1511_v51  ;;  %v1374_v25 = vor.u32 %v1373_v18, %v1369_v5  ;;  %v785_v34 = vld [vmem:[#allocation2 + $0x20] sm:$0x1]  ;;  %v1520_v38 = vshll.u32 %v6788_v27, 16  ;;  %1176 = vst.msk [vmem:[#allocation3 + $0x3a8] sm:$0xff] %vm1162_vm10, %v6790_v28  ;;  %v6793_v61 = vld [vmem:[#allocation7 + $0x98] sm:$0xff]  }
  0xc1   : > { %6367 = vmatpush3.bf16.msra.mxu0 %v6783_v26  ;;  %v3553_v3 = vld [vmem:[#allocation3 + $0x360] sm:$0xff]  ;;  %v443_v40 = vld [vmem:[%s7411_s8 + $0x68] sm:$0xf]  ;;  %v786_v42 = vsel %vm7579_vm3, %v484_v31, %v785_v34  ;;  %v444_v43 = vld [vmem:[%s7411_s8 + $0x6c] sm:$0xf] }
  0xc2   : > { %6368 = vmatprep.subr.bf16.mxu0 %v6800_v46  ;;  %v6787_v26 = vld [vmem:[#allocation2 + $0x9c] sm:$0xff]   ;;  %v1379_v35 = vsel %vm1355_vm8, %v1374_v25, %v1378_v21  ;;  %v673_v44 = vshrl.u32 %v443_v40, 16  ;;  %v676_v45 = vshll.u32 %v443_v40, 16  ;;  %v1522_v47 = vrot.slane %v1520_v38, 1  ;;  %783 = vst [vmem:[#allocation2 + $0x18] sm:$0xf] %v782_v41 }
  0xc3   : > { %v1513_v36 = vshrl.u32 %v6787_v26, 16  ;;  %v1515_v37 = vshll.u32 %v6787_v26, 16  ;;  %1565 = vst.msk [vmem:[#allocation3 + $0x50] sm:$0xff] %vm1162_vm10, %v1379_v35  ;;  %787 = vst [vmem:[#allocation2 + $0x20] sm:$0x1] %v786_v42  ;;  %v681_v48 = vshrl.u32 %v444_v43, 16 }
  0xc4   : > { %v684_v49 = vshll.u32 %v444_v43, 16  ;;  %v675_v51 = vrot.slane %v673_v44, 7  ;;  %v865_v52 = vld [vmem:[#allocation2 + $0xa8] sm:$0xf]  ;;  %v869_v56 = vld [vmem:[#allocation2 + $0xb0] sm:$0x1] }
  0xc5   : > { %6369 = vmatpush3.bf16.msra.mxu0 %v6803_v10  ;;  %v1517_v46 = vrot.slane %v1515_v37, 1  ;;  %v683_v55 = vrot.slane %v681_v48, 7  ;;  %v3454_v57 = vld [vmem:[#allocation3 + $0x48] sm:$0xff]  ;;  %v6815_v0 = vld [vmem:[#allocation7 + $0x150] sm:$0xff]   ;;  %v6799_v5 = vld [vmem:[#allocation7 + $0xe0] sm:$0xff]  }
  0xc6   : > { %v678_v58 = vor.u32 %v676_v45, %v675_v51  ;;  %v679_v59 = vrot.slane %v675_v51, 4  ;;  %6370 = vmatprep.subr.bf16.mxu0 %v6815_v0  ;;  %v6802_v13 = vld [vmem:[#allocation7 + $0xa0] sm:$0xff]   ;;  %v316_v17 = vld [vmem:[#allocation2 + $0x24] sm:$0x1]  ;;  %v421_v21 = vld [vmem:[%s7411_s8 + $0x10] sm:$0xf] }
  0xc7   : > { %v3554_v20 = vld [vmem:[#allocation3 + $0x368] sm:$0xff]  ;;  %v1518_v53 = vor.u32 %v1517_v46, %v1513_v36  ;;  %v686_v62 = vor.u32 %v684_v49, %v683_v55  ;;  %v688_v63 = vrot.slane %v683_v55, 4  ;;  %v317_v19 = vsel %vm7579_vm3, 0, %v316_v17  ;;  %v422_v25 = vld [vmem:[%s7411_s8 + $0x14] sm:$0xf]  ;;  %v6822_v17 = vld [vmem:[#allocation7 + $0x1c0] sm:$0xff]  }
  0xc8   : > { %4293 = vmatprep.mubr.bf16.mxu1 %v3554_v20  ;;  %v866_v1 = vsel %vm7601_vm7, %v678_v58, %v865_v52  ;;  %v3562_v14 = vld [vmem:[#allocation3 + $0x3a8] sm:$0xff]  ;;  %v372_v20 = vld [vmem:[#allocation2 + $0x2c] sm:$0x1]  ;;  %318 = vst [vmem:[#allocation2 + $0x24] sm:$0x1] %v317_v19  ;;  %v486_v26 = vshrl.u32 %v421_v21, 16 }
  0xc9   : > { %4294 = vmatmul.mubr.bf16.vlgmr.msra.gmra.mrb[0].mxu1 %v3553_v3  ;;  %v1523_v60 = vsel %vm1355_vm8, %v1518_v53, %v1522_v47  ;;  %v687_v3 = vsel %vm7607_vm9, %v679_v59, %v686_v62  ;;  %867 = vst [vmem:[#allocation2 + $0xa8] sm:$0xf] %v866_v1  ;;  %v6794_v6 = vld [vmem:[#allocation2 + $0x18] sm:$0xff]   ;;  %v6805_v28 = vld [vmem:[#allocation7 + $0xa8] sm:$0xff]   ;;  %v489_v29 = vshll.u32 %v421_v21, 16  ;;  %v494_v31 = vshrl.u32 %v422_v25, 16 }
  0xca   : > { %6255 = vmatpush3.bf16.msra.mxu1 %v6779_v4  ;;  %1577 = vst.msk [vmem:[#allocation3 + $0x3b0] sm:$0xff] %vm1162_vm10, %v1523_v60  ;;  %v3455_v2 = vld [vmem:[#allocation3 + $0x50] sm:$0xff]  ;;  %v870_v4 = vsel %vm7579_vm3, %v688_v63, %v869_v56  ;;  %v6795_v7 = vld [vmem:[#allocation2 + $0x20] ss:$0 sps:$4 sm:$0x11]   ;;  %v6796_v9 = vld [vmem:[#allocation2 + $0x18] sm:$0xff]  }
  0xcb   : > { %6256 = vmatprep.subr.bf16.mxu1 %v6780_v12  ;;  %4205 = vmatprep.mubr.bf16.mxu0 %v3455_v2  ;;  %868 = vst.msk [vmem:[#allocation2 + $0xac] sm:$0xf] %vm295_vm0, %v687_v3  ;;  %871 = vst [vmem:[#allocation2 + $0xb0] sm:$0x1] %v870_v4  ;;  %v1381_v10 = vshrl.u32 %v6794_v6, 16  ;;  %v1383_v12 = vshll.u32 %v6794_v6, 16 }
  0xcc   : > { %4206 = vmatmul.mubr.bf16.gmra.mrb[4].mxu0 %v3454_v57  ;;  %v1388_v15 = vshll.u32 %v6795_v7, 16  ;;  %1165 = vst.msk [vmem:[#allocation3 + $0x90] sm:$0xff] %vm1162_vm10, %v6796_v9  ;;  %v488_v34 = vrot.slane %v486_v26, 7  ;;  %v6811_v35 = vld [vmem:[#allocation7 + $0xf0] sm:$0xff]   ;;  %v352_v43 = vld [vmem:[#allocation2 + $0xb4] sm:$0x1] }
  0xcd   : > { %v1385_v18 = vrot.slane %v1383_v12, 1  ;;  %v6817_v44 = vld [vmem:[#allocation7 + $0x110] sm:$0xff]   ;;  %v496_v46 = vrot.slane %v494_v31, 7  ;;  %v497_v47 = vshll.u32 %v422_v25, 16  ;;  %v353_v48 = vsel %vm7579_vm3, 0, %v352_v43  ;;  %v6814_v59 = vld [vmem:[#allocation7 + $0xf8] sm:$0xff]  }
  0xce   : > { %6257 = vmatpush3.bf16.msra.mxu1 %v6782_v24  ;;  %v1390_v23 = vrot.slane %v1388_v15, 1  ;;  %v373_v24 = vsel %vm7585_vm5, 0, %v372_v20  ;;  %v491_v41 = vor.u32 %v489_v29, %v488_v34  ;;  %v492_v42 = vrot.slane %v488_v34, 4  ;;  %v6821_v49 = vld [vmem:[#allocation2 + $0xc] sm:$0xff]   ;;  %354 = vst [vmem:[#allocation2 + $0xb4] sm:$0x1] %v353_v48  ;;  %6371 = vmatpush3.bf16.msra.mxu0 %v6817_v44 }
  0xcf   : > { %6258 = vmatprep.subr.bf16.mxu1 %v6789_v39  ;;  %v1386_v27 = vor.u32 %v1385_v18, %v1381_v10  ;;  %374 = vst [vmem:[#allocation2 + $0x2c] sm:$0x1] %v373_v24  ;;  %v408_v51 = vld [vmem:[#allocation2 + $0xbc] sm:$0x1]  ;;  %v445_v52 = vld [vmem:[%s7411_s8 + $0x70] sm:$0xf]  ;;  %v499_v55 = vor.u32 %v497_v47, %v496_v46 }
  0xd0   : > { %v6813_v53 = vld [vmem:[#allocation7 + $0xb0] sm:$0xff]   ;;  %v501_v56 = vrot.slane %v496_v46, 4  ;;  %v788_v57 = vld [vmem:[#allocation2 + $0x24] sm:$0xf]  ;;  %v409_v58 = vsel %vm7585_vm5, 0, %v408_v51  ;;  %1969 = vst.msk [vmem:[#allocation3 + $0x18] sm:$0xff] %vm1162_vm10, %v6821_v49 }
  0xd1   : > { %v3563_v22 = vld [vmem:[#allocation3 + $0x3b0] sm:$0xff]  ;;  %v1391_v36 = vsel %vm1355_vm8, %v1386_v27, %v1390_v23  ;;  %v789_v62 = vsel %vm7601_vm7, %v491_v41, %v788_v57  ;;  %410 = vst [vmem:[#allocation2 + $0xbc] sm:$0x1] %v409_v58  ;;  %v690_v1 = vshrl.u32 %v445_v52, 16  ;;  %v693_v2 = vshll.u32 %v445_v52, 16  ;;  %v6816_v7 = vld [vmem:[#allocation7 + $0xb8] sm:$0xff]  }
  0xd2   : > { %6259 = vmatpush3.bf16.msra.mxu1 %v6791_v50  ;;  %4301 = vmatprep.mubr.bf16.mxu1 %v3563_v22  ;;  %v6797_v33 = vld [vmem:[#allocation2 + $0xa8] sm:$0xff]   ;;  %v6798_v37 = vld [vmem:[#allocation2 + $0xb0] ss:$0 sps:$4 sm:$0x11]   ;;  %1566 = vst.msk [vmem:[#allocation3 + $0x98] sm:$0xff] %vm1162_vm10, %v1391_v36  ;;  %v500_v3 = vsel %vm7607_vm9, %v492_v42, %v499_v55  ;;  %v6829_v12 = vld [vmem:[#allocation2 + $0x18] sm:$0xff]  }
  0xd3   : > { %6260 = vmatprep.subr.bf16.mxu1 %v6792_v54  ;;  %4302 = vmatmul.mubr.bf16.gmra.mrb[4].mxu1 %v3562_v14  ;;  %v6801_v38 = vld [vmem:[#allocation2 + $0xa8] sm:$0xff]   ;;  %v1525_v39 = vshrl.u32 %v6797_v33, 16  ;;  %v1527_v40 = vshll.u32 %v6797_v33, 16  ;;  %v1532_v45 = vshll.u32 %v6798_v37, 16  ;;  %790 = vst [vmem:[#allocation2 + $0x24] sm:$0xf] %v789_v62 }
  0xd4   : > { %1177 = vst.msk [vmem:[#allocation3 + $0x3f0] sm:$0xff] %vm1162_vm10, %v6801_v38  ;;  %v3463_v60 = vld [vmem:[#allocation3 + $0x90] sm:$0xff]  ;;  %v692_v10 = vrot.slane %v690_v1, 7  ;;  %1970 = vst.msk [vmem:[#allocation3 + $0x60] sm:$0xff] %vm1162_vm10, %v6829_v12  ;;  %v6830_v21 = vld [vmem:[#allocation7 + $0x158] sm:$0xff]  }
  0xd5   : > { %v1529_v50 = vrot.slane %v1527_v40, 1  ;;  %v1534_v54 = vrot.slane %v1532_v45, 1  ;;  %v446_v0 = vld [vmem:[%s7411_s8 + $0x74] sm:$0xf]  ;;  %791 = vst.msk [vmem:[#allocation2 + $0x28] sm:$0xf] %vm295_vm0, %v500_v3  ;;  %6372 = vmatprep.subr.bf16.mxu0 %v6830_v21 }
  0xd6   : > { %6261 = vmatpush3.bf16.msra.mxu1 %v6793_v61  ;;  %v792_v63 = vld [vmem:[#allocation2 + $0x2c] sm:$0x1]  ;;  %v701_v6 = vshll.u32 %v446_v0, 16  ;;  %v695_v15 = vor.u32 %v693_v2, %v692_v10  ;;  %v872_v20 = vld [vmem:[#allocation2 + $0xb4] sm:$0xf]  ;;  %v6958_v30 = vld [vmem:[#allocation2 + $0x18] sm:$0xff]  }
  0xd7   : > { %6262 = vmatprep.subr.bf16.mxu1 %v6799_v5  ;;  %v1530_v61 = vor.u32 %v1529_v50, %v1525_v39  ;;  %v793_v4 = vsel %vm7579_vm3, %v501_v56, %v792_v63  ;;  %v698_v5 = vshrl.u32 %v446_v0, 16  ;;  %v319_v26 = vld [vmem:[#allocation2 + $0x30] sm:$0x1]  ;;  %v375_v27 = vld [vmem:[#allocation2 + $0x38] sm:$0x1]  ;;  %2773 = vst.msk [vmem:[#allocation3 + $0x30] sm:$0xff] %vm1162_vm10, %v6958_v30 }
  0xd8   : > { %794 = vst [vmem:[#allocation2 + $0x2c] sm:$0x1] %v793_v4  ;;  %v873_v22 = vsel %vm7601_vm7, %v695_v15, %v872_v20  ;;  %v876_v25 = vld [vmem:[#allocation2 + $0xbc] sm:$0x1]  ;;  %v320_v29 = vsel %vm7579_vm3, 0, %v319_v26  ;;  %v376_v31 = vsel %vm7585_vm5, 0, %v375_v27 }
  0xd9   : > { %v1535_v9 = vsel %vm1355_vm8, %v1530_v61, %v1534_v54  ;;  %v700_v14 = vrot.slane %v698_v5, 7  ;;  %874 = vst [vmem:[#allocation2 + $0xb4] sm:$0xf] %v873_v22  ;;  %321 = vst [vmem:[#allocation2 + $0x30] sm:$0x1] %v320_v29  ;;  %v6833_v47 = vld [vmem:[#allocation7 + $0x118] sm:$0xff]  }
  0xda   : > { %6263 = vmatpush3.bf16.msra.mxu1 %v6802_v13  ;;  %v3464_v13 = vld [vmem:[#allocation3 + $0x98] sm:$0xff]  ;;  %1578 = vst.msk [vmem:[#allocation3 + $0x3f8] sm:$0xff] %vm1162_vm10, %v1535_v9  ;;  %377 = vst [vmem:[#allocation2 + $0x38] sm:$0x1] %v376_v31  ;;  %6373 = vmatpush3.bf16.msra.mxu0 %v6833_v47  ;;  %v6823_v9 = vld [vmem:[#allocation2] sm:$0xfe]  }
  0xdb   : > { %6264 = vmatprep.subr.bf16.mxu1 %v6804_v16  ;;  %4213 = vmatprep.mubr.bf16.mxu0 %v3464_v13  ;;  %v696_v16 = vrot.slane %v692_v10, 4  ;;  %v703_v18 = vor.u32 %v701_v6, %v700_v14  ;;  %v705_v19 = vrot.slane %v700_v14, 4  ;;  %v3571_v23 = vld [vmem:[#allocation3 + $0x3f0] sm:$0xff]  ;;  %v423_v39 = vld [vmem:[%s7411_s8 + $0x18] sm:$0xf]  ;;  %v1757_v14 = vrot.slane %v6823_v9, 1 }
  0xdc   : > { %4214 = vmatmul.mubr.bf16.gmra.mrb[8].mxu0 %v3463_v60  ;;  %v6806_v33 = vld [vmem:[#allocation2 + $0x24] sm:$0xff]   ;;  %v424_v41 = vld [vmem:[%s7411_s8 + $0x1c] sm:$0xf]  ;;  %v503_v42 = vshrl.u32 %v423_v39, 16  ;;  %v506_v43 = vshll.u32 %v423_v39, 16  ;;  %v6843_v22 = vld [vmem:[#allocation7 + $0x120] sm:$0xff]  }
  0xdd   : > { %v704_v24 = vsel %vm7607_vm9, %v696_v16, %v703_v18  ;;  %v1393_v36 = vshrl.u32 %v6806_v33, 16  ;;  %v1395_v37 = vshll.u32 %v6806_v33, 16  ;;  %v6808_v38 = vld [vmem:[#allocation2 + $0x24] sm:$0xff]   ;;  %v511_v45 = vshrl.u32 %v424_v41, 16  ;;  %v322_v15 = vld [vmem:[#allocation2 + $0x3c] sm:$0x1] }
  0xde   : > { %6265 = vmatpush3.bf16.msra.mxu1 %v6805_v28  ;;  %875 = vst.msk [vmem:[#allocation2 + $0xb8] sm:$0xf] %vm295_vm0, %v704_v24  ;;  %v877_v28 = vsel %vm7579_vm3, %v705_v19, %v876_v25  ;;  %v514_v46 = vshll.u32 %v424_v41, 16  ;;  %v505_v49 = vrot.slane %v503_v42, 7  ;;  %v6837_v61 = vld [vmem:[#allocation2 + $0x24] sm:$0xff]   ;;  %v323_v19 = vsel %vm7579_vm3, 0, %v322_v15 }
  0xdf   : > { %6266 = vmatprep.subr.bf16.mxu1 %v6811_v35  ;;  %878 = vst [vmem:[#allocation2 + $0xbc] sm:$0x1] %v877_v28  ;;  %v6807_v35 = vld [vmem:[#allocation2 + $0x2c] ss:$0 sps:$4 sm:$0x11]   ;;  %v1397_v44 = vrot.slane %v1395_v37, 1 }
  0xe0   : > { %v1400_v40 = vshll.u32 %v6807_v35, 16  ;;  %1166 = vst.msk [vmem:[#allocation3 + $0xd8] sm:$0xff] %vm1162_vm10, %v6808_v38  ;;  %v513_v52 = vrot.slane %v511_v45, 7  ;;  %v508_v55 = vor.u32 %v506_v43, %v505_v49  ;;  %v795_v60 = vld [vmem:[#allocation2 + $0x30] sm:$0xf]  ;;  %1971 = vst.msk [vmem:[#allocation3 + $0xa8] sm:$0xff] %vm1162_vm10, %v6837_v61 }
  0xe1   : > { %v3572_v34 = vld [vmem:[#allocation3 + $0x3f8] sm:$0xff]  ;;  %v1398_v50 = vor.u32 %v1397_v44, %v1393_v36  ;;  %v799_v2 = vld [vmem:[#allocation2 + $0x38] sm:$0x1]  ;;  %v6824_v12 = vld [vmem:[#allocation2 + $0x8] ss:$0 sps:$4 sm:$0x11]  }
  0xe2   : > { %6267 = vmatpush3.bf16.msra.mxu1 %v6813_v53  ;;  %4309 = vmatprep.mubr.bf16.mxu1 %v3572_v34  ;;  %v1402_v48 = vrot.slane %v1400_v40, 1  ;;  %v516_v63 = vor.u32 %v514_v46, %v513_v52  ;;  %v518_v0 = vrot.slane %v513_v52, 4  ;;  %v796_v1 = vsel %vm7601_vm7, %v508_v55, %v795_v60  ;;  %v378_v16 = vld [vmem:[#allocation2 + $0x44] sm:$0x1]  ;;  %v425_v21 = vld [vmem:[%s7411_s8 + $0x20] sm:$0xf] }
  0xe3   : > { %6268 = vmatprep.subr.bf16.mxu1 %v6814_v59  ;;  %4310 = vmatmul.mubr.bf16.gmra.mrb[8].mxu1 %v3571_v23  ;;  %v509_v59 = vrot.slane %v505_v49, 4  ;;  %797 = vst [vmem:[#allocation2 + $0x30] sm:$0xf] %v796_v1  ;;  %v1758_v18 = vrot.slane %v6824_v12, 1  ;;  %v379_v20 = vsel %vm7585_vm5, 0, %v378_v16  ;;  %v520_v25 = vshrl.u32 %v425_v21, 16 }
  0xe4   : > { %v1403_v56 = vsel %vm1355_vm8, %v1398_v50, %v1402_v48  ;;  %v800_v6 = vsel %vm7579_vm3, %v518_v0, %v799_v2  ;;  %324 = vst [vmem:[#allocation2 + $0x3c] sm:$0x1] %v323_v19  ;;  %380 = vst [vmem:[#allocation2 + $0x44] sm:$0x1] %v379_v20  ;;  %v426_v24 = vld [vmem:[%s7411_s8 + $0x24] sm:$0xf] }
  0xe5   : > { %v6809_v51 = vld [vmem:[#allocation2 + $0xb4] sm:$0xff]   ;;  %1567 = vst.msk [vmem:[#allocation3 + $0xe0] sm:$0xff] %vm1162_vm10, %v1403_v56  ;;  %v517_v5 = vsel %vm7607_vm9, %v509_v59, %v516_v63  ;;  %801 = vst [vmem:[#allocation2 + $0x38] sm:$0x1] %v800_v6  ;;  %v523_v26 = vshll.u32 %v425_v21, 16  ;;  %v1759_v27 = vsel %vm1756_vm11, %v1757_v14, %v1758_v18  ;;  %v528_v28 = vshrl.u32 %v426_v24, 16 }
  0xe6   : > { %6269 = vmatpush3.bf16.msra.mxu1 %v6816_v7  ;;  %v6810_v53 = vld [vmem:[#allocation2 + $0xbc] ss:$0 sps:$4 sm:$0x11]   ;;  %v6812_v54 = vld [vmem:[#allocation2 + $0xb4] sm:$0xff]   ;;  %v1537_v57 = vshrl.u32 %v6809_v51, 16  ;;  %v1539_v58 = vshll.u32 %v6809_v51, 16 }
  0xe7   : > { %6478 = vmatprep.subr.bf16.mxu1 %v6822_v17  ;;  %v1544_v62 = vshll.u32 %v6810_v53, 16  ;;  %1178 = vst.msk [vmem:[#allocation3 + $0x438] sm:$0xff] %vm1162_vm10, %v6812_v54  ;;  %v3472_v10 = vld [vmem:[#allocation3 + $0xd8] sm:$0xff]  ;;  %v6842_v17 = vld [vmem:[#allocation7 + $0x160] sm:$0xff]   ;;  %v531_v29 = vshll.u32 %v426_v24, 16  ;;  %1821 = vst.msk [vmem:[#allocation3 + $0x10] sm:$0xff] %vm1162_vm10, %v1759_v27 }
  0xe8   : > { %v1541_v3 = vrot.slane %v1539_v58, 1  ;;  %798 = vst.msk [vmem:[#allocation2 + $0x34] sm:$0xf] %vm295_vm0, %v517_v5  ;;  %6374 = vmatprep.subr.bf16.mxu0 %v6842_v17  ;;  %v522_v31 = vrot.slane %v520_v25, 7  ;;  %v530_v35 = vrot.slane %v528_v28, 7  ;;  %v3448_v38 = vld [vmem:[#allocation3 + $0x18] sm:$0xff] }
  0xe9   : > { %v1546_v4 = vrot.slane %v1544_v62, 1  ;;  %6375 = vmatpush3.bf16.msra.mxu0 %v6843_v22  ;;  %v6854_v48 = vld [vmem:[#allocation7 + $0x168] sm:$0xff]   ;;  %v6831_v58 = vld [vmem:[#allocation2 + $0xc] sm:$0xfe]   ;;  %v6825_v61 = vld [vmem:[#allocation7 + $0x180] sm:$0xff]  }
  0xea   : > { %v1542_v7 = vor.u32 %v1541_v3, %v1537_v57  ;;  %v525_v39 = vor.u32 %v523_v26, %v522_v31  ;;  %v526_v42 = vrot.slane %v522_v31, 4  ;;  %v533_v43 = vor.u32 %v531_v29, %v530_v35  ;;  %6376 = vmatprep.subr.bf16.mxu0 %v6854_v48  ;;  %v6858_v56 = vld [vmem:[#allocation7 + $0x128] sm:$0xff]   ;;  %v6832_v59 = vld [vmem:[#allocation2 + $0x14] ss:$0 sps:$4 sm:$0x11]   ;;  %v6866_v0 = vld [vmem:[#allocation7 + $0x170] sm:$0xff]  }
  0xeb   : > { %v535_v47 = vrot.slane %v530_v35, 4  ;;  %v802_v51 = vld [vmem:[#allocation2 + $0x3c] sm:$0xf]  ;;  %v806_v52 = vld [vmem:[#allocation2 + $0x44] sm:$0x1]  ;;  %v1760_v62 = vrot.slane %v6831_v58, 1 }
  0xec   : > { %v1547_v13 = vsel %vm1355_vm8, %v1542_v7, %v1546_v4  ;;  %v3473_v23 = vld [vmem:[#allocation3 + $0xe0] sm:$0xff]  ;;  %v534_v50 = vsel %vm7607_vm9, %v526_v42, %v533_v43  ;;  %v803_v54 = vsel %vm7601_vm7, %v525_v39, %v802_v51  ;;  %v325_v63 = vld [vmem:[#allocation2 + $0x48] sm:$0x1]  ;;  %v1761_v2 = vrot.slane %v6832_v59, 1  ;;  %v381_v4 = vld [vmem:[#allocation2 + $0x50] sm:$0x1] }
  0xed   : > { %1579 = vst.msk [vmem:[#allocation3 + $0x440] sm:$0xff] %vm1162_vm10, %v1547_v13  ;;  %4221 = vmatprep.mubr.bf16.mxu0 %v3473_v23  ;;  %v6819_v36 = vld [vmem:[#allocation2 + $0x38] ss:$0 sps:$4 sm:$0x11]   ;;  %v807_v55 = vsel %vm7579_vm3, %v535_v47, %v806_v52  ;;  %804 = vst [vmem:[#allocation2 + $0x3c] sm:$0xf] %v803_v54  ;;  %6377 = vmatpush3.bf16.msra.mxu0 %v6858_v56 }
  0xee   : > { %4222 = vmatmul.mubr.bf16.gmra.mrb[12].mxu0 %v3472_v10  ;;  %v3580_v33 = vld [vmem:[#allocation3 + $0x438] sm:$0xff]  ;;  %v1412_v46 = vshll.u32 %v6819_v36, 16  ;;  %805 = vst.msk [vmem:[#allocation2 + $0x40] sm:$0xf] %vm295_vm0, %v534_v50  ;;  %808 = vst [vmem:[#allocation2 + $0x44] sm:$0x1] %v807_v55  ;;  %6378 = vmatprep.subr.bf16.mxu0 %v6866_v0  ;;  %v1762_v14 = vsel %vm1756_vm11, %v1760_v62, %v1761_v2 }
  0xef   : > { %v6818_v34 = vld [vmem:[#allocation2 + $0x30] sm:$0xff]   ;;  %v3457_v1 = vld [vmem:[#allocation3 + $0x60] sm:$0xff]  ;;  %v326_v3 = vsel %vm7579_vm3, 0, %v325_v63  ;;  %v427_v5 = vld [vmem:[%s7411_s8 + $0x28] sm:$0xf]  ;;  %v382_v9 = vsel %vm7585_vm5, 0, %v381_v4 }
  0xf0   : > { %v6820_v37 = vld [vmem:[#allocation2 + $0x30] sm:$0xff]   ;;  %v1405_v40 = vshrl.u32 %v6818_v34, 16  ;;  %v1407_v41 = vshll.u32 %v6818_v34, 16  ;;  %v1414_v53 = vrot.slane %v1412_v46, 1  ;;  %v6838_v6 = vld [vmem:[#allocation7 + $0x1c8] sm:$0xff]   ;;  %v3447_v7 = vld [vmem:[#allocation3 + $0x10] sm:$0xff] }
  0xf1   : > { %v6847_v44 = vld [vmem:[#allocation2 + $0x30] sm:$0xff]   ;;  %1167 = vst.msk [vmem:[#allocation3 + $0x120] sm:$0xff] %vm1162_vm10, %v6820_v37  ;;  %327 = vst [vmem:[#allocation2 + $0x48] sm:$0x1] %v326_v3  ;;  %v428_v10 = vld [vmem:[%s7411_s8 + $0x2c] sm:$0xf] }
  0xf2   : > { %v1409_v49 = vrot.slane %v1407_v41, 1  ;;  %1972 = vst.msk [vmem:[#allocation3 + $0xf0] sm:$0xff] %vm1162_vm10, %v6847_v44  ;;  %v537_v12 = vshrl.u32 %v427_v5, 16  ;;  %v540_v13 = vshll.u32 %v427_v5, 16  ;;  %383 = vst [vmem:[#allocation2 + $0x50] sm:$0x1] %v382_v9 }
  0xf3   : > { %v545_v15 = vshrl.u32 %v428_v10, 16  ;;  %v548_v16 = vshll.u32 %v428_v10, 16  ;;  %1822 = vst.msk [vmem:[#allocation3 + $0x58] sm:$0xff] %vm1162_vm10, %v1762_v14  ;;  %v6841_v18 = vld [vmem:[#allocation7 + $0x188] sm:$0xff]   ;;  %v6855_v22 = vld [vmem:[#allocation7 + $0x1d0] sm:$0xff]   ;;  %v6880_v51 = vld [vmem:[#allocation7 + $0x178] sm:$0xff]  }
  0xf4   : > { %v3581_v45 = vld [vmem:[#allocation3 + $0x440] sm:$0xff]  ;;  %v1410_v57 = vor.u32 %v1409_v49, %v1405_v40  ;;  %v539_v17 = vrot.slane %v537_v12, 7  ;;  %v6867_v36 = vld [vmem:[#allocation7 + $0x130] sm:$0xff]   ;;  %v3466_v40 = vld [vmem:[#allocation3 + $0xa8] sm:$0xff] }
  0xf5   : > { %4317 = vmatprep.mubr.bf16.mxu1 %v3581_v45  ;;  %v6826_v20 = vld [vmem:[#allocation2 + $0x3c] sm:$0xff]   ;;  %v547_v21 = vrot.slane %v545_v15, 7  ;;  %v6827_v23 = vld [vmem:[#allocation2 + $0x44] ss:$0 sps:$4 sm:$0x11]   ;;  %v6859_v41 = vld [vmem:[#allocation7 + $0x190] sm:$0xff]   ;;  %6379 = vmatpush3.bf16.msra.mxu0 %v6867_v36 }
  0xf6   : > { %4318 = vmatmul.mubr.bf16.gmra.mrb[12].mxu1 %v3580_v33  ;;  %v1415_v60 = vsel %vm1355_vm8, %v1410_v57, %v1414_v53  ;;  %v6828_v24 = vld [vmem:[#allocation2 + $0x3c] sm:$0xff]   ;;  %v542_v25 = vor.u32 %v540_v13, %v539_v17  ;;  %v1417_v26 = vshrl.u32 %v6826_v20, 16  ;;  %v1419_v27 = vshll.u32 %v6826_v20, 16  ;;  %v6872_v45 = vld [vmem:[#allocation7 + $0x1d8] sm:$0xff]   ;;  %6380 = vmatprep.subr.bf16.mxu0 %v6880_v51  ;;  %v387_v36 = vld [vmem:[#allocation2 + $0x68] sm:$0x1] }
  0xf7   : > { %4358 = vmatprep.mubr.bf16.mxu1 %v3448_v38  ;;  %1568 = vst.msk [vmem:[#allocation3 + $0x128] sm:$0xff] %vm1162_vm10, %v1415_v60  ;;  %v543_v28 = vrot.slane %v539_v17, 4  ;;  %v550_v29 = vor.u32 %v548_v16, %v547_v21  ;;  %v6853_v31 = vld [vmem:[#allocation2 + $0x3c] sm:$0xff]   ;;  %v1424_v34 = vshll.u32 %v6827_v23, 16  ;;  %1168 = vst.msk [vmem:[#allocation3 + $0x168] sm:$0xff] %vm1162_vm10, %v6828_v24  ;;  %v552_v35 = vrot.slane %v547_v21, 4 }
  0xf8   : > { %v3481_v19 = vld [vmem:[#allocation3 + $0x120] sm:$0xff]  ;;  %v1421_v37 = vrot.slane %v1419_v27, 1  ;;  %v809_v39 = vld [vmem:[#allocation2 + $0x48] sm:$0xf]  ;;  %1973 = vst.msk [vmem:[#allocation3 + $0x138] sm:$0xff] %vm1162_vm10, %v6853_v31  ;;  %v6883_v54 = vld [vmem:[#allocation7 + $0x138] sm:$0xff]  }
  0xf9   : > { %v551_v38 = vsel %vm7607_vm9, %v543_v28, %v550_v29  ;;  %v1426_v42 = vrot.slane %v1424_v34, 1  ;;  %v810_v43 = vsel %vm7601_vm7, %v542_v25, %v809_v39  ;;  %v813_v44 = vld [vmem:[#allocation2 + $0x50] sm:$0x1]  ;;  %v6839_v49 = vld [vmem:[#allocation2 + $0x18] sm:$0xfe]   ;;  %6381 = vmatpush3.bf16.msra.mxu0 %v6883_v54  ;;  %v3475_v16 = vld [vmem:[#allocation3 + $0xf0] sm:$0xff] }
  0xfa   : > { %812 = vst.msk [vmem:[#allocation2 + $0x4c] sm:$0xf] %vm295_vm0, %v551_v38  ;;  %v1422_v46 = vor.u32 %v1421_v37, %v1417_v26  ;;  %v3456_v47 = vld [vmem:[#allocation3 + $0x58] sm:$0xff]  ;;  %811 = vst [vmem:[#allocation2 + $0x48] sm:$0xf] %v810_v43  ;;  %v814_v48 = vsel %vm7579_vm3, %v552_v35, %v813_v44  ;;  %v1763_v53 = vrot.slane %v6839_v49, 1 }
  0xfb   : > { %815 = vst [vmem:[#allocation2 + $0x50] sm:$0x1] %v814_v48  ;;  %v6840_v50 = vld [vmem:[#allocation2 + $0x20] ss:$0 sps:$4 sm:$0x11]   ;;  %v6875_v56 = vld [vmem:[#allocation7 + $0x198] sm:$0xff]  }
  0xfc   : > { %v1427_v52 = vsel %vm1355_vm8, %v1422_v46, %v1426_v42  ;;  %v1764_v55 = vrot.slane %v6840_v50, 1  ;;  %v328_v57 = vld [vmem:[#allocation2 + $0x54] sm:$0x1]  ;;  %v384_v60 = vld [vmem:[#allocation2 + $0x5c] sm:$0x1]  ;;  %v388_v43 = vsel %vm7585_vm5, 0, %v387_v36 }
  0xfd   : > { %1569 = vst.msk [vmem:[#allocation3 + $0x170] sm:$0xff] %vm1162_vm10, %v1427_v52  ;;  %v329_v59 = vsel %vm7579_vm3, 0, %v328_v57  ;;  %v385_v62 = vsel %vm7585_vm5, 0, %v384_v60  ;;  %v6848_v25 = vld [vmem:[#allocation2 + $0x24] sm:$0xfe]   ;;  %v6889_v46 = vld [vmem:[#allocation7 + $0x1e0] sm:$0xff]  }
  0xfe   : > { %4359 = vmatmul.mubr.bf16.vlgmr.msra.gmra.mrb[16].mxu1 %v3447_v7  ;;  %v3482_v33 = vld [vmem:[#allocation3 + $0x128] sm:$0xff]  ;;  %v1765_v58 = vsel %vm1756_vm11, %v1763_v53, %v1764_v55  ;;  %330 = vst [vmem:[#allocation2 + $0x54] sm:$0x1] %v329_v59  ;;  %386 = vst [vmem:[#allocation2 + $0x5c] sm:$0x1] %v385_v62  ;;  %v1766_v34 = vrot.slane %v6848_v25, 1 }
  0xff   : > { %6479 = vmatpush3.bf16.msra.mxu1 %v6825_v61  ;;  %4366 = vmatprep.mubr.bf16.mxu1 %v3457_v1  ;;  %v429_v61 = vld [vmem:[%s7411_s8 + $0x30] sm:$0xf]  ;;  %1823 = vst.msk [vmem:[#allocation3 + $0xa0] sm:$0xff] %vm1162_vm10, %v1765_v58  ;;  %v3490_v0 = vld [vmem:[#allocation3 + $0x168] sm:$0xff]  ;;  %v430_v7 = vld [vmem:[%s7411_s8 + $0x34] sm:$0xf] }
 0x100   : > { %6480 = vmatprep.subr.bf16.mxu1 %v6838_v6  ;;  %4229 = vmatprep.mubr.bf16.mxu0 %v3482_v33  ;;  %v554_v63 = vshrl.u32 %v429_v61, 16  ;;  %v557_v2 = vshll.u32 %v429_v61, 16  ;;  %v562_v14 = vshrl.u32 %v430_v7, 16  ;;  %v565_v15 = vshll.u32 %v430_v7, 16  ;;  %v331_v35 = vld [vmem:[#allocation2 + $0x60] sm:$0x1] }
 0x101   : > { %4230 = vmatmul.mubr.bf16.gmra.mrb[16].mxu0 %v3481_v19  ;;  %v6834_v1 = vld [vmem:[#allocation2 + $0x48] sm:$0xff]   ;;  %v432_v42 = vld [vmem:[%s7411_s8 + $0x3c] sm:$0xf]  ;;  %389 = vst [vmem:[#allocation2 + $0x68] sm:$0x1] %v388_v43 }
 0x102   : > { %v6835_v3 = vld [vmem:[#allocation2 + $0x50] ss:$0 sps:$4 sm:$0x11]   ;;  %v6836_v4 = vld [vmem:[#allocation2 + $0x48] sm:$0xff]   ;;  %v1429_v5 = vshrl.u32 %v6834_v1, 16  ;;  %v1431_v6 = vshll.u32 %v6834_v1, 16 }
 0x103   : > { %6481 = vmatpush3.bf16.msra.mxu1 %v6841_v18  ;;  %v556_v9 = vrot.slane %v554_v63, 7  ;;  %v6863_v10 = vld [vmem:[#allocation2 + $0x48] sm:$0xff]   ;;  %v1436_v13 = vshll.u32 %v6835_v3, 16  ;;  %1169 = vst.msk [vmem:[#allocation3 + $0x1b0] sm:$0xff] %vm1162_vm10, %v6836_v4  ;;  %v564_v21 = vrot.slane %v562_v14, 7  ;;  %v582_v49 = vshll.u32 %v432_v42, 16 }
 0x104   : > { %6482 = vmatprep.subr.bf16.mxu1 %v6855_v22  ;;  %v3491_v12 = vld [vmem:[#allocation3 + $0x170] sm:$0xff]  ;;  %v1433_v17 = vrot.slane %v1431_v6, 1  ;;  %1974 = vst.msk [vmem:[#allocation3 + $0x180] sm:$0xff] %vm1162_vm10, %v6863_v10  ;;  %v3484_v60 = vld [vmem:[#allocation3 + $0x138] sm:$0xff]  ;;  %v6864_v36 = vld [vmem:[#allocation2 + $0x3c] sm:$0xfe]  }
 0x105   : > { %4237 = vmatprep.mubr.bf16.mxu0 %v3491_v12  ;;  %v559_v18 = vor.u32 %v557_v2, %v556_v9  ;;  %v560_v19 = vrot.slane %v556_v9, 4  ;;  %v1438_v20 = vrot.slane %v1436_v13, 1  ;;  %v816_v24 = vld [vmem:[#allocation2 + $0x54] sm:$0xf]  ;;  %v567_v26 = vor.u32 %v565_v15, %v564_v21  ;;  %v820_v29 = vld [vmem:[#allocation2 + $0x5c] sm:$0x1] }
 0x106   : > { %4367 = vmatmul.mubr.bf16.gmra.mrb[20].mxu1 %v3456_v47  ;;  %v1434_v22 = vor.u32 %v1433_v17, %v1429_v5  ;;  %v3465_v23 = vld [vmem:[#allocation3 + $0xa0] sm:$0xff]  ;;  %v569_v27 = vrot.slane %v564_v21, 4  ;;  %v6849_v31 = vld [vmem:[#allocation2 + $0x2c] ss:$0 sps:$4 sm:$0x11]  }
 0x107   : > { %4374 = vmatprep.mubr.bf16.mxu1 %v3466_v40  ;;  %6483 = vmatpush3.bf16.msra.mxu1 %v6859_v41  ;;  %v817_v28 = vsel %vm7601_vm7, %v559_v18, %v816_v24  ;;  %v568_v37 = vsel %vm7607_vm9, %v560_v19, %v567_v26  ;;  %v1767_v39 = vrot.slane %v6849_v31, 1  ;;  %v332_v40 = vsel %vm7579_vm3, 0, %v331_v35  ;;  %v431_v41 = vld [vmem:[%s7411_s8 + $0x38] sm:$0xf]  ;;  %v334_v17 = vld [vmem:[#allocation2 + $0x6c] sm:$0x1] }
 0x108   : > { %6484 = vmatprep.subr.bf16.mxu1 %v6872_v45  ;;  %v1439_v33 = vsel %vm1355_vm8, %v1434_v22, %v1438_v20  ;;  %818 = vst [vmem:[#allocation2 + $0x54] sm:$0xf] %v817_v28  ;;  %v821_v38 = vsel %vm7579_vm3, %v569_v27, %v820_v29  ;;  %819 = vst.msk [vmem:[#allocation2 + $0x58] sm:$0xf] %vm295_vm0, %v568_v37  ;;  %v571_v44 = vshrl.u32 %v431_v41, 16  ;;  %v579_v45 = vshrl.u32 %v432_v42, 16 }
 0x109   : > { %4238 = vmatmul.mubr.bf16.gmra.mrb[20].mxu0 %v3490_v0  ;;  %1570 = vst.msk [vmem:[#allocation3 + $0x1b8] sm:$0xff] %vm1162_vm10, %v1439_v33  ;;  %822 = vst [vmem:[#allocation2 + $0x5c] sm:$0x1] %v821_v38  ;;  %v1768_v47 = vsel %vm1756_vm11, %v1766_v34, %v1767_v39  ;;  %v574_v48 = vshll.u32 %v431_v41, 16  ;;  %v827_v10 = vld [vmem:[#allocation2 + $0x68] sm:$0x1] }
 0x10a   : > { %333 = vst [vmem:[#allocation2 + $0x60] sm:$0x1] %v332_v40  ;;  %1824 = vst.msk [vmem:[#allocation3 + $0xe8] sm:$0xff] %vm1162_vm10, %v1768_v47  ;;  %v573_v50 = vrot.slane %v571_v44, 7  ;;  %v581_v51 = vrot.slane %v579_v45, 7  ;;  %v3499_v52 = vld [vmem:[#allocation3 + $0x1b0] sm:$0xff] }
 0x10b   : > { %6485 = vmatpush3.bf16.msra.mxu1 %v6875_v56  ;;  %v6856_v56 = vld [vmem:[#allocation2 + $0x30] sm:$0xfe]   ;;  %v6857_v61 = vld [vmem:[#allocation2 + $0x38] ss:$0 sps:$4 sm:$0x11]   ;;  %v335_v21 = vsel %vm7579_vm3, 0, %v334_v17 }
 0x10c   : > { %6486 = vmatprep.subr.bf16.mxu1 %v6889_v46  ;;  %v577_v53 = vrot.slane %v573_v50, 4  ;;  %v584_v54 = vor.u32 %v582_v49, %v581_v51  ;;  %v586_v55 = vrot.slane %v581_v51, 4  ;;  %v576_v58 = vor.u32 %v574_v48, %v573_v50  ;;  %v390_v18 = vld [vmem:[#allocation2 + $0x74] sm:$0x1]  ;;  %v6892_v19 = vld [vmem:[#allocation7 + $0x1a0] sm:$0xff]   ;;  %v3451_v30 = vld [vmem:[#allocation3 + $0x30] sm:$0xff] }
 0x10d   : > { %v1769_v63 = vrot.slane %v6856_v56, 1  ;;  %v1770_v6 = vrot.slane %v6857_v61, 1  ;;  %v391_v22 = vsel %vm7585_vm5, 0, %v390_v18  ;;  %v434_v24 = vld [vmem:[%s7411_s8 + $0x44] sm:$0xf]  ;;  %v1772_v48 = vrot.slane %v6864_v36, 1 }
 0x10e   : > { %4375 = vmatmul.mubr.bf16.gmra.mrb[24].mxu1 %v3465_v23  ;;  %v585_v59 = vsel %vm7607_vm9, %v577_v53, %v584_v54  ;;  %v828_v14 = vsel %vm7579_vm3, %v586_v55, %v827_v10  ;;  %v433_v23 = vld [vmem:[%s7411_s8 + $0x40] sm:$0xf]  ;;  %336 = vst [vmem:[#allocation2 + $0x6c] sm:$0x1] %v335_v21  ;;  %392 = vst [vmem:[#allocation2 + $0x74] sm:$0x1] %v391_v22 }
 0x10f   : > { %4382 = vmatprep.mubr.bf16.mxu1 %v3475_v16  ;;  %v6844_v62 = vld [vmem:[#allocation2 + $0x54] sm:$0xff]   ;;  %826 = vst.msk [vmem:[#allocation2 + $0x64] sm:$0xf] %vm295_vm0, %v585_v59  ;;  %v1771_v15 = vsel %vm1756_vm11, %v1769_v63, %v1770_v6  ;;  %829 = vst [vmem:[#allocation2 + $0x68] sm:$0x1] %v828_v14  ;;  %v588_v25 = vshrl.u32 %v433_v23, 16  ;;  %6487 = vmatpush3.bf16.msra.mxu1 %v6892_v19 }
 0x110   : > { %v3500_v57 = vld [vmem:[#allocation3 + $0x1b8] sm:$0xff]  ;;  %v6845_v0 = vld [vmem:[#allocation2 + $0x5c] ss:$0 sps:$4 sm:$0x11]   ;;  %v1441_v2 = vshrl.u32 %v6844_v62, 16  ;;  %v1443_v3 = vshll.u32 %v6844_v62, 16 }
 0x111   : > { %4245 = vmatprep.mubr.bf16.mxu0 %v3500_v57  ;;  %v6846_v1 = vld [vmem:[#allocation2 + $0x54] sm:$0xff]   ;;  %v3474_v4 = vld [vmem:[#allocation3 + $0xe8] sm:$0xff]  ;;  %v1448_v7 = vshll.u32 %v6845_v0, 16  ;;  %1825 = vst.msk [vmem:[#allocation3 + $0x130] sm:$0xff] %vm1162_vm10, %v1771_v15  ;;  %v591_v26 = vshll.u32 %v433_v23, 16  ;;  %v596_v28 = vshrl.u32 %v434_v24, 16 }
 0x112   : > { %4246 = vmatmul.mubr.bf16.gmra.mrb[24].mxu0 %v3499_v52  ;;  %v823_v5 = vld [vmem:[#allocation2 + $0x60] sm:$0xf]  ;;  %1170 = vst.msk [vmem:[#allocation3 + $0x1f8] sm:$0xff] %vm1162_vm10, %v6846_v1  ;;  %v6871_v12 = vld [vmem:[#allocation2 + $0x54] sm:$0xff]   ;;  %v1445_v13 = vrot.slane %v1443_v3, 1  ;;  %v599_v29 = vshll.u32 %v434_v24, 16 }
 0x113   : > { %v824_v9 = vsel %vm7601_vm7, %v576_v58, %v823_v5  ;;  %v1450_v16 = vrot.slane %v1448_v7, 1  ;;  %1975 = vst.msk [vmem:[#allocation3 + $0x1c8] sm:$0xff] %vm1162_vm10, %v6871_v12  ;;  %v590_v31 = vrot.slane %v588_v25, 7  ;;  %v7820_v33 = vld [vmem:[#allocation7 + $0x200] sm:$0xff]   ;;  %v598_v34 = vrot.slane %v596_v28, 7 }
 0x114   : > { %825 = vst [vmem:[#allocation2 + $0x60] sm:$0xf] %v824_v9  ;;  %v1446_v20 = vor.u32 %v1445_v13, %v1441_v2  ;;  %v3493_v35 = vld [vmem:[#allocation3 + $0x180] sm:$0xff]  ;;  %6614 = vmatprep.subr.bf16.mxu0 %v7820_v33  ;;  %v6865_v57 = vld [vmem:[#allocation2 + $0x44] ss:$0 sps:$4 sm:$0x11]  }
 0x115   : > { %v593_v38 = vor.u32 %v591_v26, %v590_v31  ;;  %v594_v39 = vrot.slane %v590_v31, 4  ;;  %v601_v42 = vor.u32 %v599_v29, %v598_v34  ;;  %v603_v47 = vrot.slane %v598_v34, 4  ;;  %v830_v51 = vld [vmem:[#allocation2 + $0x6c] sm:$0xf]  ;;  %v834_v52 = vld [vmem:[#allocation2 + $0x74] sm:$0x1] }
 0x116   : > { %4383 = vmatmul.mubr.bf16.gmra.mrb[28].mxu1 %v3474_v4  ;;  %v1451_v27 = vsel %vm1355_vm8, %v1446_v20, %v1450_v16  ;;  %v6851_v40 = vld [vmem:[#allocation2 + $0x68] ss:$0 sps:$4 sm:$0x11]   ;;  %v1773_v61 = vrot.slane %v6865_v57, 1  ;;  %v337_v62 = vld [vmem:[#allocation2 + $0x78] sm:$0x1] }
 0x117   : > { %4390 = vmatprep.mubr.bf16.mxu1 %v3484_v60  ;;  %1571 = vst.msk [vmem:[#allocation3 + $0x200] sm:$0xff] %vm1162_vm10, %v1451_v27  ;;  %v1460_v49 = vshll.u32 %v6851_v40, 16  ;;  %v602_v50 = vsel %vm7607_vm9, %v594_v39, %v601_v42  ;;  %v831_v55 = vsel %vm7601_vm7, %v593_v38, %v830_v51  ;;  %v835_v56 = vsel %vm7579_vm3, %v603_v47, %v834_v52  ;;  %v393_v0 = vld [vmem:[#allocation2 + $0x80] sm:$0x1]  ;;  %v436_v5 = vld [vmem:[%s7411_s8 + $0x4c] sm:$0xf] }
 0x118   : > { %v3483_v46 = vld [vmem:[#allocation3 + $0x130] sm:$0xff]  ;;  %833 = vst.msk [vmem:[#allocation2 + $0x70] sm:$0xf] %vm295_vm0, %v602_v50  ;;  %832 = vst [vmem:[#allocation2 + $0x6c] sm:$0xf] %v831_v55  ;;  %v338_v63 = vsel %vm7579_vm3, 0, %v337_v62  ;;  %v1774_v3 = vsel %vm1756_vm11, %v1772_v48, %v1773_v61 }
 0x119   : > { %v3508_v43 = vld [vmem:[#allocation3 + $0x1f8] sm:$0xff]  ;;  %v1462_v59 = vrot.slane %v1460_v49, 1  ;;  %836 = vst [vmem:[#allocation2 + $0x74] sm:$0x1] %v835_v56  ;;  %v435_v1 = vld [vmem:[%s7411_s8 + $0x48] sm:$0xf] }
 0x11a   : > { %339 = vst [vmem:[#allocation2 + $0x78] sm:$0x1] %v338_v63  ;;  %v394_v4 = vsel %vm7585_vm5, 0, %v393_v0  ;;  %v605_v6 = vshrl.u32 %v435_v1, 16  ;;  %1826 = vst.msk [vmem:[#allocation3 + $0x178] sm:$0xff] %vm1162_vm10, %v1774_v3  ;;  %v608_v7 = vshll.u32 %v435_v1, 16 }
 0x11b   : > { %v6850_v37 = vld [vmem:[#allocation2 + $0x60] sm:$0xff]   ;;  %395 = vst [vmem:[#allocation2 + $0x80] sm:$0x1] %v394_v4  ;;  %v613_v9 = vshrl.u32 %v436_v5, 16  ;;  %v616_v10 = vshll.u32 %v436_v5, 16  ;;  %v7861_v61 = vld [vmem:[#allocation2 + $0xc] sm:$0xff]  }
 0x11c   : > { %v6852_v41 = vld [vmem:[#allocation2 + $0x60] sm:$0xff]   ;;  %v1453_v44 = vshrl.u32 %v6850_v37, 16  ;;  %v1455_v45 = vshll.u32 %v6850_v37, 16  ;;  %v607_v12 = vrot.slane %v605_v6, 7  ;;  %v6873_v39 = vld [vmem:[#allocation2 + $0x48] sm:$0xfe]  }
 0x11d   : > { %1171 = vst.msk [vmem:[#allocation3 + $0x240] sm:$0xff] %vm1162_vm10, %v6852_v41  ;;  %v6879_v53 = vld [vmem:[#allocation2 + $0x60] sm:$0xff]   ;;  %v615_v13 = vrot.slane %v613_v9, 7  ;;  %v6874_v41 = vld [vmem:[#allocation2 + $0x50] ss:$0 sps:$4 sm:$0x11]  }
 0x11e   : > { %4391 = vmatmul.mubr.bf16.gmra.mrb[32].mxu1 %v3483_v46  ;;  %v1457_v54 = vrot.slane %v1455_v45, 1  ;;  %v3509_v58 = vld [vmem:[#allocation3 + $0x200] sm:$0xff]  ;;  %1976 = vst.msk [vmem:[#allocation3 + $0x210] sm:$0xff] %vm1162_vm10, %v6879_v53  ;;  %v610_v15 = vor.u32 %v608_v7, %v607_v12  ;;  %v611_v16 = vrot.slane %v607_v12, 4  ;;  %v3502_v20 = vld [vmem:[#allocation3 + $0x1c8] sm:$0xff]  ;;  %v1775_v42 = vrot.slane %v6873_v39, 1 }
 0x11f   : > { %4398 = vmatprep.mubr.bf16.mxu1 %v3493_v35  ;;  %4253 = vmatprep.mubr.bf16.mxu0 %v3509_v58  ;;  %v6860_v14 = vld [vmem:[#allocation2 + $0x6c] sm:$0xff]   ;;  %v618_v19 = vor.u32 %v616_v10, %v615_v13  ;;  %v620_v24 = vrot.slane %v615_v13, 4  ;;  %v1776_v46 = vrot.slane %v6874_v41, 1  ;;  %v437_v49 = vld [vmem:[%s7411_s8 + $0x50] sm:$0xf]  ;;  %v6909_v57 = vld [vmem:[#allocation7 + $0x1a8] sm:$0xff]  }
 0x120   : > { %v1458_v60 = vor.u32 %v1457_v54, %v1453_v44  ;;  %4254 = vmatmul.mubr.bf16.gmra.mrb[28].mxu0 %v3508_v43  ;;  %v6861_v17 = vld [vmem:[#allocation2 + $0x74] ss:$0 sps:$4 sm:$0x11]   ;;  %v6862_v18 = vld [vmem:[#allocation2 + $0x6c] sm:$0xff]   ;;  %v1465_v22 = vshrl.u32 %v6860_v14, 16  ;;  %v1467_v23 = vshll.u32 %v6860_v14, 16 }
 0x121   : > { %v1472_v25 = vshll.u32 %v6861_v17, 16  ;;  %1172 = vst.msk [vmem:[#allocation3 + $0x288] sm:$0xff] %vm1162_vm10, %v6862_v18  ;;  %v619_v26 = vsel %vm7607_vm9, %v611_v16, %v618_v19  ;;  %v837_v27 = vld [vmem:[#allocation2 + $0x78] sm:$0xf]  ;;  %v6888_v28 = vld [vmem:[#allocation2 + $0x6c] sm:$0xff]   ;;  %v6906_v44 = vld [vmem:[#allocation7 + $0x1e8] sm:$0xff]   ;;  %v1777_v54 = vsel %vm1756_vm11, %v1775_v42, %v1776_v46 }
 0x122   : > { %v1463_v2 = vsel %vm1355_vm8, %v1458_v60, %v1462_v59  ;;  %v1469_v31 = vrot.slane %v1467_v23, 1  ;;  %v3492_v34 = vld [vmem:[#allocation3 + $0x178] sm:$0xff]  ;;  %v838_v35 = vsel %vm7601_vm7, %v610_v15, %v837_v27  ;;  %840 = vst.msk [vmem:[#allocation2 + $0x7c] sm:$0xf] %vm295_vm0, %v619_v26  ;;  %v841_v36 = vld [vmem:[#allocation2 + $0x80] sm:$0x1]  ;;  %6488 = vmatprep.subr.bf16.mxu1 %v6906_v44 }
 0x123   : > { %1572 = vst.msk [vmem:[#allocation3 + $0x248] sm:$0xff] %vm1162_vm10, %v1463_v2  ;;  %v1474_v37 = vrot.slane %v1472_v25, 1  ;;  %839 = vst [vmem:[#allocation2 + $0x78] sm:$0xf] %v838_v35  ;;  %v842_v38 = vsel %vm7579_vm3, %v620_v24, %v841_v36  ;;  %v340_v43 = vld [vmem:[#allocation2 + $0x84] sm:$0x1]  ;;  %6489 = vmatpush3.bf16.msra.mxu1 %v6909_v57 }
 0x124   : > { %v3517_v21 = vld [vmem:[#allocation3 + $0x240] sm:$0xff]  ;;  %1977 = vst.msk [vmem:[#allocation3 + $0x258] sm:$0xff] %vm1162_vm10, %v6888_v28  ;;  %v1470_v40 = vor.u32 %v1469_v31, %v1465_v22  ;;  %843 = vst [vmem:[#allocation2 + $0x80] sm:$0x1] %v842_v38  ;;  %v341_v47 = vsel %vm7579_vm3, 0, %v340_v43  ;;  %v622_v52 = vshrl.u32 %v437_v49, 16 }
 0x125   : > { %v396_v48 = vld [vmem:[#allocation2 + $0x8c] sm:$0x1]  ;;  %342 = vst [vmem:[#allocation2 + $0x84] sm:$0x1] %v341_v47  ;;  %v625_v53 = vshll.u32 %v437_v49, 16  ;;  %1827 = vst.msk [vmem:[#allocation3 + $0x1c0] sm:$0xff] %vm1162_vm10, %v1777_v54 }
 0x126   : > { %4399 = vmatmul.mubr.bf16.gmra.mrb[36].mxu1 %v3492_v34  ;;  %v1475_v45 = vsel %vm1355_vm8, %v1470_v40, %v1474_v37  ;;  %v397_v50 = vsel %vm7585_vm5, 0, %v396_v48  ;;  %v438_v51 = vld [vmem:[%s7411_s8 + $0x54] sm:$0xf]  ;;  %v624_v58 = vrot.slane %v622_v52, 7  ;;  %v6881_v22 = vld [vmem:[#allocation2 + $0x54] sm:$0xfe]  }
 0x127   : > { %4406 = vmatprep.mubr.bf16.mxu1 %v3502_v20  ;;  %1573 = vst.msk [vmem:[#allocation3 + $0x290] sm:$0xff] %vm1162_vm10, %v1475_v45  ;;  %398 = vst [vmem:[#allocation2 + $0x8c] sm:$0x1] %v397_v50  ;;  %v630_v55 = vshrl.u32 %v438_v51, 16  ;;  %v633_v56 = vshll.u32 %v438_v51, 16  ;;  %v3511_v9 = vld [vmem:[#allocation3 + $0x210] sm:$0xff] }
 0x128   : > { %v627_v0 = vor.u32 %v625_v53, %v624_v58  ;;  %v3526_v1 = vld [vmem:[#allocation3 + $0x288] sm:$0xff]  ;;  %v628_v4 = vrot.slane %v624_v58, 4  ;;  %v2164_v23 = vshll.u32 %v7861_v61, 16  ;;  %v6882_v24 = vld [vmem:[#allocation2 + $0x5c] ss:$0 sps:$4 sm:$0x11]  }
 0x129   : > { %v632_v60 = vrot.slane %v630_v55, 7  ;;  %v2162_v25 = vshrl.u32 %v7861_v61, 16  ;;  %v1778_v27 = vrot.slane %v6881_v22, 1  ;;  %v6915_v28 = vld [vmem:[#allocation2 + $0x90] sm:$0xff]   ;;  %v6896_v31 = vld [vmem:[#allocation2 + $0x18] sm:$0xff]  }
 0x12a   : > { %v3518_v29 = vld [vmem:[#allocation3 + $0x248] sm:$0xff]  ;;  %v6868_v59 = vld [vmem:[#allocation2 + $0x78] sm:$0xff]   ;;  %v6884_v34 = vld [vmem:[#allocation2 + $0xc] sm:$0xfe]   ;;  %v2166_v36 = vrot.slane %v2164_v23, 1  ;;  %1980 = vst.msk [vmem:[#allocation3 + $0x330] sm:$0xff] %vm1162_vm10, %v6915_v28 }
 0x12b   : > { %4261 = vmatprep.mubr.bf16.mxu0 %v3518_v29  ;;  %v6869_v62 = vld [vmem:[#allocation2 + $0x80] ss:$0 sps:$4 sm:$0x11]   ;;  %v6870_v63 = vld [vmem:[#allocation2 + $0x78] sm:$0xff]   ;;  %v1477_v2 = vshrl.u32 %v6868_v59, 16  ;;  %v1479_v3 = vshll.u32 %v6868_v59, 16  ;;  %v635_v5 = vor.u32 %v633_v56, %v632_v60 }
 0x12c   : > { %4262 = vmatmul.mubr.bf16.gmra.mrb[32].mxu0 %v3517_v21  ;;  %v1484_v6 = vshll.u32 %v6869_v62, 16  ;;  %1173 = vst.msk [vmem:[#allocation3 + $0x2d0] sm:$0xff] %vm1162_vm10, %v6870_v63  ;;  %v637_v7 = vrot.slane %v632_v60, 4  ;;  %v844_v14 = vld [vmem:[#allocation2 + $0x84] sm:$0xf]  ;;  %v6898_v18 = vld [vmem:[#allocation2 + $0x78] sm:$0xff]   ;;  %v2167_v53 = vor.u32 %v2166_v36, %v2162_v25 }
 0x12d   : > { %v1481_v12 = vrot.slane %v1479_v3, 1  ;;  %v636_v13 = vsel %vm7607_vm9, %v628_v4, %v635_v5  ;;  %v845_v16 = vsel %vm7601_vm7, %v627_v0, %v844_v14  ;;  %v3501_v20 = vld [vmem:[#allocation3 + $0x1c0] sm:$0xff]  ;;  %1978 = vst.msk [vmem:[#allocation3 + $0x2a0] sm:$0xff] %vm1162_vm10, %v6898_v18  ;;  %v1779_v29 = vrot.slane %v6882_v24, 1  ;;  %v3520_v51 = vld [vmem:[#allocation3 + $0x258] sm:$0xff]  ;;  %v6903_v62 = vld [vmem:[#allocation2 + $0x24] sm:$0xff]  }
 0x12e   : > { %v3527_v10 = vld [vmem:[#allocation3 + $0x290] sm:$0xff]  ;;  %v1486_v15 = vrot.slane %v1484_v6, 1  ;;  %847 = vst.msk [vmem:[#allocation2 + $0x88] sm:$0xf] %vm295_vm0, %v636_v13  ;;  %846 = vst [vmem:[#allocation2 + $0x84] sm:$0xf] %v845_v16  ;;  %4407 = vmatmul.mubr.bf16.gmra.mrb[40].mxu1 %v3501_v20 }
 0x12f   : > { %4269 = vmatprep.mubr.bf16.mxu0 %v3527_v10  ;;  %v848_v17 = vld [vmem:[#allocation2 + $0x8c] sm:$0x1]  ;;  %v1482_v19 = vor.u32 %v1481_v12, %v1477_v2  ;;  %4414 = vmatprep.mubr.bf16.mxu1 %v3511_v9  ;;  %v6885_v35 = vld [vmem:[#allocation2 + $0x14] ss:$0 sps:$4 sm:$0x11]   ;;  %v1780_v37 = vsel %vm1756_vm11, %v1778_v27, %v1779_v29  ;;  %v2561_v38 = vrot.slane %v6884_v34, 1 }
 0x130   : > { %v849_v21 = vsel %vm7579_vm3, %v637_v7, %v848_v17  ;;  %1828 = vst.msk [vmem:[#allocation3 + $0x208] sm:$0xff] %vm1162_vm10, %v1780_v37  ;;  %v2562_v39 = vrot.slane %v6885_v35, 1  ;;  %v2176_v41 = vshll.u32 %v6896_v31, 16  ;;  %v6887_v48 = vld [vmem:[#allocation2 + $0x14] ss:$0 sps:$4 sm:$0x11]  }
 0x131   : > { %850 = vst [vmem:[#allocation2 + $0x8c] sm:$0x1] %v849_v21  ;;  %v1487_v26 = vsel %vm1355_vm8, %v1482_v19, %v1486_v15  ;;  %v2169_v54 = vshll.u32 %v6887_v48, 16  ;;  %v6890_v60 = vld [vmem:[#allocation2 + $0x60] sm:$0xfe]   ;;  %v2174_v2 = vshrl.u32 %v6896_v31, 16 }
 0x132   : > { %1574 = vst.msk [vmem:[#allocation3 + $0x2d8] sm:$0xff] %vm1162_vm10, %v1487_v26  ;;  %v2563_v44 = vsel %vm1756_vm11, %v2561_v38, %v2562_v39  ;;  %v6891_v61 = vld [vmem:[#allocation2 + $0x68] ss:$0 sps:$4 sm:$0x11]   ;;  %v7887_v4 = vld [vmem:[#allocation2 + $0x30] sm:$0xff]   ;;  %v2178_v5 = vrot.slane %v2176_v41, 1 }
 0x133   : > { %v3535_v45 = vld [vmem:[#allocation3 + $0x2d0] sm:$0xff]  ;;  %2625 = vst.msk [vmem:[#allocation3 + $0x28] sm:$0xff] %vm1162_vm10, %v2563_v44  ;;  %v2171_v59 = vrot.slane %v2169_v54, 1  ;;  %v1782_v3 = vrot.slane %v6891_v61, 1  ;;  %v2186_v6 = vshrl.u32 %v6903_v62, 16  ;;  %v2188_v12 = vshll.u32 %v6903_v62, 16 }
 0x134   : > { %4270 = vmatmul.mubr.bf16.gmra.mrb[36].mxu0 %v3526_v1  ;;  %v1781_v1 = vrot.slane %v6890_v60, 1  ;;  %v6894_v9 = vld [vmem:[#allocation2 + $0x18] sm:$0xfe]   ;;  %v6895_v10 = vld [vmem:[#allocation2 + $0x20] ss:$0 sps:$4 sm:$0x11]   ;;  %v2179_v19 = vor.u32 %v2178_v5, %v2174_v2 }
 0x135   : > { %v6876_v40 = vld [vmem:[#allocation2 + $0x84] sm:$0xff]   ;;  %v2172_v0 = vsel %vm1355_vm8, %v2167_v53, %v2171_v59  ;;  %v2564_v13 = vrot.slane %v6894_v9, 1  ;;  %v2565_v14 = vrot.slane %v6895_v10, 1  ;;  %v6897_v15 = vld [vmem:[#allocation2 + $0x20] ss:$0 sps:$4 sm:$0x11]  }
 0x136   : > { %v6878_v43 = vld [vmem:[#allocation2 + $0x84] sm:$0xff]   ;;  %v1489_v46 = vshrl.u32 %v6876_v40, 16  ;;  %v1491_v47 = vshll.u32 %v6876_v40, 16  ;;  %2369 = vst.msk [vmem:[#allocation3 + $0x20] sm:$0xff] %vm1162_vm10, %v2172_v0  ;;  %v1783_v7 = vsel %vm1756_vm11, %v1781_v1, %v1782_v3  ;;  %v2200_v16 = vshll.u32 %v7887_v4, 16  ;;  %v3529_v23 = vld [vmem:[#allocation3 + $0x2a0] sm:$0xff] }
 0x137   : > { %1174 = vst.msk [vmem:[#allocation3 + $0x318] sm:$0xff] %vm1162_vm10, %v6878_v43  ;;  %v6905_v56 = vld [vmem:[#allocation2 + $0x84] sm:$0xff]   ;;  %1829 = vst.msk [vmem:[#allocation3 + $0x250] sm:$0xff] %vm1162_vm10, %v1783_v7  ;;  %v2566_v18 = vsel %vm1756_vm11, %v2564_v13, %v2565_v14  ;;  %v2181_v20 = vshll.u32 %v6897_v15, 16  ;;  %v6899_v24 = vld [vmem:[#allocation2 + $0x6c] sm:$0xfe]  }
 0x138   : > { %v6877_v42 = vld [vmem:[#allocation2 + $0x8c] ss:$0 sps:$4 sm:$0x11]   ;;  %v1493_v52 = vrot.slane %v1491_v47, 1  ;;  %v3510_v58 = vld [vmem:[#allocation3 + $0x208] sm:$0xff]  ;;  %1979 = vst.msk [vmem:[#allocation3 + $0x2e8] sm:$0xff] %vm1162_vm10, %v6905_v56 }
 0x139   : > { %v3536_v49 = vld [vmem:[#allocation3 + $0x2d8] sm:$0xff]  ;;  %v1496_v50 = vshll.u32 %v6877_v42, 16  ;;  %4415 = vmatmul.mubr.bf16.gmra.mrb[44].mxu1 %v3510_v58  ;;  %2626 = vst.msk [vmem:[#allocation3 + $0x70] sm:$0xff] %vm1162_vm10, %v2566_v18  ;;  %v2190_v25 = vrot.slane %v2188_v12, 1  ;;  %v2198_v26 = vshrl.u32 %v7887_v4, 16  ;;  %v2183_v27 = vrot.slane %v2181_v20, 1 }
 0x13a   : > { %4277 = vmatprep.mubr.bf16.mxu0 %v3536_v49  ;;  %v1494_v57 = vor.u32 %v1493_v52, %v1489_v46  ;;  %4422 = vmatprep.mubr.bf16.mxu1 %v3520_v51  ;;  %v3450_v22 = vld [vmem:[#allocation3 + $0x28] sm:$0xff]  ;;  %v6900_v28 = vld [vmem:[#allocation2 + $0x74] ss:$0 sps:$4 sm:$0x11]   ;;  %v1784_v29 = vrot.slane %v6899_v24, 1  ;;  %v2202_v31 = vrot.slane %v2200_v16, 1 }
 0x13b   : > { %v1498_v55 = vrot.slane %v1496_v50, 1  ;;  %v2184_v35 = vsel %vm1355_vm8, %v2179_v19, %v2183_v27  ;;  %v1785_v36 = vrot.slane %v6900_v28, 1  ;;  %v6901_v37 = vld [vmem:[#allocation2 + $0x24] sm:$0xfe]   ;;  %v6922_v39 = vld [vmem:[#allocation2 + $0x9c] sm:$0xff]   ;;  %v2191_v49 = vor.u32 %v2190_v25, %v2186_v6 }
 0x13c   : > { %4278 = vmatmul.mubr.bf16.gmra.mrb[40].mxu0 %v3535_v45  ;;  %2370 = vst.msk [vmem:[#allocation3 + $0x68] sm:$0xff] %vm1162_vm10, %v2184_v35  ;;  %v6902_v38 = vld [vmem:[#allocation2 + $0x2c] ss:$0 sps:$4 sm:$0x11]   ;;  %v2567_v42 = vrot.slane %v6901_v37, 1  ;;  %v7898_v44 = vld [vmem:[#allocation2 + $0x3c] sm:$0xff]   ;;  %v2203_v9 = vor.u32 %v2202_v31, %v2198_v26 }
 0x13d   : > { %v1499_v63 = vsel %vm1355_vm8, %v1494_v57, %v1498_v55  ;;  %v3449_v40 = vld [vmem:[#allocation3 + $0x20] sm:$0xff]  ;;  %v1786_v41 = vsel %vm1756_vm11, %v1784_v29, %v1785_v36  ;;  %v6904_v43 = vld [vmem:[#allocation2 + $0x2c] ss:$0 sps:$4 sm:$0x11]   ;;  %v2568_v45 = vrot.slane %v6902_v38, 1  ;;  %v6910_v46 = vld [vmem:[#allocation7 + $0x208] sm:$0xff]  }
 0x13e   : > { %1575 = vst.msk [vmem:[#allocation3 + $0x320] sm:$0xff] %vm1162_vm10, %v1499_v63  ;;  %v3544_v17 = vld [vmem:[#allocation3 + $0x318] sm:$0xff]  ;;  %v3519_v34 = vld [vmem:[#allocation3 + $0x250] sm:$0xff]  ;;  %1830 = vst.msk [vmem:[#allocation3 + $0x298] sm:$0xff] %vm1162_vm10, %v1786_v41  ;;  %v2193_v50 = vshll.u32 %v6904_v43, 16  ;;  %v2212_v59 = vshll.u32 %v7898_v44, 16 }
 0x13f   : > { %1981 = vst.msk [vmem:[#allocation3 + $0x378] sm:$0xff] %vm1162_vm10, %v6922_v39  ;;  %v6923_v47 = vld [vmem:[#allocation7 + $0x1f0] sm:$0xff]   ;;  %v2569_v51 = vsel %vm1756_vm11, %v2567_v42, %v2568_v45  ;;  %v6907_v53 = vld [vmem:[#allocation2 + $0x78] sm:$0xfe]   ;;  %v3538_v55 = vld [vmem:[#allocation3 + $0x2e8] sm:$0xff]  ;;  %v2210_v6 = vshrl.u32 %v7898_v44, 16 }
 0x140   : > { %v3459_v48 = vld [vmem:[#allocation3 + $0x70] sm:$0xff]  ;;  %6490 = vmatprep.subr.bf16.mxu1 %v6923_v47  ;;  %2627 = vst.msk [vmem:[#allocation3 + $0xb8] sm:$0xff] %vm1162_vm10, %v2569_v51  ;;  %v2195_v52 = vrot.slane %v2193_v50, 1  ;;  %v6908_v54 = vld [vmem:[#allocation2 + $0x80] ss:$0 sps:$4 sm:$0x11]  }
 0x141   : > { %4423 = vmatmul.mubr.bf16.gmra.mrb[48].mxu1 %v3519_v34  ;;  %v1787_v57 = vrot.slane %v6907_v53, 1  ;;  %v1788_v58 = vrot.slane %v6908_v54, 1  ;;  %v6926_v60 = vld [vmem:[#allocation7 + $0x1b0] sm:$0xff]   ;;  %v6911_v63 = vld [vmem:[#allocation2 + $0x30] sm:$0xfe]  }
 0x142   : > { %4430 = vmatprep.mubr.bf16.mxu1 %v3529_v23  ;;  %v2196_v56 = vsel %vm1355_vm8, %v2191_v49, %v2195_v52  ;;  %v6912_v0 = vld [vmem:[#allocation2 + $0x38] ss:$0 sps:$4 sm:$0x11]   ;;  %6491 = vmatpush3.bf16.msra.mxu1 %v6926_v60  ;;  %v2570_v1 = vrot.slane %v6911_v63, 1  ;;  %v6927_v12 = vld [vmem:[#allocation7 + $0x210] sm:$0xff]  }
 0x143   : > { %2371 = vst.msk [vmem:[#allocation3 + $0xb0] sm:$0xff] %vm1162_vm10, %v2196_v56  ;;  %v1789_v62 = vsel %vm1756_vm11, %v1787_v57, %v1788_v58  ;;  %v2571_v2 = vrot.slane %v6912_v0, 1  ;;  %v6914_v3 = vld [vmem:[#allocation2 + $0x38] ss:$0 sps:$4 sm:$0x11]   ;;  %v3547_v13 = vld [vmem:[#allocation3 + $0x330] sm:$0xff] }
 0x144   : > { %1831 = vst.msk [vmem:[#allocation3 + $0x2e0] sm:$0xff] %vm1162_vm10, %v1789_v62  ;;  %v2205_v10 = vshll.u32 %v6914_v3, 16  ;;  %v6916_v14 = vld [vmem:[#allocation2 + $0x84] sm:$0xfe]   ;;  %v6918_v24 = vld [vmem:[#allocation2 + $0x3c] sm:$0xfe]  }
 0x145   : > { %v3545_v21 = vld [vmem:[#allocation3 + $0x320] sm:$0xff]  ;;  %v3528_v61 = vld [vmem:[#allocation3 + $0x298] sm:$0xff]  ;;  %v2572_v7 = vsel %vm1756_vm11, %v2570_v1, %v2571_v2  ;;  %v6917_v16 = vld [vmem:[#allocation2 + $0x8c] ss:$0 sps:$4 sm:$0x11]   ;;  %v1790_v19 = vrot.slane %v6916_v14, 1 }
 0x146   : > { %4285 = vmatprep.mubr.bf16.mxu0 %v3545_v21  ;;  %2628 = vst.msk [vmem:[#allocation3 + $0x100] sm:$0xff] %vm1162_vm10, %v2572_v7  ;;  %v2207_v15 = vrot.slane %v2205_v10, 1  ;;  %v6930_v18 = vld [vmem:[#allocation2 + $0x48] sm:$0xff]   ;;  %v1791_v23 = vrot.slane %v6917_v16, 1  ;;  %v2573_v28 = vrot.slane %v6918_v24, 1  ;;  %v3556_v42 = vld [vmem:[#allocation3 + $0x378] sm:$0xff] }
 0x147   : > { %4286 = vmatmul.mubr.bf16.gmra.mrb[44].mxu0 %v3544_v17  ;;  %v3468_v5 = vld [vmem:[#allocation3 + $0xb8] sm:$0xff]  ;;  %v2214_v17 = vrot.slane %v2212_v59, 1  ;;  %v6932_v20 = vld [vmem:[#allocation2 + $0xa8] sm:$0xff]   ;;  %v6919_v25 = vld [vmem:[#allocation2 + $0x44] ss:$0 sps:$4 sm:$0x11]  }
 0x148   : > { %4519 = vmatprep.mubr.bf16.mxu0 %v3450_v22  ;;  %v2208_v4 = vsel %vm1355_vm8, %v2203_v9, %v2207_v15  ;;  %v2222_v26 = vshrl.u32 %v6930_v18, 16  ;;  %1982 = vst.msk [vmem:[#allocation3 + $0x3c0] sm:$0xff] %vm1162_vm10, %v6932_v20  ;;  %v1792_v27 = vsel %vm1756_vm11, %v1790_v19, %v1791_v23  ;;  %v6921_v29 = vld [vmem:[#allocation2 + $0x44] ss:$0 sps:$4 sm:$0x11]   ;;  %v2574_v31 = vrot.slane %v6919_v25, 1 }
 0x149   : > { %4431 = vmatmul.mubr.bf16.gmra.mrb[52].mxu1 %v3528_v61  ;;  %2372 = vst.msk [vmem:[#allocation3 + $0xf8] sm:$0xff] %vm1162_vm10, %v2208_v4  ;;  %1832 = vst.msk [vmem:[#allocation3 + $0x328] sm:$0xff] %vm1162_vm10, %v1792_v27  ;;  %v2224_v34 = vshll.u32 %v6930_v18, 16  ;;  %v2215_v36 = vor.u32 %v2214_v17, %v2210_v6  ;;  %v2217_v37 = vshll.u32 %v6921_v29, 16  ;;  %v6928_v50 = vld [vmem:[#allocation2 + $0x48] sm:$0xfe]  }
 0x14a   : > { %4438 = vmatprep.mubr.bf16.mxu1 %v3538_v55  ;;  %v3467_v21 = vld [vmem:[#allocation3 + $0xb0] sm:$0xff]  ;;  %v2575_v38 = vsel %vm1756_vm11, %v2573_v28, %v2574_v31  ;;  %v6925_v41 = vld [vmem:[#allocation2 + $0x98] ss:$0 sps:$4 sm:$0x11]   ;;  %v2576_v52 = vrot.slane %v6928_v50, 1  ;;  %v6943_v24 = vld [vmem:[#allocation7 + $0x1b8] sm:$0xff]  }
 0x14b   : > { %v3537_v22 = vld [vmem:[#allocation3 + $0x2e0] sm:$0xff]  ;;  %2629 = vst.msk [vmem:[#allocation3 + $0x148] sm:$0xff] %vm1162_vm10, %v2575_v38  ;;  %v2219_v39 = vrot.slane %v2217_v37, 1  ;;  %v2226_v47 = vrot.slane %v2224_v34, 1  ;;  %v6941_v23 = vld [vmem:[#allocation2 + $0xa8] sm:$0xfe]  }
 0x14c   : > { %v6929_v51 = vld [vmem:[#allocation2 + $0x50] ss:$0 sps:$4 sm:$0x11]   ;;  %v6937_v59 = vld [vmem:[#allocation2 + $0x54] sm:$0xff]   ;;  %v6933_v61 = vld [vmem:[#allocation2 + $0x9c] sm:$0xfe]  }
 0x14d   : > { %v3477_v35 = vld [vmem:[#allocation3 + $0x100] sm:$0xff]  ;;  %v2220_v44 = vsel %vm1355_vm8, %v2215_v36, %v2219_v39  ;;  %v2577_v53 = vrot.slane %v6929_v51, 1  ;;  %v6931_v54 = vld [vmem:[#allocation2 + $0x50] ss:$0 sps:$4 sm:$0x11]   ;;  %v2227_v57 = vor.u32 %v2226_v47, %v2222_v26  ;;  %v1796_v1 = vrot.slane %v6933_v61, 1 }
 0x14e   : > { %2373 = vst.msk [vmem:[#allocation3 + $0x140] sm:$0xff] %vm1162_vm10, %v2220_v44  ;;  %v2229_v58 = vshll.u32 %v6931_v54, 16  ;;  %v6934_v0 = vld [vmem:[#allocation2 + $0xa4] ss:$0 sps:$4 sm:$0x11]   ;;  %v2236_v2 = vshll.u32 %v6937_v59, 16 }
 0x14f   : > { %4520 = vmatmul.mubr.bf16.vlgmr.msra.gmra.mrb[48].mxu0 %v3449_v40  ;;  %v6924_v40 = vld [vmem:[#allocation2 + $0x90] sm:$0xfe]   ;;  %v2578_v56 = vsel %vm1756_vm11, %v2576_v52, %v2577_v53  ;;  %v3565_v60 = vld [vmem:[#allocation3 + $0x3c0] sm:$0xff]  ;;  %v1797_v6 = vrot.slane %v6934_v0, 1  ;;  %v1799_v29 = vrot.slane %v6941_v23, 1  ;;  %v6947_v34 = vld [vmem:[#allocation2 + $0x60] sm:$0xff]  }
 0x150   : > { %6615 = vmatpush3.bf16.msra.mxu0 %v7820_v33  ;;  %4527 = vmatprep.mubr.bf16.mxu0 %v3459_v48  ;;  %v3458_v33 = vld [vmem:[#allocation3 + $0x68] sm:$0xff]  ;;  %v3476_v43 = vld [vmem:[#allocation3 + $0xf8] sm:$0xff]  ;;  %v1793_v45 = vrot.slane %v6924_v40, 1  ;;  %2630 = vst.msk [vmem:[#allocation3 + $0x190] sm:$0xff] %vm1162_vm10, %v2578_v56  ;;  %v2231_v63 = vrot.slane %v2229_v58, 1  ;;  %v2238_v10 = vrot.slane %v2236_v2, 1 }
 0x151   : > { %6616 = vmatprep.subr.bf16.mxu0 %v6910_v46  ;;  %4439 = vmatmul.mubr.bf16.gmra.mrb[56].mxu1 %v3537_v22  ;;  %v3546_v48 = vld [vmem:[#allocation3 + $0x328] sm:$0xff]  ;;  %v6935_v7 = vld [vmem:[#allocation2 + $0x54] sm:$0xfe]   ;;  %v6936_v9 = vld [vmem:[#allocation2 + $0x5c] ss:$0 sps:$4 sm:$0x11]  }
 0x152   : > { %4446 = vmatprep.mubr.bf16.mxu1 %v3547_v13  ;;  %v3486_v55 = vld [vmem:[#allocation3 + $0x148] sm:$0xff]  ;;  %v2579_v13 = vrot.slane %v6935_v7, 1  ;;  %v6938_v14 = vld [vmem:[#allocation2 + $0x5c] ss:$0 sps:$4 sm:$0x11]   ;;  %v2580_v15 = vrot.slane %v6936_v9, 1 }
 0x153   : > { %v6939_v16 = vld [vmem:[#allocation2 + $0xb4] sm:$0xff]   ;;  %v2241_v19 = vshll.u32 %v6938_v14, 16  ;;  %v6942_v25 = vld [vmem:[#allocation2 + $0xb0] ss:$0 sps:$4 sm:$0x11]   ;;  %v2246_v40 = vshrl.u32 %v6947_v34, 16 }
 0x154   : > { %6617 = vmatpush3.bf16.msra.mxu0 %v6910_v46  ;;  %v1794_v46 = vrot.slane %v6925_v41, 1  ;;  %v2581_v20 = vsel %vm1756_vm11, %v2579_v13, %v2580_v15  ;;  %1983 = vst.msk [vmem:[#allocation3 + $0x408] sm:$0xff] %vm1162_vm10, %v6939_v16  ;;  %v6944_v26 = vld [vmem:[#allocation7 + $0x218] sm:$0xff]   ;;  %v1800_v31 = vrot.slane %v6942_v25, 1  ;;  %v6945_v38 = vld [vmem:[#allocation2 + $0x60] sm:$0xfe]  }
 0x155   : > { %6618 = vmatprep.subr.bf16.mxu0 %v6927_v12  ;;  %v3485_v62 = vld [vmem:[#allocation3 + $0x140] sm:$0xff]  ;;  %2631 = vst.msk [vmem:[#allocation3 + $0x1d8] sm:$0xff] %vm1162_vm10, %v2581_v20  ;;  %v2243_v4 = vrot.slane %v2241_v19, 1  ;;  %v6946_v39 = vld [vmem:[#allocation2 + $0x68] ss:$0 sps:$4 sm:$0x11]  }
 0x156   : > { %v1795_v49 = vsel %vm1756_vm11, %v1793_v45, %v1794_v46  ;;  %v1801_v37 = vsel %vm1756_vm11, %v1799_v29, %v1800_v31  ;;  %v2582_v45 = vrot.slane %v6945_v38, 1  ;;  %v2583_v46 = vrot.slane %v6946_v39, 1  ;;  %v6948_v47 = vld [vmem:[#allocation2 + $0x68] ss:$0 sps:$4 sm:$0x11]   ;;  %v6954_v54 = vld [vmem:[#allocation2 + $0x6c] sm:$0xff]  }
 0x157   : > { %4528 = vmatmul.mubr.bf16.gmra.mrb[52].mxu0 %v3458_v33  ;;  %1833 = vst.msk [vmem:[#allocation3 + $0x370] sm:$0xff] %vm1162_vm10, %v1795_v49  ;;  %v2234_v33 = vshrl.u32 %v6937_v59, 16  ;;  %v3495_v17 = vld [vmem:[#allocation3 + $0x190] sm:$0xff]  ;;  %1835 = vst.msk [vmem:[#allocation3 + $0x400] sm:$0xff] %vm1162_vm10, %v1801_v37  ;;  %v355_v49 = vld [vmem:[#allocation2 + $0xc0] sm:$0x1] }
 0x158   : > { %4535 = vmatprep.mubr.bf16.mxu0 %v3468_v5  ;;  %6619 = vmatpush3.bf16.msra.mxu0 %v6927_v12  ;;  %v2232_v5 = vsel %vm1355_vm8, %v2227_v57, %v2231_v63  ;;  %v1798_v12 = vsel %vm1756_vm11, %v1796_v1, %v1797_v6  ;;  %v2584_v50 = vsel %vm1756_vm11, %v2582_v45, %v2583_v46  ;;  %v356_v51 = vsel %vm7579_vm3, 0, %v355_v49  ;;  %v447_v52 = vld [vmem:[%s7411_s8 + $0x78] sm:$0xf]  ;;  %v448_v53 = vld [vmem:[%s7411_s8 + $0x7c] sm:$0xf]  ;;  %v6962_v38 = vld [vmem:[#allocation2 + $0x78] sm:$0xff]  }
 0x159   : > { %4447 = vmatmul.mubr.bf16.gmra.mrb[60].mxu1 %v3546_v48  ;;  %2374 = vst.msk [vmem:[#allocation3 + $0x188] sm:$0xff] %vm1162_vm10, %v2232_v5  ;;  %1834 = vst.msk [vmem:[#allocation3 + $0x3b8] sm:$0xff] %vm1162_vm10, %v1798_v12  ;;  %v2239_v18 = vor.u32 %v2238_v10, %v2234_v33  ;;  %6620 = vmatprep.subr.bf16.mxu0 %v6944_v26  ;;  %v2253_v57 = vshll.u32 %v6948_v47, 16  ;;  %v707_v58 = vshrl.u32 %v447_v52, 16  ;;  %v710_v59 = vshll.u32 %v447_v52, 16  ;;  %v6964_v47 = vld [vmem:[#allocation2 + $0x24] sm:$0xff]  }
 0x15a   : > { %4454 = vmatprep.mubr.bf16.mxu1 %v3556_v42  ;;  %2632 = vst.msk [vmem:[#allocation3 + $0x220] sm:$0xff] %vm1162_vm10, %v2584_v50  ;;  %357 = vst [vmem:[#allocation2 + $0xc0] sm:$0x1] %v356_v51  ;;  %v718_v61 = vshll.u32 %v448_v53, 16  ;;  %v6950_v0 = vld [vmem:[#allocation2 + $0xb4] sm:$0xfe]  }
 0x15b   : > { %v2244_v28 = vsel %vm1355_vm8, %v2239_v18, %v2243_v4  ;;  %v3574_v42 = vld [vmem:[#allocation3 + $0x408] sm:$0xff]  ;;  %v709_v63 = vrot.slane %v707_v58, 7  ;;  %v6951_v2 = vld [vmem:[#allocation2 + $0xbc] ss:$0 sps:$4 sm:$0x11]   ;;  %v1802_v9 = vrot.slane %v6950_v0, 1 }
 0x15c   : > { %2375 = vst.msk [vmem:[#allocation3 + $0x1d0] sm:$0xff] %vm1162_vm10, %v2244_v28  ;;  %6621 = vmatpush3.bf16.msra.mxu0 %v6944_v26  ;;  %v3504_v44 = vld [vmem:[#allocation3 + $0x1d8] sm:$0xff]  ;;  %v1803_v12 = vrot.slane %v6951_v2, 1  ;;  %v2258_v14 = vshrl.u32 %v6954_v54, 16  ;;  %v2270_v45 = vshrl.u32 %v6962_v38, 16  ;;  %v2272_v46 = vshll.u32 %v6962_v38, 16 }
 0x15d   : > { %v712_v6 = vor.u32 %v710_v59, %v709_v63  ;;  %v713_v7 = vrot.slane %v709_v63, 4  ;;  %v6952_v13 = vld [vmem:[#allocation2 + $0x6c] sm:$0xfe]   ;;  %v6953_v15 = vld [vmem:[#allocation2 + $0x74] ss:$0 sps:$4 sm:$0x11]  }
 0x15e   : > { %v3555_v3 = vld [vmem:[#allocation3 + $0x370] sm:$0xff]  ;;  %v3573_v33 = vld [vmem:[#allocation3 + $0x400] sm:$0xff]  ;;  %v1804_v20 = vsel %vm1756_vm11, %v1802_v9, %v1803_v12  ;;  %v2586_v4 = vrot.slane %v6953_v15, 1  ;;  %v6955_v23 = vld [vmem:[#allocation2 + $0x74] ss:$0 sps:$4 sm:$0x11]  }
 0x15f   : > { %4536 = vmatmul.mubr.bf16.gmra.mrb[56].mxu0 %v3467_v21  ;;  %v6940_v21 = vld [vmem:[#allocation7 + $0x1f8] sm:$0xff]   ;;  %1836 = vst.msk [vmem:[#allocation3 + $0x448] sm:$0xff] %vm1162_vm10, %v1804_v20  ;;  %v6957_v28 = vld [vmem:[#allocation2 + $0x20] ss:$0 sps:$4 sm:$0x11]   ;;  %v2274_v52 = vrot.slane %v2272_v46, 1 }
 0x160   : > { %4543 = vmatprep.mubr.bf16.mxu0 %v3477_v35  ;;  %6492 = vmatprep.subr.bf16.mxu1 %v6940_v21  ;;  %v3494_v27 = vld [vmem:[#allocation3 + $0x188] sm:$0xff]  ;;  %v3564_v35 = vld [vmem:[#allocation3 + $0x3b8] sm:$0xff]  ;;  %v2585_v21 = vrot.slane %v6952_v13, 1  ;;  %v2973_v37 = vshll.u32 %v6957_v28, 16  ;;  %v2978_v58 = vshrl.u32 %v6964_v47, 16 }
 0x161   : > { %4455 = vmatmul.mubr.bf16.gmra.mrb[64].mxu1 %v3555_v3  ;;  %v2260_v3 = vshll.u32 %v6954_v54, 16  ;;  %v879_v19 = vld [vmem:[#allocation2 + $0xc0] sm:$0xf]  ;;  %v2275_v59 = vor.u32 %v2274_v52, %v2270_v45  ;;  %v6967_v9 = vld [vmem:[#allocation2 + $0x84] sm:$0xfe]  }
 0x162   : > { %4462 = vmatprep.mubr.bf16.mxu1 %v3565_v60  ;;  %6493 = vmatpush3.bf16.msra.mxu1 %v6943_v24  ;;  %v715_v60 = vshrl.u32 %v448_v53, 16  ;;  %v6956_v24 = vld [vmem:[#allocation2 + $0x18] sm:$0xff]   ;;  %v2587_v32 = vsel %vm1756_vm11, %v2585_v21, %v2586_v4  ;;  %v6961_v49 = vld [vmem:[#allocation2 + $0x80] ss:$0 sps:$4 sm:$0x11]   ;;  %v6969_v21 = vld [vmem:[#allocation2 + $0x84] sm:$0xff]  }
 0x163   : > { %v2262_v16 = vrot.slane %v2260_v3, 1  ;;  %2633 = vst.msk [vmem:[#allocation3 + $0x268] sm:$0xff] %vm1162_vm10, %v2587_v32  ;;  %v2966_v29 = vshrl.u32 %v6956_v24, 16  ;;  %v2968_v31 = vshll.u32 %v6956_v24, 16  ;;  %v2589_v54 = vrot.slane %v6961_v49, 1  ;;  %v6974_v38 = vld [vmem:[#allocation7 + $0x228] sm:$0xff]  }
 0x164   : > { %v7947_v1 = vrot.slane %v715_v60, 7  ;;  %v2284_v32 = vshll.u32 %v6969_v21, 16  ;;  %v6975_v46 = vld [vmem:[#allocation2 + $0x90] sm:$0xfe]  }
 0x165   : > { %v2263_v26 = vor.u32 %v2262_v16, %v2258_v14  ;;  %v2970_v39 = vrot.slane %v2968_v31, 1  ;;  %v6973_v31 = vld [vmem:[#allocation2 + $0x30] sm:$0xff]  }
 0x166   : > { %v720_v10 = vor.u32 %v718_v61, %v7947_v1  ;;  %v2980_v61 = vshll.u32 %v6964_v47, 16  ;;  %2775 = vst.msk [vmem:[#allocation3 + $0xc0] sm:$0xff] %vm1162_vm10, %v6973_v31 }
 0x167   : > { %4544 = vmatmul.mubr.bf16.gmra.mrb[60].mxu0 %v3476_v43  ;;  %v2248_v43 = vshll.u32 %v6947_v34, 16  ;;  %v6959_v34 = vld [vmem:[#allocation7 + $0x220] sm:$0xff]  }
 0x168   : > { %4551 = vmatprep.mubr.bf16.mxu0 %v3486_v55  ;;  %v3503_v55 = vld [vmem:[#allocation3 + $0x1d0] sm:$0xff]  ;;  %v721_v18 = vsel %vm7607_vm9, %v713_v7, %v720_v10  ;;  %6622 = vmatprep.subr.bf16.mxu0 %v6959_v34 }
 0x169   : > { %4463 = vmatmul.mubr.bf16.gmra.mrb[68].mxu1 %v3564_v35  ;;  %v2250_v48 = vrot.slane %v2248_v43, 1  ;;  %882 = vst.msk [vmem:[#allocation2 + $0xc4] sm:$0xf] %vm295_vm0, %v721_v18  ;;  %6623 = vmatpush3.bf16.msra.mxu0 %v6959_v34  ;;  %v2971_v43 = vor.u32 %v2970_v39, %v2966_v29  ;;  %v6968_v10 = vld [vmem:[#allocation2 + $0x8c] ss:$0 sps:$4 sm:$0x11]  }
 0x16a   : > { %4470 = vmatprep.mubr.bf16.mxu1 %v3574_v42  ;;  %v2975_v42 = vrot.slane %v2973_v37, 1  ;;  %v3522_v53 = vld [vmem:[#allocation3 + $0x268] sm:$0xff]  ;;  %v2591_v18 = vrot.slane %v6967_v9, 1  ;;  %v6972_v29 = vld [vmem:[#allocation2 + $0x38] ss:$0 sps:$4 sm:$0x11]   ;;  %6624 = vmatprep.subr.bf16.mxu0 %v6974_v38 }
 0x16b   : > { %v2251_v56 = vor.u32 %v2250_v48, %v2246_v40  ;;  %v2286_v34 = vrot.slane %v2284_v32, 1  ;;  %v2997_v39 = vshll.u32 %v6972_v29, 16  ;;  %v6984_v9 = vld [vmem:[#allocation2 + $0x9c] sm:$0xff]  }
 0x16c   : > { %v2976_v50 = vsel %vm1355_vm8, %v2971_v43, %v2975_v42 }
 0x16d   : > { %3173 = vst.msk [vmem:[#allocation3 + $0x38] sm:$0xff] %vm1162_vm10, %v2976_v50  ;;  %v2999_v45 = vrot.slane %v2997_v39, 1  ;;  %6625 = vmatpush3.bf16.msra.mxu0 %v6974_v38 }
 0x16f   : > { %4552 = vmatmul.mubr.bf16.gmra.mrb[64].mxu0 %v3485_v62  ;;  %v2255_v62 = vrot.slane %v2253_v57, 1  ;;  %v6965_v57 = vld [vmem:[#allocation2 + $0x2c] ss:$0 sps:$4 sm:$0x11]  }
 0x170   : > { %4559 = vmatprep.mubr.bf16.mxu0 %v3495_v17  ;;  %v3513_v17 = vld [vmem:[#allocation3 + $0x220] sm:$0xff]  ;;  %v2985_v0 = vshll.u32 %v6965_v57, 16 }
 0x171   : > { %4471 = vmatmul.mubr.bf16.gmra.mrb[72].mxu1 %v3573_v33  ;;  %v2256_v5 = vsel %vm1355_vm8, %v2251_v56, %v2255_v62  ;;  %v3582_v62 = vld [vmem:[#allocation3 + $0x448] sm:$0xff] }
 0x172   : > { %2376 = vst.msk [vmem:[#allocation3 + $0x218] sm:$0xff] %vm1162_vm10, %v2256_v5  ;;  %v6966_v33 = vld [vmem:[#allocation2 + $0x24] sm:$0xff]   ;;  %v2982_v5 = vrot.slane %v2980_v61, 1  ;;  %v2987_v7 = vrot.slane %v2985_v0, 1 }
 0x173   : > { %2774 = vst.msk [vmem:[#allocation3 + $0x78] sm:$0xff] %vm1162_vm10, %v6966_v33 }
 0x174   : > { %v3452_v13 = vld [vmem:[#allocation3 + $0x38] sm:$0xff]  ;;  %v2983_v15 = vor.u32 %v2982_v5, %v2978_v58  ;;  %v6979_v58 = vld [vmem:[#allocation2 + $0x3c] sm:$0xff]  }
 0x175   : > { %v3002_v0 = vshrl.u32 %v6979_v58, 16  ;;  %v3004_v33 = vshll.u32 %v6979_v58, 16 }
 0x176   : > { %v2988_v20 = vsel %vm1355_vm8, %v2983_v15, %v2987_v7  ;;  %v6981_v7 = vld [vmem:[#allocation2 + $0x3c] sm:$0xff]  }
 0x177   : > { %4560 = vmatmul.mubr.bf16.gmra.mrb[68].mxu0 %v3494_v27  ;;  %v2265_v27 = vshll.u32 %v6955_v23, 16  ;;  %3174 = vst.msk [vmem:[#allocation3 + $0x80] sm:$0xff] %vm1162_vm10, %v2988_v20  ;;  %2776 = vst.msk [vmem:[#allocation3 + $0x108] sm:$0xff] %vm1162_vm10, %v6981_v7  ;;  %v2306_v20 = vshrl.u32 %v6984_v9, 16 }
 0x178   : > { %4567 = vmatprep.mubr.bf16.mxu0 %v3504_v44  ;;  %v6960_v44 = vld [vmem:[#allocation2 + $0x78] sm:$0xfe]  }
 0x179   : > { %v3512_v35 = vld [vmem:[#allocation3 + $0x218] sm:$0xff]  ;;  %v2588_v51 = vrot.slane %v6960_v44, 1 }
 0x17b   : > { %v2590_v56 = vsel %vm1756_vm11, %v2588_v51, %v2589_v54  ;;  %v6976_v51 = vld [vmem:[#allocation2 + $0x98] ss:$0 sps:$4 sm:$0x11]  }
 0x17c   : > { %2634 = vst.msk [vmem:[#allocation3 + $0x2b0] sm:$0xff] %vm1162_vm10, %v2590_v56  ;;  %v6978_v56 = vld [vmem:[#allocation2 + $0x98] ss:$0 sps:$4 sm:$0x11]  }
 0x17f   : > { %4568 = vmatmul.mubr.bf16.gmra.mrb[72].mxu0 %v3503_v55  ;;  %v6963_v55 = vld [vmem:[#allocation2 + $0x80] ss:$0 sps:$4 sm:$0x11]  }
 0x180   : > { %4575 = vmatprep.mubr.bf16.mxu0 %v3513_v17  ;;  %v2277_v60 = vshll.u32 %v6963_v55, 16  ;;  %v2595_v55 = vrot.slane %v6976_v51, 1  ;;  %v6990_v51 = vld [vmem:[#allocation2 + $0xa8] sm:$0xfe]  }
 0x182   : > { %v2279_v3 = vrot.slane %v2277_v60, 1 }
 0x183   : > { %v3531_v4 = vld [vmem:[#allocation3 + $0x2b0] sm:$0xff] }
 0x184   : > { %v2280_v14 = vsel %vm1355_vm8, %v2275_v59, %v2279_v3  ;;  %v3460_v59 = vld [vmem:[#allocation3 + $0x78] sm:$0xff] }
 0x185   : > { %2378 = vst.msk [vmem:[#allocation3 + $0x2a8] sm:$0xff] %vm1162_vm10, %v2280_v14 }
 0x187   : > { %4576 = vmatmul.mubr.bf16.gmra.mrb[76].mxu0 %v3512_v35 }
 0x188   : > { %4583 = vmatprep.mubr.bf16.mxu0 %v3522_v53  ;;  %v2594_v53 = vrot.slane %v6975_v46, 1 }
 0x18a   : > { %v2596_v60 = vsel %vm1756_vm11, %v2594_v53, %v2595_v55  ;;  %v6994_v53 = vld [vmem:[#allocation2 + $0x54] sm:$0xff]   ;;  %v3478_v55 = vld [vmem:[#allocation3 + $0x108] sm:$0xff] }
 0x18b   : > { %2636 = vst.msk [vmem:[#allocation3 + $0x340] sm:$0xff] %vm1162_vm10, %v2596_v60 }
 0x18c   : > { %v3530_v42 = vld [vmem:[#allocation3 + $0x2a8] sm:$0xff] }
 0x193   : > { %v6158_v22 = vpop.f32.mrb[0].mxu0 }
 0x194   : > { %v6159_v36 = vpop.f32.mrb[1].mxu0 }
 0x195   : > { %v7938_v41 = vadd.f32 %v6159_v36, %v6158_v22  ;;  %v880_v22 = vsel %vm7601_vm7, %v712_v6, %v879_v19  ;;  %v2267_v36 = vrot.slane %v2265_v27, 1  ;;  %v7973_v17 = vpop.f32.mrb[2].mxu0  ;;  %v2592_v19 = vrot.slane %v6968_v10, 1  ;;  %v6971_v27 = vld [vmem:[#allocation2 + $0x30] sm:$0xff]  }
 0x196   : > { %881 = vst [vmem:[#allocation2 + $0xc0] sm:$0xf] %v880_v22  ;;  %v6970_v22 = vld [vmem:[#allocation2 + $0x8c] ss:$0 sps:$4 sm:$0x11]   ;;  %v2992_v37 = vshll.u32 %v6971_v27, 16 }
 0x197   : > { %v2268_v40 = vsel %vm1355_vm8, %v2263_v26, %v2267_v36  ;;  %v2593_v23 = vsel %vm1756_vm11, %v2591_v18, %v2592_v19  ;;  %v2289_v26 = vshll.u32 %v6970_v22, 16  ;;  %v2990_v36 = vshrl.u32 %v6971_v27, 16  ;;  %v6983_v19 = vld [vmem:[#allocation2 + $0xa4] ss:$0 sps:$4 sm:$0x11]   ;;  %v3549_v27 = vld [vmem:[#allocation3 + $0x340] sm:$0xff] }
 0x198   : > { %2377 = vst.msk [vmem:[#allocation3 + $0x260] sm:$0xff] %vm1162_vm10, %v2268_v40  ;;  %2635 = vst.msk [vmem:[#allocation3 + $0x2f8] sm:$0xff] %vm1162_vm10, %v2593_v23  ;;  %v6977_v40 = vld [vmem:[#allocation2 + $0x90] sm:$0xff]   ;;  %v2994_v44 = vrot.slane %v2992_v37, 1  ;;  %v3006_v10 = vrot.slane %v3004_v33, 1  ;;  %v2598_v32 = vrot.slane %v6983_v19, 1 }
 0x199   : > { %v2291_v35 = vrot.slane %v2289_v26, 1  ;;  %v2294_v47 = vshrl.u32 %v6977_v40, 16  ;;  %v2296_v57 = vshll.u32 %v6977_v40, 16  ;;  %v6985_v26 = vld [vmem:[#allocation2 + $0xa4] ss:$0 sps:$4 sm:$0x11]  }
 0x19a   : > { %v2995_v50 = vor.u32 %v2994_v44, %v2990_v36  ;;  %v3007_v18 = vor.u32 %v3006_v10, %v3002_v0  ;;  %v6988_v36 = vld [vmem:[#allocation2 + $0x48] sm:$0xff]   ;;  %v6162_v44 = vpop.f32.mrb[3].mxu0  ;;  %v3026_v0 = vshrl.u32 %v6994_v53, 16 }
 0x19b   : > { %v2298_v61 = vrot.slane %v2296_v57, 1  ;;  %2777 = vst.msk [vmem:[#allocation3 + $0x150] sm:$0xff] %vm1162_vm10, %v6988_v36  ;;  %v2600_v57 = vrot.slane %v6990_v51, 1 }
 0x19c   : > { %v6230_v25 = vpop.f32.mrb[0].mxu1  ;;  %v3000_v54 = vsel %vm1355_vm8, %v2995_v50, %v2999_v45  ;;  %v8001_v50 = vadd.f32 %v6162_v44, %v7973_v17  ;;  %v7004_v44 = vld [vmem:[#allocation7 + $0x238] sm:$0xff]  }
 0x19d   : > { %v6949_v48 = vld [vmem:[#allocation2 + $0xc0] sm:$0xff]   ;;  %v6231_v2 = vpop.f32.mrb[1].mxu1  ;;  %3175 = vst.msk [vmem:[#allocation3 + $0xc8] sm:$0xff] %vm1162_vm10, %v3000_v54 }
 0x19e   : > { %1984 = vst.msk [vmem:[#allocation3 + $0x450] sm:$0xff] %vm1162_vm10, %v6949_v48  ;;  %v7969_v6 = vadd.f32 %v6231_v2, %v6230_v25  ;;  %v6233_v16 = vpop.f32.mrb[2].mxu1  ;;  %v2282_v25 = vshrl.u32 %v6969_v21, 16  ;;  %v3461_v48 = vld [vmem:[#allocation3 + $0x80] sm:$0xff]  ;;  %v2299_v2 = vor.u32 %v2298_v61, %v2294_v47 }
 0x19f   : > { %v3521_v63 = vld [vmem:[#allocation3 + $0x260] sm:$0xff]  ;;  %v6234_v24 = vpop.f32.mrb[3].mxu1  ;;  %v3540_v52 = vld [vmem:[#allocation3 + $0x2f8] sm:$0xff] }
 0x1a0   : > { %4584 = vmatmul.mubr.bf16.gmra.mrb[80].mxu0 %v3521_v63  ;;  %v7980_v28 = vadd.f32 %v6234_v24, %v6233_v16  ;;  %v2287_v43 = vor.u32 %v2286_v34, %v2282_v25  ;;  %v6980_v63 = vld [vmem:[#allocation2 + $0x44] ss:$0 sps:$4 sm:$0x11]   ;;  %v6982_v16 = vld [vmem:[#allocation2 + $0x9c] sm:$0xfe]  }
 0x1a1   : > { %4591 = vmatprep.mubr.bf16.mxu0 %v3531_v4  ;;  %v3009_v5 = vshll.u32 %v6980_v63, 16  ;;  %v2597_v22 = vrot.slane %v6982_v16, 1  ;;  %v2308_v4 = vshll.u32 %v6984_v9, 16  ;;  %v3469_v24 = vld [vmem:[#allocation3 + $0xc0] sm:$0xff] }
 0x1a2   : > { %v2292_v49 = vsel %vm1355_vm8, %v2287_v43, %v2291_v35  ;;  %v6987_v34 = vld [vmem:[#allocation2 + $0x50] ss:$0 sps:$4 sm:$0x11]   ;;  %v6989_v43 = vld [vmem:[#allocation7 + $0x230] sm:$0xff]  }
 0x1a3   : > { %2379 = vst.msk [vmem:[#allocation3 + $0x2f0] sm:$0xff] %vm1162_vm10, %v2292_v49  ;;  %v3011_v15 = vrot.slane %v3009_v5, 1  ;;  %v2310_v29 = vrot.slane %v2308_v4, 1  ;;  %v2599_v31 = vsel %vm1756_vm11, %v2597_v22, %v2598_v32  ;;  %v3021_v40 = vshll.u32 %v6987_v34, 16  ;;  %v6992_v49 = vld [vmem:[#allocation2 + $0xa8] sm:$0xff]   ;;  %6626 = vmatprep.subr.bf16.mxu0 %v6989_v43  ;;  %v6996_v5 = vld [vmem:[#allocation2 + $0x54] sm:$0xff]  }
 0x1a4   : > { %v3470_v21 = vld [vmem:[#allocation3 + $0xc8] sm:$0xff]  ;;  %2637 = vst.msk [vmem:[#allocation3 + $0x388] sm:$0xff] %vm1162_vm10, %v2599_v31  ;;  %6627 = vmatpush3.bf16.msra.mxu0 %v6989_v43  ;;  %v2320_v60 = vshll.u32 %v6992_v49, 16  ;;  %v6993_v61 = vld [vmem:[#allocation2 + $0xb0] ss:$0 sps:$4 sm:$0x11]  }
 0x1a5   : > { %v3583_v12 = vld [vmem:[#allocation3 + $0x450] sm:$0xff]  ;;  %v3012_v25 = vsel %vm1355_vm8, %v3007_v18, %v3011_v15  ;;  %v2311_v37 = vor.u32 %v2310_v29, %v2306_v20  ;;  %v2325_v33 = vshll.u32 %v6993_v61, 16  ;;  %2778 = vst.msk [vmem:[#allocation3 + $0x198] sm:$0xff] %vm1162_vm10, %v6996_v5  ;;  %v6999_v22 = vld [vmem:[#allocation2 + $0xb4] sm:$0xff]   ;;  %6628 = vmatprep.subr.bf16.mxu0 %v7004_v44 }
 0x1a6   : > { %4478 = vmatprep.mubr.bf16.mxu1 %v3583_v12  ;;  %v6986_v12 = vld [vmem:[#allocation2 + $0x48] sm:$0xff]   ;;  %3176 = vst.msk [vmem:[#allocation3 + $0x110] sm:$0xff] %vm1162_vm10, %v3012_v25  ;;  %v7997_v45 = vpop.f32.mrb[4].mxu1  ;;  %v2322_v63 = vrot.slane %v2320_v60, 1 }
 0x1a7   : > { %4479 = vmatmul.mubr.bf16.gmra.mrb[76].mxu1 %v3582_v62  ;;  %v2301_v62 = vshll.u32 %v6978_v56, 16  ;;  %v3014_v23 = vshrl.u32 %v6986_v12, 16  ;;  %v3016_v35 = vshll.u32 %v6986_v12, 16  ;;  %v2327_v10 = vrot.slane %v2325_v33, 1  ;;  %v3487_v16 = vld [vmem:[#allocation3 + $0x150] sm:$0xff]  ;;  %v6237_v5 = vpop.f32.mrb[5].mxu1 }
 0x1a8   : > { %4680 = vmatprep.mubr.bf16.mxu1 %v3452_v13  ;;  %4592 = vmatmul.mubr.bf16.gmra.mrb[84].mxu0 %v3530_v42  ;;  %v7000_v32 = vld [vmem:[#allocation2 + $0xbc] ss:$0 sps:$4 sm:$0x11]  }
 0x1a9   : > { %4599 = vmatprep.mubr.bf16.mxu0 %v3540_v52  ;;  %v2303_v3 = vrot.slane %v2301_v62, 1  ;;  %v3018_v39 = vrot.slane %v3016_v35, 1  ;;  %v6991_v52 = vld [vmem:[#allocation2 + $0xb0] ss:$0 sps:$4 sm:$0x11]   ;;  %v2337_v35 = vshll.u32 %v7000_v32, 16  ;;  %6629 = vmatpush3.bf16.msra.mxu0 %v7004_v44 }
 0x1aa   : > { %v3539_v13 = vld [vmem:[#allocation3 + $0x2f0] sm:$0xff]  ;;  %v2601_v58 = vrot.slane %v6991_v52, 1 }
 0x1ab   : > { %v2304_v14 = vsel %vm1355_vm8, %v2299_v2, %v2303_v3  ;;  %v3019_v47 = vor.u32 %v3018_v39, %v3014_v23  ;;  %v3558_v17 = vld [vmem:[#allocation3 + $0x388] sm:$0xff]  ;;  %v6995_v2 = vld [vmem:[#allocation2 + $0x5c] ss:$0 sps:$4 sm:$0x11]   ;;  %v3028_v3 = vshll.u32 %v6994_v53, 16 }
 0x1ac   : > { %2380 = vst.msk [vmem:[#allocation3 + $0x338] sm:$0xff] %vm1162_vm10, %v2304_v14  ;;  %v2602_v62 = vsel %vm1756_vm11, %v2600_v57, %v2601_v58  ;;  %v6997_v14 = vld [vmem:[#allocation2 + $0xb4] sm:$0xfe]   ;;  %v7001_v23 = vld [vmem:[#allocation2 + $0x60] sm:$0xff]   ;;  %v6164_v57 = vpop.f32.mrb[4].mxu0  ;;  %v722_v58 = vrot.slane %v7947_v1, 4 }
 0x1ad   : > { %v3479_v54 = vld [vmem:[#allocation3 + $0x110] sm:$0xff]  ;;  %2638 = vst.msk [vmem:[#allocation3 + $0x3d0] sm:$0xff] %vm1162_vm10, %v2602_v62  ;;  %v3030_v12 = vrot.slane %v3028_v3, 1  ;;  %v2603_v4 = vrot.slane %v6997_v14, 1  ;;  %v3038_v31 = vshrl.u32 %v7001_v23, 16  ;;  %v3040_v36 = vshll.u32 %v7001_v23, 16 }
 0x1ae   : > { %v7010_v62 = vld [vmem:[#allocation2 + $0x74] ss:$0 sps:$4 sm:$0x11]   ;;  %v7011_v1 = vld [vmem:[#allocation2 + $0x6c] sm:$0xff]  }
 0x1af   : > { %4681 = vmatmul.mubr.bf16.vlgmr.msra.gmra.mrb[80].mxu1 %v3451_v30  ;;  %v2313_v30 = vshll.u32 %v6985_v26, 16  ;;  %v3031_v19 = vor.u32 %v3030_v12, %v3026_v0  ;;  %v2330_v26 = vshrl.u32 %v6999_v22, 16  ;;  %v3057_v3 = vshll.u32 %v7010_v62, 16  ;;  %2780 = vst.msk [vmem:[#allocation3 + $0x228] sm:$0xff] %vm1162_vm10, %v7011_v1  ;;  %v7019_v1 = vld [vmem:[#allocation2 + $0x30] sm:$0xfe]  }
 0x1b0   : > { %4688 = vmatprep.mubr.bf16.mxu1 %v3461_v48  ;;  %4600 = vmatmul.mubr.bf16.gmra.mrb[88].mxu0 %v3539_v13  ;;  %v3023_v48 = vrot.slane %v3021_v40, 1  ;;  %v3033_v13 = vshll.u32 %v6995_v2, 16  ;;  %v2339_v40 = vrot.slane %v2337_v35, 1  ;;  %v7018_v35 = vld [vmem:[#allocation2 + $0x78] sm:$0xff]  }
 0x1b1   : > { %4607 = vmatprep.mubr.bf16.mxu0 %v3549_v27  ;;  %v2315_v38 = vrot.slane %v2313_v30, 1  ;;  %v2332_v27 = vshll.u32 %v6999_v22, 16  ;;  %v7013_v22 = vld [vmem:[#allocation2 + $0x20] ss:$0 sps:$4 sm:$0x11]   ;;  %2781 = vst.msk [vmem:[#allocation3 + $0x270] sm:$0xff] %vm1162_vm10, %v7018_v35 }
 0x1b2   : > { %v3024_v56 = vsel %vm1355_vm8, %v3019_v47, %v3023_v48  ;;  %v3035_v20 = vrot.slane %v3033_v13, 1  ;;  %v3496_v48 = vld [vmem:[#allocation3 + $0x198] sm:$0xff]  ;;  %v6239_v13 = vpop.f32.mrb[6].mxu1 }
 0x1b3   : > { %v3548_v42 = vld [vmem:[#allocation3 + $0x338] sm:$0xff]  ;;  %v2316_v46 = vsel %vm1355_vm8, %v2311_v37, %v2315_v38  ;;  %3177 = vst.msk [vmem:[#allocation3 + $0x158] sm:$0xff] %vm1162_vm10, %v3024_v56  ;;  %v2334_v34 = vrot.slane %v2332_v27, 1  ;;  %v7003_v37 = vld [vmem:[#allocation2 + $0x60] sm:$0xff]  }
 0x1b4   : > { %2381 = vst.msk [vmem:[#allocation3 + $0x380] sm:$0xff] %vm1162_vm10, %v2316_v46  ;;  %v3567_v29 = vld [vmem:[#allocation3 + $0x3d0] sm:$0xff]  ;;  %2779 = vst.msk [vmem:[#allocation3 + $0x1e0] sm:$0xff] %vm1162_vm10, %v7003_v37 }
 0x1b5   : > { %v7002_v38 = vld [vmem:[#allocation2 + $0x68] ss:$0 sps:$4 sm:$0x11]   ;;  %v2335_v39 = vor.u32 %v2334_v34, %v2330_v26  ;;  %v3366_v26 = vrot.slane %v7013_v22, 1 }
 0x1b6   : > { %v3045_v43 = vshll.u32 %v7002_v38, 16  ;;  %v411_v46 = vld [vmem:[#allocation2 + $0xc8] sm:$0x1]  ;;  %v3514_v44 = vld [vmem:[#allocation3 + $0x228] sm:$0xff] }
 0x1b7   : > { %4689 = vmatmul.mubr.bf16.gmra.mrb[84].mxu1 %v3460_v59  ;;  %v2318_v59 = vshrl.u32 %v6992_v49, 16  ;;  %v2340_v49 = vsel %vm1355_vm8, %v2335_v39, %v2339_v40  ;;  %v412_v52 = vsel %vm7585_vm5, 0, %v411_v46  ;;  %v7017_v40 = vld [vmem:[#allocation2 + $0x80] ss:$0 sps:$4 sm:$0x11]  }
 0x1b8   : > { %4696 = vmatprep.mubr.bf16.mxu1 %v3470_v21  ;;  %4608 = vmatmul.mubr.bf16.gmra.mrb[92].mxu0 %v3548_v42  ;;  %v6998_v21 = vld [vmem:[#allocation2 + $0xbc] ss:$0 sps:$4 sm:$0x11]   ;;  %v3042_v42 = vrot.slane %v3040_v36, 1  ;;  %2383 = vst.msk [vmem:[#allocation3 + $0x410] sm:$0xff] %vm1162_vm10, %v2340_v49  ;;  %v3047_v53 = vrot.slane %v3045_v43, 1 }
 0x1b9   : > { %4615 = vmatprep.mubr.bf16.mxu0 %v3558_v17  ;;  %v2323_v7 = vor.u32 %v2322_v63, %v2318_v59  ;;  %v2604_v25 = vrot.slane %v6998_v21, 1  ;;  %413 = vst [vmem:[#allocation2 + $0xc8] sm:$0x1] %v412_v52  ;;  %v7009_v17 = vld [vmem:[#allocation2 + $0x6c] sm:$0xff]   ;;  %v7012_v21 = vld [vmem:[#allocation2 + $0x18] sm:$0xfe]  }
 0x1ba   : > { %v3488_v15 = vld [vmem:[#allocation3 + $0x158] sm:$0xff]  ;;  %v3043_v51 = vor.u32 %v3042_v42, %v3038_v31  ;;  %v3050_v33 = vshrl.u32 %v7009_v17, 16  ;;  %v3052_v2 = vshll.u32 %v7009_v17, 16  ;;  %v3365_v32 = vrot.slane %v7012_v21, 1  ;;  %v7014_v31 = vld [vmem:[#allocation2 + $0x24] sm:$0xfe]  }
 0x1bb   : > { %v3557_v9 = vld [vmem:[#allocation3 + $0x380] sm:$0xff]  ;;  %v2328_v18 = vsel %vm1355_vm8, %v2323_v7, %v2327_v10  ;;  %v2605_v30 = vsel %vm1756_vm11, %v2603_v4, %v2604_v25  ;;  %v6165_v7 = vpop.f32.mrb[5].mxu0  ;;  %v8031_v10 = vadd.f32 %v6237_v5, %v7997_v45  ;;  %v6240_v45 = vpop.f32.mrb[7].mxu1  ;;  %v3368_v38 = vrot.slane %v7014_v31, 1 }
 0x1bc   : > { %2382 = vst.msk [vmem:[#allocation3 + $0x3c8] sm:$0xff] %vm1162_vm10, %v2328_v18  ;;  %2639 = vst.msk [vmem:[#allocation3 + $0x418] sm:$0xff] %vm1162_vm10, %v2605_v30  ;;  %v3048_v59 = vsel %vm1355_vm8, %v3043_v51, %v3047_v53  ;;  %v8033_v12 = vadd.f32 %v6165_v7, %v6164_v57  ;;  %v3059_v18 = vrot.slane %v3057_v3, 1  ;;  %v6167_v4 = vpop.f32.mrb[6].mxu0  ;;  %v8039_v27 = vadd.f32 %v6240_v45, %v6239_v13  ;;  %v3523_v45 = vld [vmem:[#allocation3 + $0x270] sm:$0xff] }
 0x1bd   : > { %3179 = vst.msk [vmem:[#allocation3 + $0x1e8] sm:$0xff] %vm1162_vm10, %v3048_v59  ;;  %v6168_v23 = vpop.f32.mrb[7].mxu0  ;;  %v7015_v30 = vld [vmem:[#allocation2 + $0x2c] ss:$0 sps:$4 sm:$0x11]   ;;  %v3367_v36 = vsel %vm1756_vm11, %v3365_v32, %v3366_v26  ;;  %v7025_v26 = vld [vmem:[#allocation2 + $0x84] sm:$0xff]  }
 0x1be   : > { %v8042_v34 = vadd.f32 %v6168_v23, %v6167_v4  ;;  %3429 = vst.msk [vmem:[#allocation3 + $0x40] sm:$0xff] %vm1162_vm10, %v3367_v36  ;;  %v3369_v39 = vrot.slane %v7015_v30, 1  ;;  %v6170_v49 = vpop.f32.mrb[8].mxu0  ;;  %v7022_v21 = vld [vmem:[#allocation2 + $0x44] ss:$0 sps:$4 sm:$0x11]  }
 0x1bf   : > { %4697 = vmatmul.mubr.bf16.gmra.mrb[88].mxu1 %v3469_v24  ;;  %v3036_v24 = vsel %vm1355_vm8, %v3031_v19, %v3035_v20  ;;  %v3575_v14 = vld [vmem:[#allocation3 + $0x410] sm:$0xff]  ;;  %2782 = vst.msk [vmem:[#allocation3 + $0x2b8] sm:$0xff] %vm1162_vm10, %v7025_v26  ;;  %v7039_v26 = vld [vmem:[#allocation2 + $0x9c] sm:$0xff]  }
 0x1c0   : > { %4704 = vmatprep.mubr.bf16.mxu1 %v3479_v54  ;;  %4616 = vmatmul.mubr.bf16.gmra.mrb[96].mxu0 %v3557_v9  ;;  %3178 = vst.msk [vmem:[#allocation3 + $0x1a0] sm:$0xff] %vm1162_vm10, %v3036_v24  ;;  %v8020_v54 = vld [vmem:[#allocation2 + $0xc0] sm:$0xfe]   ;;  %v3054_v9 = vrot.slane %v3052_v2, 1  ;;  %v3370_v46 = vsel %vm1756_vm11, %v3368_v38, %v3369_v39  ;;  %2784 = vst.msk [vmem:[#allocation3 + $0x348] sm:$0xff] %vm1162_vm10, %v7039_v26 }
 0x1c1   : > { %4623 = vmatprep.mubr.bf16.mxu0 %v3567_v29  ;;  %v2606_v60 = vrot.slane %v8020_v54, 1  ;;  %v7016_v29 = vld [vmem:[#allocation2 + $0x78] sm:$0xff]   ;;  %3430 = vst.msk [vmem:[#allocation3 + $0x88] sm:$0xff] %vm1162_vm10, %v3370_v46 }
 0x1c2   : > { %v3055_v20 = vor.u32 %v3054_v9, %v3050_v33  ;;  %v3062_v42 = vshrl.u32 %v7016_v29, 16  ;;  %v3064_v43 = vshll.u32 %v7016_v29, 16  ;;  %v7020_v9 = vld [vmem:[#allocation2 + $0x38] ss:$0 sps:$4 sm:$0x11]  }
 0x1c3   : > { %v3566_v47 = vld [vmem:[#allocation3 + $0x3c8] sm:$0xff]  ;;  %v3576_v61 = vld [vmem:[#allocation3 + $0x418] sm:$0xff] }
 0x1c4   : > { %v3506_v24 = vld [vmem:[#allocation3 + $0x1e8] sm:$0xff]  ;;  %v3060_v25 = vsel %vm1355_vm8, %v3055_v20, %v3059_v18  ;;  %v3066_v52 = vrot.slane %v3064_v43, 1  ;;  %v3372_v18 = vrot.slane %v7020_v9, 1 }
 0x1c5   : > { %3180 = vst.msk [vmem:[#allocation3 + $0x230] sm:$0xff] %vm1162_vm10, %v3060_v25  ;;  %v7021_v20 = vld [vmem:[#allocation2 + $0x3c] sm:$0xfe]   ;;  %v7024_v25 = vld [vmem:[#allocation2 + $0x8c] ss:$0 sps:$4 sm:$0x11]  }
 0x1c6   : > { %v3067_v59 = vor.u32 %v3066_v52, %v3062_v42  ;;  %v3374_v23 = vrot.slane %v7021_v20, 1  ;;  %v3081_v35 = vshll.u32 %v7024_v25, 16  ;;  %v3453_v39 = vld [vmem:[#allocation3 + $0x40] sm:$0xff]  ;;  %v7027_v52 = vld [vmem:[#allocation2 + $0x50] ss:$0 sps:$4 sm:$0x11]  }
 0x1c7   : > { %4705 = vmatmul.mubr.bf16.gmra.mrb[92].mxu1 %v3478_v55  ;;  %v8022_v55 = vld [vmem:[#allocation2 + $0xc0] sm:$0xff]   ;;  %v3497_v56 = vld [vmem:[#allocation3 + $0x1a0] sm:$0xff] }
 0x1c8   : > { %4712 = vmatprep.mubr.bf16.mxu1 %v3488_v15  ;;  %4624 = vmatmul.mubr.bf16.gmra.mrb[100].mxu0 %v3566_v47  ;;  %v2342_v63 = vshrl.u32 %v8022_v55, 16  ;;  %v2344_v0 = vshll.u32 %v8022_v55, 16  ;;  %v3505_v15 = vld [vmem:[#allocation3 + $0x1e0] sm:$0xff]  ;;  %v3069_v47 = vshll.u32 %v7017_v40, 16 }
 0x1c9   : > { %4631 = vmatprep.mubr.bf16.mxu0 %v3576_v61  ;;  %v6171_v61 = vpop.f32.mrb[9].mxu0 }
 0x1ca   : > { %v2346_v37 = vrot.slane %v2344_v0, 1  ;;  %v8053_v2 = vadd.f32 %v6171_v61, %v6170_v49  ;;  %v6173_v13 = vpop.f32.mrb[10].mxu0  ;;  %v7026_v49 = vld [vmem:[#allocation2 + $0x48] sm:$0xfe]   ;;  %v7028_v61 = vld [vmem:[#allocation2 + $0x54] sm:$0xfe]  }
 0x1cb   : > { %v3380_v9 = vrot.slane %v7028_v61, 1 }
 0x1cc   : > { %v2347_v62 = vor.u32 %v2346_v37, %v2342_v63  ;;  %v3371_v63 = vrot.slane %v7019_v1, 1 }
 0x1ce   : > { %v3373_v4 = vsel %vm1756_vm11, %v3371_v63, %v3372_v18 }
 0x1cf   : > { %4713 = vmatmul.mubr.bf16.gmra.mrb[96].mxu1 %v3487_v16  ;;  %v883_v16 = vld [vmem:[#allocation2 + $0xc8] sm:$0x1]  ;;  %3431 = vst.msk [vmem:[#allocation3 + $0xd0] sm:$0xff] %vm1162_vm10, %v3373_v4 }
 0x1d0   : > { %4720 = vmatprep.mubr.bf16.mxu1 %v3497_v56  ;;  %4632 = vmatmul.mubr.bf16.gmra.mrb[104].mxu0 %v3575_v14  ;;  %v884_v19 = vsel %vm7579_vm3, %v722_v58, %v883_v16  ;;  %v3071_v56 = vrot.slane %v3069_v47, 1  ;;  %v3515_v58 = vld [vmem:[#allocation3 + $0x230] sm:$0xff]  ;;  %v6174_v16 = vpop.f32.mrb[11].mxu0  ;;  %v3083_v47 = vrot.slane %v3081_v35, 1  ;;  %v7033_v35 = vld [vmem:[#allocation2 + $0x60] sm:$0xfe]  }
 0x1d1   : > { %885 = vst [vmem:[#allocation2 + $0xc8] sm:$0x1] %v884_v19  ;;  %v7023_v14 = vld [vmem:[#allocation2 + $0x84] sm:$0xff]   ;;  %v8063_v54 = vadd.f32 %v6174_v16, %v6173_v13  ;;  %v6176_v36 = vpop.f32.mrb[12].mxu0  ;;  %v3532_v16 = vld [vmem:[#allocation3 + $0x2b8] sm:$0xff] }
 0x1d2   : > { %v3072_v7 = vsel %vm1355_vm8, %v3067_v59, %v3071_v56  ;;  %v3074_v22 = vshrl.u32 %v7023_v14, 16  ;;  %v3076_v32 = vshll.u32 %v7023_v14, 16  ;;  %v6177_v43 = vpop.f32.mrb[13].mxu0  ;;  %v3462_v13 = vld [vmem:[#allocation3 + $0x88] sm:$0xff] }
 0x1d3   : > { %3181 = vst.msk [vmem:[#allocation3 + $0x278] sm:$0xff] %vm1162_vm10, %v3072_v7 }
 0x1d4   : > { %v3078_v30 = vrot.slane %v3076_v32, 1 }
 0x1d6   : > { %v3079_v46 = vor.u32 %v3078_v30, %v3074_v22 }
 0x1d7   : > { %4721 = vmatmul.mubr.bf16.gmra.mrb[100].mxu1 %v3496_v48  ;;  %v6242_v48 = vpop.f32.mrb[8].mxu1 }
 0x1d8   : > { %4728 = vmatprep.mubr.bf16.mxu1 %v3506_v24  ;;  %v7006_v51 = vld [vmem:[#allocation2 + $0xc8] ss:$0 sps:$4 sm:$0x11]   ;;  %v6243_v17 = vpop.f32.mrb[9].mxu1  ;;  %v3375_v24 = vrot.slane %v7022_v21, 1 }
 0x1d9   : > { %v7008_v53 = vld [vmem:[#allocation2 + $0xc8] ss:$0 sps:$4 sm:$0x11]   ;;  %v2607_v57 = vrot.slane %v7006_v51, 1  ;;  %v8051_v33 = vadd.f32 %v6243_v17, %v6242_v48  ;;  %v6245_v3 = vpop.f32.mrb[10].mxu1  ;;  %v8074_v48 = vadd.f32 %v6177_v43, %v6176_v36  ;;  %v6179_v51 = vpop.f32.mrb[14].mxu0 }
 0x1da   : > { %v2349_v0 = vshll.u32 %v7008_v53, 16  ;;  %v3376_v31 = vsel %vm1756_vm11, %v3374_v23, %v3375_v24  ;;  %v3524_v40 = vld [vmem:[#allocation3 + $0x278] sm:$0xff]  ;;  %v3378_v17 = vrot.slane %v7027_v52, 1 }
 0x1db   : > { %v2608_v5 = vsel %vm1756_vm11, %v2606_v60, %v2607_v57  ;;  %3432 = vst.msk [vmem:[#allocation3 + $0x118] sm:$0xff] %vm1162_vm10, %v3376_v31  ;;  %v3084_v57 = vsel %vm1355_vm8, %v3079_v46, %v3083_v47 }
 0x1dc   : > { %2640 = vst.msk [vmem:[#allocation3 + $0x460] sm:$0xff] %vm1162_vm10, %v2608_v5  ;;  %v2351_v55 = vrot.slane %v2349_v0, 1  ;;  %3182 = vst.msk [vmem:[#allocation3 + $0x2c0] sm:$0xff] %vm1162_vm10, %v3084_v57  ;;  %v7030_v0 = vld [vmem:[#allocation2 + $0x90] sm:$0xff]  }
 0x1dd   : > { %v7032_v5 = vld [vmem:[#allocation2 + $0x90] sm:$0xff]   ;;  %v3086_v63 = vshrl.u32 %v7030_v0, 16  ;;  %v3088_v18 = vshll.u32 %v7030_v0, 16 }
 0x1de   : > { %v2352_v60 = vsel %vm1355_vm8, %v2347_v62, %v2351_v55  ;;  %v6180_v62 = vpop.f32.mrb[15].mxu0  ;;  %v7031_v55 = vld [vmem:[#allocation2 + $0x98] ss:$0 sps:$4 sm:$0x11]   ;;  %2783 = vst.msk [vmem:[#allocation3 + $0x300] sm:$0xff] %vm1162_vm10, %v7032_v5 }
 0x1df   : > { %4729 = vmatmul.mubr.bf16.gmra.mrb[104].mxu1 %v3505_v15  ;;  %v6246_v15 = vpop.f32.mrb[11].mxu1  ;;  %2384 = vst.msk [vmem:[#allocation3 + $0x458] sm:$0xff] %vm1162_vm10, %v2352_v60  ;;  %v8080_v1 = vadd.f32 %v6180_v62, %v6179_v51  ;;  %v3093_v21 = vshll.u32 %v7031_v55, 16  ;;  %v6182_v22 = vpop.f32.mrb[16].mxu0  ;;  %v3090_v23 = vrot.slane %v3088_v18, 1 }
 0x1e0   : > { %4736 = vmatprep.mubr.bf16.mxu1 %v3515_v58  ;;  %v8061_v19 = vadd.f32 %v6246_v15, %v6245_v3  ;;  %v6248_v29 = vpop.f32.mrb[12].mxu1  ;;  %v3377_v58 = vrot.slane %v7026_v49, 1  ;;  %v7029_v3 = vld [vmem:[#allocation2 + $0x5c] ss:$0 sps:$4 sm:$0x11]   ;;  %v3471_v15 = vld [vmem:[#allocation3 + $0xd0] sm:$0xff] }
 0x1e1   : > { %v6249_v37 = vpop.f32.mrb[13].mxu1  ;;  %v3381_v14 = vrot.slane %v7029_v3, 1  ;;  %v6183_v25 = vpop.f32.mrb[17].mxu0  ;;  %v3095_v31 = vrot.slane %v3093_v21, 1  ;;  %v3091_v36 = vor.u32 %v3090_v23, %v3086_v63  ;;  %v7035_v57 = vld [vmem:[#allocation2 + $0x6c] sm:$0xfe]  }
 0x1e2   : > { %v8072_v42 = vadd.f32 %v6249_v37, %v6248_v29  ;;  %v3379_v7 = vsel %vm1756_vm11, %v3377_v58, %v3378_v17  ;;  %v8087_v30 = vadd.f32 %v6183_v25, %v6182_v22  ;;  %v7036_v58 = vld [vmem:[#allocation2 + $0x74] ss:$0 sps:$4 sm:$0x11]   ;;  %v3386_v0 = vrot.slane %v7035_v57, 1  ;;  %v7040_v22 = vld [vmem:[#allocation2 + $0x78] sm:$0xfe]  }
 0x1e3   : > { %v3585_v38 = vld [vmem:[#allocation3 + $0x460] sm:$0xff]  ;;  %3433 = vst.msk [vmem:[#allocation3 + $0x160] sm:$0xff] %vm1162_vm10, %v3379_v7  ;;  %v3382_v20 = vsel %vm1756_vm11, %v3380_v9, %v3381_v14  ;;  %v3096_v49 = vsel %vm1355_vm8, %v3091_v36, %v3095_v31  ;;  %v3387_v3 = vrot.slane %v7036_v58, 1  ;;  %v7038_v5 = vld [vmem:[#allocation2 + $0xa4] ss:$0 sps:$4 sm:$0x11]  }
 0x1e4   : > { %4639 = vmatprep.mubr.bf16.mxu0 %v3585_v38  ;;  %3434 = vst.msk [vmem:[#allocation3 + $0x1a8] sm:$0xff] %vm1162_vm10, %v3382_v20  ;;  %v3533_v29 = vld [vmem:[#allocation3 + $0x2c0] sm:$0xff]  ;;  %v7034_v38 = vld [vmem:[#allocation2 + $0x68] ss:$0 sps:$4 sm:$0x11]   ;;  %3183 = vst.msk [vmem:[#allocation3 + $0x308] sm:$0xff] %vm1162_vm10, %v3096_v49 }
 0x1e5   : > { %v3384_v51 = vrot.slane %v7034_v38, 1  ;;  %v3388_v14 = vsel %vm1756_vm11, %v3386_v0, %v3387_v3  ;;  %v3105_v55 = vshll.u32 %v7038_v5, 16  ;;  %v3389_v26 = vrot.slane %v7040_v22, 1  ;;  %v7043_v38 = vld [vmem:[#allocation2 + $0x8c] ss:$0 sps:$4 sm:$0x11]  }
 0x1e6   : > { %v3584_v56 = vld [vmem:[#allocation3 + $0x458] sm:$0xff]  ;;  %3436 = vst.msk [vmem:[#allocation3 + $0x238] sm:$0xff] %vm1162_vm10, %v3388_v14  ;;  %v3393_v49 = vrot.slane %v7043_v38, 1  ;;  %v3550_v58 = vld [vmem:[#allocation3 + $0x348] sm:$0xff] }
 0x1e7   : > { %4737 = vmatmul.mubr.bf16.gmra.mrb[108].mxu1 %v3514_v44  ;;  %v6251_v44 = vpop.f32.mrb[14].mxu1  ;;  %4640 = vmatmul.mubr.bf16.gmra.mrb[108].mxu0 %v3584_v56  ;;  %v3480_v56 = vld [vmem:[#allocation3 + $0x118] sm:$0xff]  ;;  %v3107_v21 = vrot.slane %v3105_v55, 1 }
 0x1e8   : > { %4744 = vmatprep.mubr.bf16.mxu1 %v3524_v40  ;;  %v6252_v53 = vpop.f32.mrb[15].mxu1  ;;  %6630 = vmatprep.mubr.bf16.mxu0 %v3453_v39  ;;  %v6185_v39 = vpop.f32.mrb[18].mxu0 }
 0x1e9   : > { %v8077_v59 = vadd.f32 %v6252_v53, %v6251_v44  ;;  %v6270_v60 = vpop.f32.mrb[16].mxu1  ;;  %v3383_v44 = vrot.slane %v7033_v35, 1  ;;  %v6186_v47 = vpop.f32.mrb[19].mxu0  ;;  %v7042_v35 = vld [vmem:[#allocation2 + $0x84] sm:$0xfe]  }
 0x1ea   : > { %v6271_v4 = vpop.f32.mrb[17].mxu1  ;;  %v8094_v52 = vadd.f32 %v6186_v47, %v6185_v39  ;;  %v3489_v62 = vld [vmem:[#allocation3 + $0x160] sm:$0xff]  ;;  %v6188_v9 = vpop.f32.mrb[20].mxu0  ;;  %v7046_v47 = vld [vmem:[#allocation2 + $0xa8] sm:$0xff]  }
 0x1eb   : > { %v6272_v24 = vadd.f32 %v6271_v4, %v6270_v60  ;;  %v6273_v32 = vpop.f32.mrb[18].mxu1  ;;  %v3385_v61 = vsel %vm1756_vm11, %v3383_v44, %v3384_v51  ;;  %v7041_v4 = vld [vmem:[#allocation2 + $0x80] ss:$0 sps:$4 sm:$0x11]   ;;  %v3392_v44 = vrot.slane %v7042_v35, 1  ;;  %2785 = vst.msk [vmem:[#allocation3 + $0x390] sm:$0xff] %vm1162_vm10, %v7046_v47 }
 0x1ec   : > { %v6274_v40 = vpop.f32.mrb[19].mxu1  ;;  %3435 = vst.msk [vmem:[#allocation3 + $0x1f0] sm:$0xff] %vm1162_vm10, %v3385_v61  ;;  %v3498_v25 = vld [vmem:[#allocation3 + $0x1a8] sm:$0xff]  ;;  %v7045_v51 = vld [vmem:[#allocation2 + $0xb0] ss:$0 sps:$4 sm:$0x11]  }
 0x1ed   : > { %v8090_v37 = vadd.f32 %v6272_v24, %v7938_v41  ;;  %v6275_v46 = vadd.f32 %v6274_v40, %v6273_v32  ;;  %v6276_v17 = vpop.f32.mrb[20].mxu1  ;;  %v7044_v40 = vld [vmem:[#allocation2 + $0xa8] sm:$0xff]   ;;  %v3117_v61 = vshll.u32 %v7045_v51, 16 }
 0x1ee   : > { %v6277_v63 = vpop.f32.mrb[21].mxu1 }
 0x1ef   : > { %4745 = vmatmul.mubr.bf16.gmra.mrb[112].mxu1 %v3523_v45  ;;  %v7037_v45 = vld [vmem:[#allocation2 + $0x9c] sm:$0xff]   ;;  %6631 = vmatmul.mubr.bf16.vlgmr.msra.gmra.mrb[112].mxu0 %v3462_v13  ;;  %v8098_v41 = vadd.f32 %v6275_v46, %v8001_v50  ;;  %v6189_v50 = vpop.f32.mrb[21].mxu0  ;;  %v6279_v60 = vpop.f32.mrb[22].mxu1 }
 0x1f0   : > { %4752 = vmatprep.mubr.bf16.mxu1 %v3533_v29  ;;  %v3098_v43 = vshrl.u32 %v7037_v45, 16  ;;  %6634 = vmatprep.mubr.bf16.mxu0 %v3471_v15  ;;  %v3100_v53 = vshll.u32 %v7037_v45, 16  ;;  %v3541_v13 = vld [vmem:[#allocation3 + $0x300] sm:$0xff]  ;;  %v8104_v18 = vadd.f32 %v6189_v50, %v6188_v9  ;;  %v6191_v20 = vpop.f32.mrb[22].mxu0  ;;  %v3542_v45 = vld [vmem:[#allocation3 + $0x308] sm:$0xff]  ;;  %v6280_v24 = vpop.f32.mrb[23].mxu1 }
 0x1f1   : > { %v3390_v29 = vrot.slane %v7041_v4, 1  ;;  %v6281_v31 = vadd.f32 %v6280_v24, %v6279_v60  ;;  %v6192_v39 = vpop.f32.mrb[23].mxu0  ;;  %v6282_v57 = vpop.f32.mrb[24].mxu1  ;;  %v7053_v9 = vld [vmem:[#allocation2 + $0xb4] sm:$0xff]  }
 0x1f2   : > { %v3102_v7 = vrot.slane %v3100_v53, 1  ;;  %v8115_v46 = vadd.f32 %v6192_v39, %v6191_v20  ;;  %v3110_v53 = vshrl.u32 %v7044_v40, 16  ;;  %v7047_v60 = vld [vmem:[#allocation2 + $0x90] sm:$0xfe]   ;;  %2786 = vst.msk [vmem:[#allocation3 + $0x3d8] sm:$0xff] %vm1162_vm10, %v7053_v9 }
 0x1f3   : > { %v3507_v36 = vld [vmem:[#allocation3 + $0x1f0] sm:$0xff]  ;;  %v7048_v20 = vld [vmem:[#allocation2 + $0x98] ss:$0 sps:$4 sm:$0x11]  }
 0x1f4   : > { %v3103_v15 = vor.u32 %v3102_v7, %v3098_v43  ;;  %v3391_v43 = vsel %vm1756_vm11, %v3389_v26, %v3390_v29  ;;  %v3396_v24 = vrot.slane %v7048_v20, 1 }
 0x1f5   : > { %3437 = vst.msk [vmem:[#allocation3 + $0x280] sm:$0xff] %vm1162_vm10, %v3391_v43  ;;  %v7052_v43 = vld [vmem:[#allocation2 + $0xbc] ss:$0 sps:$4 sm:$0x11]  }
 0x1f6   : > { %v3108_v32 = vsel %vm1355_vm8, %v3103_v15, %v3107_v21 }
 0x1f7   : > { %4753 = vmatmul.mubr.bf16.gmra.mrb[116].mxu1 %v3532_v16  ;;  %6635 = vmatmul.mubr.bf16.gmra.mrb[116].mxu0 %v3480_v56  ;;  %v6278_v16 = vadd.f32 %v6277_v63, %v6276_v17  ;;  %3184 = vst.msk [vmem:[#allocation3 + $0x350] sm:$0xff] %vm1162_vm10, %v3108_v32  ;;  %v3112_v56 = vshll.u32 %v7044_v40, 16  ;;  %v3394_v17 = vsel %vm1756_vm11, %v3392_v44, %v3393_v49  ;;  %v3516_v63 = vld [vmem:[#allocation3 + $0x238] sm:$0xff]  ;;  %v3559_v49 = vld [vmem:[#allocation3 + $0x390] sm:$0xff] }
 0x1f8   : > { %6638 = vmatprep.mubr.bf16.mxu0 %v3489_v62  ;;  %4760 = vmatprep.mubr.bf16.mxu1 %v3542_v45  ;;  %v6283_v62 = vpop.f32.mrb[25].mxu1  ;;  %3438 = vst.msk [vmem:[#allocation3 + $0x2c8] sm:$0xff] %vm1162_vm10, %v3394_v17  ;;  %v3395_v45 = vrot.slane %v7047_v60, 1  ;;  %v7051_v32 = vld [vmem:[#allocation2 + $0xb4] sm:$0xff]  }
 0x1f9   : > { %v8107_v23 = vadd.f32 %v6278_v16, %v8033_v12  ;;  %v8113_v12 = vadd.f32 %v6281_v31, %v8042_v34  ;;  %v6194_v34 = vpop.f32.mrb[24].mxu0  ;;  %v3114_v0 = vrot.slane %v3112_v56, 1  ;;  %v6284_v3 = vadd.f32 %v6283_v62, %v6282_v57  ;;  %v6285_v7 = vpop.f32.mrb[26].mxu1  ;;  %v7050_v31 = vld [vmem:[#allocation2 + $0xa4] ss:$0 sps:$4 sm:$0x11]  }
 0x1fa   : > { %v6195_v5 = vpop.f32.mrb[25].mxu0  ;;  %v6286_v21 = vpop.f32.mrb[27].mxu1  ;;  %v3399_v40 = vrot.slane %v7050_v31, 1  ;;  %v3122_v44 = vshrl.u32 %v7051_v32, 16  ;;  %v3124_v47 = vshll.u32 %v7051_v32, 16  ;;  %v7058_v62 = vld [vmem:[#allocation2 + $0xc0] sm:$0xff]  }
 0x1fb   : > { %v8121_v14 = vadd.f32 %v6195_v5, %v6194_v34  ;;  %v6197_v55 = vpop.f32.mrb[26].mxu0  ;;  %v3115_v15 = vor.u32 %v3114_v0, %v3110_v53  ;;  %v8124_v16 = vadd.f32 %v6284_v3, %v8053_v2  ;;  %v6288_v26 = vpop.f32.mrb[28].mxu1  ;;  %v7049_v2 = vld [vmem:[#allocation2 + $0x9c] sm:$0xfe]   ;;  %v3129_v53 = vshll.u32 %v7052_v43, 16 }
 0x1fc   : > { %v6198_v22 = vpop.f32.mrb[27].mxu0  ;;  %v3525_v29 = vld [vmem:[#allocation3 + $0x280] sm:$0xff]  ;;  %v3398_v39 = vrot.slane %v7049_v2, 1  ;;  %v6289_v57 = vpop.f32.mrb[29].mxu1  ;;  %v7054_v5 = vld [vmem:[#allocation2 + $0xa8] sm:$0xfe]  }
 0x1fd   : > { %v8129_v35 = vadd.f32 %v6198_v22, %v6197_v55  ;;  %v6200_v56 = vpop.f32.mrb[28].mxu0  ;;  %v6290_v17 = vadd.f32 %v6289_v57, %v6288_v26  ;;  %v6291_v34 = vpop.f32.mrb[30].mxu1  ;;  %v3131_v0 = vrot.slane %v3129_v53, 1  ;;  %v3401_v60 = vrot.slane %v7054_v5, 1  ;;  %v7060_v31 = vld [vmem:[#allocation2 + $0xc0] sm:$0xff]  }
 0x1fe   : > { %v3551_v50 = vld [vmem:[#allocation3 + $0x350] sm:$0xff]  ;;  %v3400_v51 = vsel %vm1756_vm11, %v3398_v39, %v3399_v40  ;;  %v3134_v22 = vshrl.u32 %v7058_v62, 16  ;;  %v7057_v32 = vld [vmem:[#allocation2 + $0xbc] ss:$0 sps:$4 sm:$0x11]   ;;  %v3136_v26 = vshll.u32 %v7058_v62, 16 }
 0x1ff   : > { %4761 = vmatmul.mubr.bf16.gmra.mrb[120].mxu1 %v3541_v13  ;;  %6639 = vmatmul.mubr.bf16.gmra.mrb[120].mxu0 %v3498_v25  ;;  %v3119_v13 = vrot.slane %v3117_v61, 1  ;;  %v6287_v25 = vadd.f32 %v6286_v21, %v6285_v7  ;;  %3440 = vst.msk [vmem:[#allocation3 + $0x358] sm:$0xff] %vm1162_vm10, %v3400_v51  ;;  %v6201_v61 = vpop.f32.mrb[29].mxu0  ;;  %v8141_v55 = vadd.f32 %v6290_v17, %v8074_v48  ;;  %v7059_v39 = vld [vmem:[#allocation2 + $0xc8] ss:$0 sps:$4 sm:$0x11]  }
 0x200   : > { %6642 = vmatprep.mubr.bf16.mxu0 %v3507_v36  ;;  %4768 = vmatprep.mubr.bf16.mxu1 %v3551_v50  ;;  %v3397_v36 = vsel %vm1756_vm11, %v3395_v45, %v3396_v24  ;;  %v8138_v3 = vadd.f32 %v6201_v61, %v6200_v56  ;;  %v6203_v7 = vpop.f32.mrb[30].mxu0  ;;  %v6292_v50 = vpop.f32.mrb[31].mxu1  ;;  %v3138_v40 = vrot.slane %v3136_v26, 1  ;;  %2787 = vst.msk [vmem:[#allocation3 + $0x420] sm:$0xff] %vm1162_vm10, %v7060_v31  ;;  %v3141_v53 = vshll.u32 %v7059_v39, 16 }
 0x201   : > { %v3120_v4 = vsel %vm1355_vm8, %v3115_v15, %v3119_v13  ;;  %v8133_v38 = vadd.f32 %v6287_v25, %v8063_v54  ;;  %3439 = vst.msk [vmem:[#allocation3 + $0x310] sm:$0xff] %vm1162_vm10, %v3397_v36  ;;  %v3126_v54 = vrot.slane %v3124_v47, 1  ;;  %v6204_v15 = vpop.f32.mrb[31].mxu0  ;;  %v6293_v20 = vadd.f32 %v6292_v50, %v6291_v34  ;;  %v7056_v25 = vld [vmem:[#allocation2 + $0xb4] sm:$0xfe]   ;;  %v6294_v43 = vpop.f32.mrb[32].mxu1 }
 0x202   : > { %3185 = vst.msk [vmem:[#allocation3 + $0x398] sm:$0xff] %vm1162_vm10, %v3120_v4  ;;  %v8143_v21 = vadd.f32 %v6204_v15, %v6203_v7  ;;  %v3404_v2 = vrot.slane %v7056_v25, 1  ;;  %v3405_v36 = vrot.slane %v7057_v32, 1  ;;  %v3139_v51 = vor.u32 %v3138_v40, %v3134_v22  ;;  %v6295_v56 = vpop.f32.mrb[33].mxu1  ;;  %v7061_v62 = vld [vmem:[#allocation2 + $0xc0] sm:$0xfe]  }
 0x203   : > { %v3127_v13 = vor.u32 %v3126_v54, %v3122_v44  ;;  %v8148_v48 = vadd.f32 %v6293_v20, %v8080_v1  ;;  %v6206_v44 = vpop.f32.mrb[32].mxu0  ;;  %v6297_v17 = vpop.f32.mrb[34].mxu1  ;;  %v3143_v34 = vrot.slane %v3141_v53, 1  ;;  %v3407_v50 = vrot.slane %v7061_v62, 1 }
 0x204   : > { %v3406_v1 = vsel %vm1756_vm11, %v3404_v2, %v3405_v36  ;;  %v6207_v57 = vpop.f32.mrb[33].mxu0  ;;  %v7063_v2 = vld [vmem:[#allocation2 + $0xcc] sm:$0xfe]  }
 0x205   : > { %v3132_v45 = vsel %vm1355_vm8, %v3127_v13, %v3131_v0  ;;  %3442 = vst.msk [vmem:[#allocation3 + $0x3e8] sm:$0xff] %vm1162_vm10, %v3406_v1  ;;  %v8155_v54 = vadd.f32 %v6207_v57, %v6206_v44  ;;  %v6209_v61 = vpop.f32.mrb[34].mxu0  ;;  %v7062_v0 = vld [vmem:[#allocation2 + $0xc8] ss:$0 sps:$4 sm:$0x11]  }
 0x206   : > { %3186 = vst.msk [vmem:[#allocation3 + $0x3e0] sm:$0xff] %vm1162_vm10, %v3132_v45  ;;  %v3552_v47 = vld [vmem:[#allocation3 + $0x358] sm:$0xff]  ;;  %v3408_v15 = vrot.slane %v7062_v0, 1  ;;  %v358_v45 = vld [vmem:[#allocation2 + $0xcc] sm:$0x1] }
 0x207   : > { %4769 = vmatmul.mubr.bf16.gmra.mrb[124].mxu1 %v3550_v58  ;;  %6643 = vmatmul.mubr.bf16.gmra.mrb[124].mxu0 %v3516_v63  ;;  %v3534_v58 = vld [vmem:[#allocation3 + $0x2c8] sm:$0xff]  ;;  %v7055_v63 = vld [vmem:[#allocation2 + $0xb0] ss:$0 sps:$4 sm:$0x11]   ;;  %v414_v13 = vld [vmem:[#allocation2 + $0xd4] sm:$0x1] }
 0x208   : > { %6646 = vmatprep.mubr.bf16.mxu0 %v3525_v29  ;;  %v3543_v4 = vld [vmem:[#allocation3 + $0x310] sm:$0xff]  ;;  %v3402_v24 = vrot.slane %v7055_v63, 1  ;;  %v3144_v63 = vsel %vm1355_vm8, %v3139_v51, %v3143_v34  ;;  %v415_v22 = vsel %vm7585_vm5, 0, %v414_v13  ;;  %v359_v26 = vsel %vm7579_vm3, 0, %v358_v45  ;;  %v3577_v8 = vld [vmem:[#allocation3 + $0x420] sm:$0xff] }
 0x209   : > { %v3560_v9 = vld [vmem:[#allocation3 + $0x398] sm:$0xff]  ;;  %3187 = vst.msk [vmem:[#allocation3 + $0x428] sm:$0xff] %vm1162_vm10, %v3144_v63  ;;  %416 = vst [vmem:[#allocation2 + $0xd4] sm:$0x1] %v415_v22 }
 0x20a   : > { %4776 = vmatprep.mubr.bf16.mxu1 %v3560_v9  ;;  %v3403_v29 = vsel %vm1756_vm11, %v3401_v60, %v3402_v24  ;;  %v6298_v9 = vpop.f32.mrb[35].mxu1  ;;  %v3409_v24 = vsel %vm1756_vm11, %v3407_v50, %v3408_v15  ;;  %360 = vst [vmem:[#allocation2 + $0xcc] sm:$0x1] %v359_v26 }
 0x20b   : > { %3441 = vst.msk [vmem:[#allocation3 + $0x3a0] sm:$0xff] %vm1162_vm10, %v3403_v29  ;;  %v6299_v60 = vadd.f32 %v6298_v9, %v6297_v17  ;;  %3443 = vst.msk [vmem:[#allocation3 + $0x430] sm:$0xff] %vm1162_vm10, %v3409_v24  ;;  %v3410_v17 = vrot.slane %v7063_v2, 1 }
 0x20c   : > { %v3570_v40 = vld [vmem:[#allocation3 + $0x3e8] sm:$0xff] }
 0x20d   : > { %v3569_v5 = vld [vmem:[#allocation3 + $0x3e0] sm:$0xff]  ;;  %v8166_v25 = vadd.f32 %v6299_v60, %v8094_v52 }
 0x20f   : > { %4777 = vmatmul.mubr.bf16.gmra.mrb[128].mxu1 %v3559_v49  ;;  %6647 = vmatmul.mubr.bf16.gmra.mrb[128].mxu0 %v3534_v58  ;;  %v3568_v49 = vld [vmem:[#allocation3 + $0x3d8] sm:$0xff]  ;;  %v6296_v58 = vadd.f32 %v6295_v56, %v6294_v43 }
 0x210   : > { %6650 = vmatprep.mubr.bf16.mxu0 %v3543_v4  ;;  %4784 = vmatprep.mubr.bf16.mxu1 %v3569_v5  ;;  %v6210_v4 = vpop.f32.mrb[35].mxu0  ;;  %v7066_v63 = vld [vmem:[#allocation2 + $0xd4] ss:$0 sps:$4 sm:$0x11]  }
 0x211   : > { %v8158_v7 = vadd.f32 %v6296_v58, %v8087_v30  ;;  %v6300_v30 = vpop.f32.mrb[36].mxu1  ;;  %v8168_v32 = vadd.f32 %v6210_v4, %v6209_v61  ;;  %v6212_v29 = vpop.f32.mrb[36].mxu0  ;;  %v3578_v58 = vld [vmem:[#allocation3 + $0x428] sm:$0xff]  ;;  %v7065_v60 = vld [vmem:[#allocation2 + $0xcc] sm:$0xff]  }
 0x212   : > { %v3561_v20 = vld [vmem:[#allocation3 + $0x3a0] sm:$0xff]  ;;  %v6301_v11 = vpop.f32.mrb[37].mxu1  ;;  %v6213_v36 = vpop.f32.mrb[37].mxu0  ;;  %v3579_v13 = vld [vmem:[#allocation3 + $0x430] sm:$0xff]  ;;  %v3148_v24 = vshll.u32 %v7065_v60, 16 }
 0x213   : > { %v6302_v31 = vadd.f32 %v6301_v11, %v6300_v30  ;;  %v6303_v39 = vpop.f32.mrb[38].mxu1  ;;  %v8173_v43 = vadd.f32 %v6213_v36, %v6212_v29  ;;  %v6215_v52 = vpop.f32.mrb[38].mxu0  ;;  %v3146_v30 = vshrl.u32 %v7065_v60, 16 }
 0x214   : > { %v6304_v44 = vpop.f32.mrb[39].mxu1  ;;  %v6216_v1 = vpop.f32.mrb[39].mxu0 }
 0x215   : > { %v6306_v51 = vpop.f32.mrb[40].mxu1  ;;  %v8178_v53 = vadd.f32 %v6216_v1, %v6215_v52  ;;  %v6218_v56 = vpop.f32.mrb[40].mxu0 }
 0x216   : > { %v6307_v57 = vpop.f32.mrb[41].mxu1  ;;  %v6219_v62 = vpop.f32.mrb[41].mxu0 }
 0x217   : > { %6651 = vmatmul.mubr.bf16.gmra.mrb[132].mxu0 %v3552_v47  ;;  %4785 = vmatmul.mubr.bf16.gmra.mrb[132].mxu1 %v3568_v49  ;;  %v8176_v47 = vadd.f32 %v6302_v31, %v8104_v18  ;;  %v6305_v49 = vadd.f32 %v6304_v44, %v6303_v39  ;;  %v6308_v34 = vadd.f32 %v6307_v57, %v6306_v51  ;;  %v6309_v0 = vpop.f32.mrb[42].mxu1  ;;  %v7064_v18 = vld [vmem:[#allocation2 + $0xd4] ss:$0 sps:$4 sm:$0x11]   ;;  %v6221_v9 = vpop.f32.mrb[42].mxu0  ;;  %v3150_v39 = vrot.slane %v3148_v24, 1 }
 0x218   : > { %6654 = vmatprep.mubr.bf16.mxu0 %v3561_v20  ;;  %4792 = vmatprep.mubr.bf16.mxu1 %v3578_v58  ;;  %v8183_v5 = vadd.f32 %v6219_v62, %v6218_v56  ;;  %v3411_v15 = vrot.slane %v7064_v18, 1  ;;  %v3153_v20 = vshll.u32 %v7066_v63, 16  ;;  %v6310_v22 = vpop.f32.mrb[43].mxu1  ;;  %v6222_v4 = vpop.f32.mrb[43].mxu0 }
 0x219   : > { %v8181_v61 = vadd.f32 %v6305_v49, %v8115_v46  ;;  %v8186_v50 = vadd.f32 %v6308_v34, %v8121_v14  ;;  %v7067_v46 = vld [vmem:[#allocation2 + $0xcc] sm:$0xff]   ;;  %v6311_v26 = vadd.f32 %v6310_v22, %v6309_v0  ;;  %v6312_v29 = vpop.f32.mrb[44].mxu1  ;;  %v8191_v14 = vadd.f32 %v6222_v4, %v6221_v9 }
 0x21a   : > { %v3412_v45 = vsel %vm1756_vm11, %v3410_v17, %v3411_v15  ;;  %v6224_v11 = vpop.f32.mrb[44].mxu0  ;;  %v3155_v2 = vrot.slane %v3153_v20, 1  ;;  %2788 = vst.msk [vmem:[#allocation3 + $0x468] sm:$0xff] %vm1162_vm10, %v7067_v46  ;;  %v6313_v31 = vpop.f32.mrb[45].mxu1  ;;  %v3151_v56 = vor.u32 %v3150_v39, %v3146_v30 }
 0x21b   : > { %3444 = vst.msk [vmem:[#allocation3 + $0x478] sm:$0xff] %vm1162_vm10, %v3412_v45  ;;  %v6225_v36 = vpop.f32.mrb[45].mxu0  ;;  %v6314_v52 = vadd.f32 %v6313_v31, %v6312_v29  ;;  %v6315_v49 = vpop.f32.mrb[46].mxu1 }
 0x21c   : > { %v8196_v44 = vadd.f32 %v6225_v36, %v6224_v11  ;;  %v6227_v1 = vpop.f32.mrb[46].mxu0  ;;  %v6316_v51 = vpop.f32.mrb[47].mxu1 }
 0x21d   : > { %v8199_v57 = vadd.f32 %v6314_v52, %v8138_v3  ;;  %v6317_v58 = vadd.f32 %v6316_v51, %v6315_v49  ;;  %v6318_v62 = vpop.f32.mrb[48].mxu1 }
 0x21e   : > { %v6319_v18 = vpop.f32.mrb[49].mxu1 }
 0x21f   : > { %6655 = vmatmul.mubr.bf16.gmra.mrb[136].mxu0 %v3570_v40  ;;  %4793 = vmatmul.mubr.bf16.gmra.mrb[136].mxu1 %v3577_v8  ;;  %v8194_v40 = vadd.f32 %v6311_v26, %v8129_v35  ;;  %v6228_v8 = vpop.f32.mrb[47].mxu0  ;;  %v3156_v35 = vsel %vm1355_vm8, %v3151_v56, %v3155_v2  ;;  %v8205_v9 = vadd.f32 %v6317_v58, %v8143_v21  ;;  %v6321_v60 = vpop.f32.mrb[50].mxu1 }
 0x220   : > { %6658 = vmatprep.mubr.bf16.mxu0 %v3579_v13  ;;  %v8201_v17 = vadd.f32 %v6228_v8, %v6227_v1  ;;  %v6320_v15 = vadd.f32 %v6319_v18, %v6318_v62  ;;  %3188 = vst.msk [vmem:[#allocation3 + $0x470] sm:$0xff] %vm1162_vm10, %v3156_v35  ;;  %v6322_v20 = vpop.f32.mrb[51].mxu1 }
 0x221   : > { %v6323_v30 = vadd.f32 %v6322_v20, %v6321_v60  ;;  %v6324_v24 = vpop.f32.mrb[52].mxu1  ;;  %v3586_v1 = vld [vmem:[#allocation3 + $0x468] sm:$0xff] }
 0x222   : > { %v6382_v34 = vpop.f32.mrb[48].mxu0  ;;  %v3588_v46 = vld [vmem:[#allocation3 + $0x478] sm:$0xff]  ;;  %v8212_v4 = vadd.f32 %v6320_v15, %v8155_v54  ;;  %v6325_v21 = vpop.f32.mrb[53].mxu1 }
 0x223   : > { %v6383_v0 = vpop.f32.mrb[49].mxu0  ;;  %v8218_v29 = vadd.f32 %v6323_v30, %v8168_v32  ;;  %v6326_v2 = vadd.f32 %v6325_v21, %v6324_v24  ;;  %v6327_v31 = vpop.f32.mrb[54].mxu1 }
 0x224   : > { %v6384_v13 = vadd.f32 %v6383_v0, %v6382_v34  ;;  %v6385_v63 = vpop.f32.mrb[50].mxu0 }
 0x225   : > { %v6386_v3 = vpop.f32.mrb[51].mxu0  ;;  %v8221_v54 = vadd.f32 %v6326_v2, %v8173_v43 }
 0x226   : > { %v8209_v22 = vadd.f32 %v6384_v13, %v8090_v37  ;;  %v6387_v45 = vadd.f32 %v6386_v3, %v6385_v63  ;;  %v6328_v37 = vpop.f32.mrb[55].mxu1 }
 0x227   : > { %6659 = vmatmul.mubr.bf16.gmra.mrb[140].mxu0 %v3588_v46  ;;  %v6329_v49 = vadd.f32 %v6328_v37, %v6327_v31  ;;  %v3587_v8 = vld [vmem:[#allocation3 + $0x470] sm:$0xff]  ;;  %v6330_v58 = vpop.f32.mrb[56].mxu1 }
 0x228   : > { %v8215_v26 = vadd.f32 %v6387_v45, %v8098_v41  ;;  %4800 = vmatprep.mubr.bf16.mxu1 %v3587_v8  ;;  %v6331_v34 = vpop.f32.mrb[57].mxu1 }
 0x229   : > { %v8227_v32 = vadd.f32 %v6329_v49, %v8178_v53  ;;  %4801 = vmatmul.mubr.bf16.gmra.mrb[140].mxu1 %v3586_v1  ;;  %v6332_v43 = vadd.f32 %v6331_v34, %v6330_v58  ;;  %v6333_v0 = vpop.f32.mrb[58].mxu1 }
 0x22a   : > { %v6388_v11 = vpop.f32.mrb[52].mxu0  ;;  %v6334_v18 = vpop.f32.mrb[59].mxu1 }
 0x22b   : > { %v6389_v36 = vpop.f32.mrb[53].mxu0  ;;  %v8233_v13 = vadd.f32 %v6332_v43, %v8183_v5 }
 0x22c   : > { %v6390_v39 = vadd.f32 %v6389_v36, %v6388_v11  ;;  %v6391_v52 = vpop.f32.mrb[54].mxu0  ;;  %v6336_v45 = vpop.f32.mrb[60].mxu1 }
 0x22d   : > { %v6392_v51 = vpop.f32.mrb[55].mxu0  ;;  %v6337_v30 = vpop.f32.mrb[61].mxu1 }
 0x22e   : > { %v8224_v41 = vadd.f32 %v6390_v39, %v8107_v23  ;;  %v6393_v56 = vadd.f32 %v6392_v51, %v6391_v52  ;;  %v6335_v23 = vadd.f32 %v6334_v18, %v6333_v0  ;;  %v6338_v5 = vadd.f32 %v6337_v30, %v6336_v45  ;;  %v6339_v21 = vpop.f32.mrb[62].mxu1 }
 0x22f   : > { %v6340_v2 = vpop.f32.mrb[63].mxu1 }
 0x230   : > { %v8230_v62 = vadd.f32 %v6393_v56, %v8113_v12  ;;  %v8236_v53 = vadd.f32 %v6335_v23, %v8191_v14  ;;  %v8245_v14 = vadd.f32 %v6338_v5, %v8196_v44  ;;  %v6341_v37 = vadd.f32 %v6340_v2, %v6339_v21 }
 0x232   : > { %v6394_v35 = vpop.f32.mrb[56].mxu0 }
 0x233   : > { %v6395_v63 = vpop.f32.mrb[57].mxu0 }
 0x234   : > { %v6396_v15 = vadd.f32 %v6395_v63, %v6394_v35  ;;  %v6397_v60 = vpop.f32.mrb[58].mxu0  ;;  %v6342_v1 = vpop.f32.mrb[64].mxu1 }
 0x235   : > { %v6398_v3 = vpop.f32.mrb[59].mxu0  ;;  %v6343_v51 = vpop.f32.mrb[65].mxu1 }
 0x236   : > { %v8239_v20 = vadd.f32 %v6396_v15, %v8124_v16  ;;  %v6399_v12 = vadd.f32 %v6398_v3, %v6397_v60  ;;  %v6344_v56 = vadd.f32 %v6343_v51, %v6342_v1  ;;  %v6345_v58 = vpop.f32.mrb[66].mxu1 }
 0x237   : > { %v6346_v44 = vpop.f32.mrb[67].mxu1 }
 0x238   : > { %v8242_v46 = vadd.f32 %v6399_v12, %v8133_v38  ;;  %v8251_v38 = vadd.f32 %v6341_v37, %v8201_v17  ;;  %v8257_v18 = vadd.f32 %v6344_v56, %v7969_v6 }
 0x23a   : > { %v6400_v24 = vpop.f32.mrb[60].mxu0 }
 0x23b   : > { %v6401_v11 = vpop.f32.mrb[61].mxu0 }
 0x23c   : > { %v6402_v31 = vadd.f32 %v6401_v11, %v6400_v24  ;;  %v6403_v36 = vpop.f32.mrb[62].mxu0  ;;  %v6348_v60 = vpop.f32.mrb[68].mxu1 }
 0x23d   : > { %v6404_v39 = vpop.f32.mrb[63].mxu0  ;;  %v6349_v12 = vpop.f32.mrb[69].mxu1 }
 0x23e   : > { %v8248_v16 = vadd.f32 %v6402_v31, %v8141_v55  ;;  %v6405_v52 = vadd.f32 %v6404_v39, %v6403_v36  ;;  %v6347_v55 = vadd.f32 %v6346_v44, %v6345_v58  ;;  %v6350_v6 = vadd.f32 %v6349_v12, %v6348_v60  ;;  %v6351_v24 = vpop.f32.mrb[70].mxu1 }
 0x23f   : > { %v6352_v21 = vpop.f32.mrb[71].mxu1 }
 0x240   : > { %v8254_v49 = vadd.f32 %v6405_v52, %v8148_v48  ;;  %v8263_v48 = vadd.f32 %v6347_v55, %v7980_v28  ;;  %v8272_v11 = vadd.f32 %v6350_v6, %v8031_v10  ;;  %v6353_v2 = vadd.f32 %v6352_v21, %v6351_v24 }
 0x242   : > { %v6406_v8 = vpop.f32.mrb[64].mxu0  ;;  %v8278_v31 = vadd.f32 %v6353_v2, %v8039_v27 }
 0x243   : > { %v6407_v34 = vpop.f32.mrb[65].mxu0 }
 0x244   : > { %v6408_v43 = vadd.f32 %v6407_v34, %v6406_v8  ;;  %v6409_v0 = vpop.f32.mrb[66].mxu0  ;;  %v6354_v39 = vpop.f32.mrb[72].mxu1 }
 0x245   : > { %v6410_v35 = vpop.f32.mrb[67].mxu0  ;;  %v6355_v51 = vpop.f32.mrb[73].mxu1 }
 0x246   : > { %v8260_v17 = vadd.f32 %v6408_v43, %v8158_v7  ;;  %v6411_v23 = vadd.f32 %v6410_v35, %v6409_v0  ;;  %v6356_v8 = vadd.f32 %v6355_v51, %v6354_v39  ;;  %v6357_v56 = vpop.f32.mrb[74].mxu1 }
 0x247   : > { %v6358_v34 = vpop.f32.mrb[75].mxu1 }
 0x248   : > { %v8266_v63 = vadd.f32 %v6411_v23, %v8166_v25  ;;  %v6359_v44 = vadd.f32 %v6358_v34, %v6357_v56 }
 0x24a   : > { %v6412_v15 = vpop.f32.mrb[68].mxu0  ;;  %v8290_v43 = vadd.f32 %v6359_v44, %v8061_v19 }
 0x24b   : > { %v6413_v3 = vpop.f32.mrb[69].mxu0 }
 0x24c   : > { %v6414_v45 = vadd.f32 %v6413_v3, %v6412_v15  ;;  %v6415_v30 = vpop.f32.mrb[70].mxu0 }
 0x24d   : > { %v6416_v5 = vpop.f32.mrb[71].mxu0 }
 0x24e   : > { %v8269_v7 = vadd.f32 %v6414_v45, %v8176_v47  ;;  %v6417_v28 = vadd.f32 %v6416_v5, %v6415_v30 }
 0x250   : > { %v8275_v25 = vadd.f32 %v6417_v28, %v8181_v61  ;;  %v8284_v61 = vadd.f32 %v6356_v8, %v8051_v33 }
 0x252   : > { %v6418_v36 = vpop.f32.mrb[72].mxu0 }
 0x253   : > { %v6419_v37 = vpop.f32.mrb[73].mxu0 }
 0x254   : > { %v6420_v52 = vadd.f32 %v6419_v37, %v6418_v36  ;;  %v6421_v1 = vpop.f32.mrb[74].mxu0 }
 0x255   : > { %v6422_v47 = vpop.f32.mrb[75].mxu0 }
 0x256   : > { %v8281_v10 = vadd.f32 %v6420_v52, %v8186_v50  ;;  %v6423_v58 = vadd.f32 %v6422_v47, %v6421_v1 }
 0x258   : > { %v8287_v27 = vadd.f32 %v6423_v58, %v8194_v40 }
 0x25a   : > { %v6424_v0 = vpop.f32.mrb[76].mxu0 }
 0x25b   : > { %v6425_v55 = vpop.f32.mrb[77].mxu0 }
 0x25c   : > { %v6426_v35 = vadd.f32 %v6425_v55, %v6424_v0  ;;  %v6427_v23 = vpop.f32.mrb[78].mxu0 }
 0x25d   : > { %v6428_v15 = vpop.f32.mrb[79].mxu0 }
 0x25e   : > { %v8293_v50 = vadd.f32 %v6426_v35, %v8199_v57  ;;  %v6429_v60 = vadd.f32 %v6428_v15, %v6427_v23 }
 0x260   : > { %v8296_v3 = vadd.f32 %v6429_v60, %v8205_v9 }
 0x273   : > { %v6430_v33 = vpop.f32.mrb[80].mxu0 }
 0x274   : > { %v6431_v12 = vpop.f32.mrb[81].mxu0 }
 0x275   : > { %v6432_v45 = vadd.f32 %v6431_v12, %v6430_v33  ;;  %v6433_v40 = vpop.f32.mrb[82].mxu0 }
 0x276   : > { %v6434_v30 = vpop.f32.mrb[83].mxu0 }
 0x277   : > { %v8299_v19 = vadd.f32 %v6432_v45, %v8212_v4  ;;  %v6435_v24 = vadd.f32 %v6434_v30, %v6433_v40 }
 0x279   : > { %v8302_v57 = vadd.f32 %v6435_v24, %v8218_v29 }
 0x27a   : > { %v6360_v6 = vpop.f32.mrb[76].mxu1 }
 0x27b   : > { %v6361_v5 = vpop.f32.mrb[77].mxu1  ;;  %v6436_v39 = vpop.f32.mrb[84].mxu0 }
 0x27c   : > { %v6362_v21 = vadd.f32 %v6361_v5, %v6360_v6  ;;  %v6363_v28 = vpop.f32.mrb[78].mxu1  ;;  %v6437_v1 = vpop.f32.mrb[85].mxu0 }
 0x27d   : > { %v6364_v2 = vpop.f32.mrb[79].mxu1  ;;  %v6438_v51 = vadd.f32 %v6437_v1, %v6436_v39  ;;  %v6439_v8 = vpop.f32.mrb[86].mxu0 }
 0x27e   : > { %v8305_v9 = vadd.f32 %v6362_v21, %v8072_v42  ;;  %v6365_v36 = vadd.f32 %v6364_v2, %v6363_v28  ;;  %v6440_v58 = vpop.f32.mrb[87].mxu0 }
 0x27f   : > { %v8311_v29 = vadd.f32 %v6438_v51, %v8221_v54  ;;  %v6441_v44 = vadd.f32 %v6440_v58, %v6439_v8 }
 0x280   : > { %v8308_v37 = vadd.f32 %v6365_v36, %v8077_v59 }
 0x281   : > { %v8317_v59 = vadd.f32 %v6441_v44, %v8227_v32 }
 0x282   : > { %v6494_v52 = vpop.f32.mrb[80].mxu1 }
 0x283   : > { %v6495_v4 = vpop.f32.mrb[81].mxu1  ;;  %v6442_v15 = vpop.f32.mrb[88].mxu0 }
 0x284   : > { %v6496_v47 = vadd.f32 %v6495_v4, %v6494_v52  ;;  %v6497_v56 = vpop.f32.mrb[82].mxu1  ;;  %v6443_v12 = vpop.f32.mrb[89].mxu0 }
 0x285   : > { %v6498_v34 = vpop.f32.mrb[83].mxu1  ;;  %v6444_v54 = vadd.f32 %v6443_v12, %v6442_v15  ;;  %v6445_v40 = vpop.f32.mrb[90].mxu0 }
 0x286   : > { %v6499_v42 = vadd.f32 %v6498_v34, %v6497_v56  ;;  %v8314_v0 = vadd.f32 %v6496_v47, %v8209_v22  ;;  %v6446_v6 = vpop.f32.mrb[91].mxu0 }
 0x287   : > { %v8326_v32 = vadd.f32 %v6444_v54, %v8233_v13  ;;  %v6447_v24 = vadd.f32 %v6446_v6, %v6445_v40 }
 0x288   : > { %v8320_v55 = vadd.f32 %v6499_v42, %v8215_v26 }
 0x289   : > { %v8332_v5 = vadd.f32 %v6447_v24, %v8236_v53 }
 0x28a   : > { %v6500_v35 = vpop.f32.mrb[84].mxu1 }
 0x28b   : > { %v6501_v23 = vpop.f32.mrb[85].mxu1  ;;  %v6448_v2 = vpop.f32.mrb[92].mxu0 }
 0x28c   : > { %v6502_v60 = vadd.f32 %v6501_v23, %v6500_v35  ;;  %v6503_v33 = vpop.f32.mrb[86].mxu1  ;;  %v6449_v52 = vpop.f32.mrb[93].mxu0 }
 0x28d   : > { %v6504_v45 = vpop.f32.mrb[87].mxu1  ;;  %v6450_v4 = vadd.f32 %v6449_v52, %v6448_v2 }
 0x28e   : > { %v6505_v30 = vadd.f32 %v6504_v45, %v6503_v33  ;;  %v8323_v22 = vadd.f32 %v6502_v60, %v8224_v41  ;;  %v6451_v41 = vpop.f32.mrb[94].mxu0 }
 0x28f   : > { %v6452_v8 = vpop.f32.mrb[95].mxu0 }
 0x290   : > { %v8329_v26 = vadd.f32 %v6505_v30, %v8230_v62  ;;  %v8338_v62 = vadd.f32 %v6450_v4, %v8245_v14  ;;  %v6453_v47 = vadd.f32 %v6452_v8, %v6451_v41 }
 0x292   : > { %v6506_v21 = vpop.f32.mrb[88].mxu1  ;;  %v8344_v56 = vadd.f32 %v6453_v47, %v8251_v38 }
 0x293   : > { %v6507_v28 = vpop.f32.mrb[89].mxu1  ;;  %v6454_v35 = vpop.f32.mrb[96].mxu0 }
 0x294   : > { %v6508_v36 = vadd.f32 %v6507_v28, %v6506_v21  ;;  %v6509_v39 = vpop.f32.mrb[90].mxu1  ;;  %v6455_v15 = vpop.f32.mrb[97].mxu0 }
 0x295   : > { %v6510_v1 = vpop.f32.mrb[91].mxu1  ;;  %v6457_v33 = vpop.f32.mrb[98].mxu0 }
 0x296   : > { %v6511_v51 = vadd.f32 %v6510_v1, %v6509_v39  ;;  %v8335_v13 = vadd.f32 %v6508_v36, %v8239_v20  ;;  %v6456_v20 = vadd.f32 %v6455_v15, %v6454_v35  ;;  %v6458_v12 = vpop.f32.mrb[99].mxu0 }
 0x297   : > { %v6459_v45 = vadd.f32 %v6458_v12, %v6457_v33 }
 0x298   : > { %v8341_v53 = vadd.f32 %v6511_v51, %v8242_v46  ;;  %v8350_v46 = vadd.f32 %v6456_v20, %v8257_v18 }
 0x299   : > { %v8356_v40 = vadd.f32 %v6459_v45, %v8263_v48 }
 0x29a   : > { %v6512_v58 = vpop.f32.mrb[92].mxu1 }
 0x29b   : > { %v6513_v34 = vpop.f32.mrb[93].mxu1  ;;  %v6460_v2 = vpop.f32.mrb[100].mxu0 }
 0x29c   : > { %v6514_v44 = vadd.f32 %v6513_v34, %v6512_v58  ;;  %v6515_v42 = vpop.f32.mrb[94].mxu1  ;;  %v6461_v36 = vpop.f32.mrb[101].mxu0 }
 0x29d   : > { %v6516_v23 = vpop.f32.mrb[95].mxu1  ;;  %v6462_v18 = vadd.f32 %v6461_v36, %v6460_v2  ;;  %v6463_v39 = vpop.f32.mrb[102].mxu0 }
 0x29e   : > { %v6517_v60 = vadd.f32 %v6516_v23, %v6515_v42  ;;  %v8347_v14 = vadd.f32 %v6514_v44, %v8248_v16 }
 0x29f   : > { %v8365_v1 = vadd.f32 %v6462_v18, %v8272_v11 }
 0x2a0   : > { %v8353_v38 = vadd.f32 %v6517_v60, %v8254_v49  ;;  %v6464_v49 = vpop.f32.mrb[103].mxu0 }
 0x2a1   : > { %v6465_v4 = vadd.f32 %v6464_v49, %v6463_v39 }
 0x2a2   : > { %v6518_v54 = vpop.f32.mrb[96].mxu1 }
 0x2a3   : > { %v6519_v30 = vpop.f32.mrb[97].mxu1  ;;  %v8368_v51 = vadd.f32 %v6465_v4, %v8278_v31  ;;  %v6466_v34 = vpop.f32.mrb[104].mxu0 }
 0x2a4   : > { %v6520_v6 = vadd.f32 %v6519_v30, %v6518_v54  ;;  %v6521_v24 = vpop.f32.mrb[98].mxu1 }
 0x2a5   : > { %v6522_v21 = vpop.f32.mrb[99].mxu1 }
 0x2a6   : > { %v6523_v28 = vadd.f32 %v6522_v21, %v6521_v24  ;;  %v8359_v16 = vadd.f32 %v6520_v6, %v8260_v17 }
 0x2a8   : > { %v8362_v52 = vadd.f32 %v6523_v28, %v8266_v63  ;;  %v6467_v63 = vpop.f32.mrb[105].mxu0 }
 0x2a9   : > { %v6468_v42 = vadd.f32 %v6467_v63, %v6466_v34  ;;  %v6469_v35 = vpop.f32.mrb[106].mxu0 }
 0x2aa   : > { %v6524_v48 = vpop.f32.mrb[100].mxu1  ;;  %v6470_v23 = vpop.f32.mrb[107].mxu0 }
 0x2ab   : > { %v6525_v41 = vpop.f32.mrb[101].mxu1  ;;  %v8377_v15 = vadd.f32 %v6468_v42, %v8284_v61  ;;  %v6471_v60 = vadd.f32 %v6470_v23, %v6469_v35  ;;  %v8409_v35 = vld [vmem:[%s8602_s2] ss:$0 sm:$0xff] }
 0x2ac   : > { %v6526_v8 = vadd.f32 %v6525_v41, %v6524_v48  ;;  %v6527_v47 = vpop.f32.mrb[102].mxu1 }
 0x2ad   : > { %v6528_v17 = vpop.f32.mrb[103].mxu1  ;;  %v8380_v33 = vadd.f32 %v6471_v60, %v8290_v43 }
 0x2ae   : > { %v6529_v58 = vadd.f32 %v6528_v17, %v6527_v47  ;;  %v8371_v44 = vadd.f32 %v6526_v8, %v8269_v7 }
 0x2b0   : > { %v8374_v11 = vadd.f32 %v6529_v58, %v8275_v25 }
 0x2b2   : > { %v6530_v31 = vpop.f32.mrb[104].mxu1 }
 0x2b3   : > { %v6531_v20 = vpop.f32.mrb[105].mxu1 }
 0x2b4   : > { %v6532_v12 = vadd.f32 %v6531_v20, %v6530_v31  ;;  %v6533_v45 = vpop.f32.mrb[106].mxu1 }
 0x2b5   : > { %v6534_v7 = vpop.f32.mrb[107].mxu1 }
 0x2b6   : > { %v6535_v54 = vadd.f32 %v6534_v7, %v6533_v45  ;;  %v8383_v30 = vadd.f32 %v6532_v12, %v8281_v10 }
 0x2b8   : > { %v8386_v25 = vadd.f32 %v6535_v54, %v8287_v27 }
 0x2ba   : > { %v6536_v6 = vpop.f32.mrb[108].mxu1  ;;  %v6472_v49 = vpop.f32.mrb[108].mxu0 }
 0x2bb   : > { %v6537_v24 = vpop.f32.mrb[109].mxu1  ;;  %v6473_v4 = vpop.f32.mrb[109].mxu0 }
 0x2bc   : > { %v6538_v61 = vadd.f32 %v6537_v24, %v6536_v6  ;;  %v6539_v21 = vpop.f32.mrb[110].mxu1  ;;  %v6474_v41 = vadd.f32 %v6473_v4, %v6472_v49  ;;  %v6475_v8 = vpop.f32.mrb[110].mxu0 }
 0x2bd   : > { %v6540_v28 = vpop.f32.mrb[111].mxu1  ;;  %v6476_v58 = vpop.f32.mrb[111].mxu0 }
 0x2be   : > { %v6541_v2 = vadd.f32 %v6540_v28, %v6539_v21  ;;  %v8389_v36 = vadd.f32 %v6538_v61, %v8293_v50  ;;  %v8398_v50 = vadd.f32 %v6474_v41, %v8305_v9  ;;  %v6477_v34 = vadd.f32 %v6476_v58, %v6475_v8  ;;  %v8415_v9 = vld [vmem:[%s8603_s3] ss:$0 sm:$0xff] }
 0x2c0   : > { %v8392_v43 = vadd.f32 %v6541_v2, %v8296_v3  ;;  %v8404_v63 = vadd.f32 %v6477_v34, %v8308_v37 }
 0x2c2   : > { %v6542_v18 = vpop.f32.mrb[112].mxu1  ;;  %v6632_v42 = vpop.f32.mrb[112].mxu0 }
 0x2c3   : > { %v6543_v39 = vpop.f32.mrb[113].mxu1  ;;  %v4843_v23 = vpop.f32.mrb[113].mxu0 }
 0x2c4   : > { %v6544_v10 = vadd.f32 %v6543_v39, %v6542_v18  ;;  %v6545_v48 = vpop.f32.mrb[114].mxu1  ;;  %v6633_v60 = vpop.f32.mrb[114].mxu0 }
 0x2c5   : > { %v6546_v27 = vpop.f32.mrb[115].mxu1  ;;  %v4855_v12 = vadd.f32 %v6633_v60, %v8329_v26  ;;  %v4846_v45 = vpop.f32.mrb[115].mxu0 }
 0x2c6   : > { %v6547_v47 = vadd.f32 %v6546_v27, %v6545_v48  ;;  %v8395_v17 = vadd.f32 %v6544_v10, %v8299_v19  ;;  %v4852_v19 = vadd.f32 %v6632_v42, %v8323_v22  ;;  %v4847_v6 = vadd.f32 %v4846_v45, %v8320_v55 }
 0x2c7   : > { %v4980_v21 = vmul.f32 %v8409_v35, %v4855_v12 }
 0x2c8   : > { %v8401_v3 = vadd.f32 %v6547_v47, %v8302_v57  ;;  %v4844_v57 = vadd.f32 %v4843_v23, %v8314_v0  ;;  %v4979_v20 = vmul.f32 %v8409_v35, %v4852_v19  ;;  %v4978_v26 = vmul.f32 %v8409_v35, %v4847_v6 }
 0x2c9   : > { %v5019_v18 = vadd.f32 %v8415_v9, %v4980_v21 }
 0x2ca   : > { %v6548_v31 = vpop.f32.mrb[116].mxu1  ;;  %v4977_v22 = vmul.f32 %v8409_v35, %v4844_v57  ;;  %v5018_v61 = vadd.f32 %v8415_v9, %v4979_v20  ;;  %v5017_v55 = vadd.f32 %v8415_v9, %v4978_v26  ;;  %v6636_v49 = vpop.f32.mrb[116].mxu0 }
 0x2cb   : > { %v6549_v37 = vpop.f32.mrb[117].mxu1  ;;  %v5051_v48 = vmax.f32 %v5019_v18, 0.0  ;;  %v4868_v4 = vadd.f32 %v6636_v49, %v8347_v14  ;;  %v4859_v27 = vpop.f32.mrb[117].mxu0 }
 0x2cc   : > { %v6550_v7 = vadd.f32 %v6549_v37, %v6548_v31  ;;  %v6551_v54 = vpop.f32.mrb[118].mxu1  ;;  %v5016_v2 = vadd.f32 %v8415_v9, %v4977_v22  ;;  %v5050_v10 = vmax.f32 %v5018_v61, 0.0  ;;  %v5049_v41 = vmax.f32 %v5017_v55, 0.0  ;;  %v6637_v47 = vpop.f32.mrb[118].mxu0 }
 0x2cd   : > { %v6552_v24 = vpop.f32.mrb[119].mxu1  ;;  %v4860_v8 = vadd.f32 %v4859_v27, %v8335_v13  ;;  %v4983_v34 = vmul.f32 %v8409_v35, %v4868_v4  ;;  %v4862_v42 = vpop.f32.mrb[119].mxu0 }
 0x2ce   : > { %v6553_v28 = vadd.f32 %v6552_v24, %v6551_v54  ;;  %v8425_v0 = vadd.f32 %v6550_v7, %v8311_v29  ;;  %v5048_v29 = vmax.f32 %v5016_v2, 0.0  ;;  %v6055_v58 = vpack.c.bf16 %v5051_v48, %v5050_v10 }
 0x2cf   : > { %v4981_v23 = vmul.f32 %v8409_v35, %v4860_v8  ;;  %v4863_v31 = vadd.f32 %v4862_v42, %v8341_v53  ;;  %v5022_v13 = vadd.f32 %v8415_v9, %v4983_v34 }
 0x2d0   : > { %v8431_v39 = vadd.f32 %v6553_v28, %v8317_v59  ;;  %v4871_v59 = vadd.f32 %v6637_v47, %v8353_v38  ;;  %v6050_v19 = vpack.c.bf16 %v5049_v41, %v5048_v29  ;;  %6127 = vst [vmem:[%s8442_s21 + $0x8] sm:$0xff] %v6055_v58  }
 0x2d1   : > { %v5020_v38 = vadd.f32 %v8415_v9, %v4981_v23  ;;  %v4982_v37 = vmul.f32 %v8409_v35, %v4863_v31  ;;  %v5054_v24 = vmax.f32 %v5022_v13, 0.0 }
 0x2d2   : > { %v6554_v57 = vpop.f32.mrb[120].mxu1  ;;  %v4984_v14 = vmul.f32 %v8409_v35, %v4871_v59  ;;  %6051 = vst [vmem:[%s8442_s21] sm:$0xff] %v6050_v19   ;;  %v6640_v54 = vpop.f32.mrb[120].mxu0 }
 0x2d3   : > { %v6555_v60 = vpop.f32.mrb[121].mxu1  ;;  %v5021_v7 = vadd.f32 %v8415_v9, %v4982_v37  ;;  %v4884_v21 = vadd.f32 %v6640_v54, %v8371_v44  ;;  %v4875_v28 = vpop.f32.mrb[121].mxu0  ;;  %v5052_v2 = vmax.f32 %v5020_v38, 0.0 }
 0x2d4   : > { %v6556_v20 = vadd.f32 %v6555_v60, %v6554_v57  ;;  %v6557_v12 = vpop.f32.mrb[122].mxu1  ;;  %v5023_v53 = vadd.f32 %v8415_v9, %v4984_v14  ;;  %v4876_v18 = vadd.f32 %v4875_v28, %v8359_v16  ;;  %v6641_v55 = vpop.f32.mrb[122].mxu0 }
 0x2d5   : > { %v6558_v45 = vpop.f32.mrb[123].mxu1  ;;  %v5053_v26 = vmax.f32 %v5021_v7, 0.0  ;;  %v4987_v48 = vmul.f32 %v8409_v35, %v4884_v21  ;;  %v4878_v4 = vpop.f32.mrb[123].mxu0 }
 0x2d6   : > { %v6559_v22 = vadd.f32 %v6558_v45, %v6557_v12  ;;  %v8453_v6 = vadd.f32 %v6556_v20, %v8326_v32  ;;  %v5055_v61 = vmax.f32 %v5023_v53, 0.0  ;;  %v4887_v32 = vadd.f32 %v6641_v55, %v8374_v11 }
 0x2d7   : > { %v6060_v27 = vpack.c.bf16 %v5053_v26, %v5052_v2  ;;  %v4985_v29 = vmul.f32 %v8409_v35, %v4876_v18  ;;  %v4879_v44 = vadd.f32 %v4878_v4, %v8362_v52  ;;  %v5026_v41 = vadd.f32 %v8415_v9, %v4987_v48 }
 0x2d8   : > { %v8458_v49 = vadd.f32 %v6559_v22, %v8332_v5  ;;  %v6065_v10 = vpack.c.bf16 %v5055_v61, %v5054_v24  ;;  %v4988_v16 = vmul.f32 %v8409_v35, %v4887_v32 }
 0x2d9   : > { %6128 = vst [vmem:[%s8442_s21 + $0x10] sm:$0xff] %v6060_v27   ;;  %v5024_v5 = vadd.f32 %v8415_v9, %v4985_v29  ;;  %v4986_v47 = vmul.f32 %v8409_v35, %v4879_v44  ;;  %v5058_v42 = vmax.f32 %v5026_v41, 0.0 }
 0x2da   : > { %6129 = vst [vmem:[%s8442_s21 + $0x18] sm:$0xff] %v6065_v10   ;;  %v6560_v8 = vpop.f32.mrb[124].mxu1  ;;  %v5027_v11 = vadd.f32 %v8415_v9, %v4988_v16  ;;  %v6644_v52 = vpop.f32.mrb[124].mxu0 }
 0x2db   : > { %v6561_v58 = vpop.f32.mrb[125].mxu1  ;;  %v5025_v19 = vadd.f32 %v8415_v9, %v4986_v47  ;;  %v4900_v57 = vadd.f32 %v6644_v52, %v8389_v36  ;;  %v4891_v13 = vpop.f32.mrb[125].mxu0  ;;  %v5056_v38 = vmax.f32 %v5024_v5, 0.0 }
 0x2dc   : > { %v6562_v34 = vadd.f32 %v6561_v58, %v6560_v8  ;;  %v6563_v59 = vpop.f32.mrb[126].mxu1  ;;  %v5059_v31 = vmax.f32 %v5027_v11, 0.0  ;;  %v4892_v20 = vadd.f32 %v4891_v13, %v8383_v30  ;;  %v6645_v12 = vpop.f32.mrb[126].mxu0 }
 0x2dd   : > { %v6564_v23 = vpop.f32.mrb[127].mxu1  ;;  %v5057_v37 = vmax.f32 %v5025_v19, 0.0  ;;  %v4991_v45 = vmul.f32 %v8409_v35, %v4900_v57  ;;  %v4903_v7 = vadd.f32 %v6645_v12, %v8392_v43  ;;  %v4894_v54 = vpop.f32.mrb[127].mxu0 }
 0x2de   : > { %v6565_v14 = vadd.f32 %v6564_v23, %v6563_v59  ;;  %v4771_v60 = vadd.f32 %v6562_v34, %v8338_v62  ;;  %v6075_v53 = vpack.c.bf16 %v5059_v31, %v5058_v42  ;;  %v4989_v24 = vmul.f32 %v8409_v35, %v4892_v20 }
 0x2df   : > { %v6070_v36 = vpack.c.bf16 %v5057_v37, %v5056_v38  ;;  %v4895_v61 = vadd.f32 %v4894_v54, %v8386_v25  ;;  %v5030_v62 = vadd.f32 %v8415_v9, %v4991_v45  ;;  %v4992_v21 = vmul.f32 %v8409_v35, %v4903_v7 }
 0x2e0   : > { %v4774_v22 = vadd.f32 %v6565_v14, %v8344_v56  ;;  %6131 = vst [vmem:[%s8442_s21 + $0x28] sm:$0xff] %v6075_v53   ;;  %v5028_v30 = vadd.f32 %v8415_v9, %v4989_v24 }
 0x2e1   : > { %6130 = vst [vmem:[%s8442_s21 + $0x20] sm:$0xff] %v6070_v36   ;;  %v4990_v28 = vmul.f32 %v8409_v35, %v4895_v61  ;;  %v5031_v43 = vadd.f32 %v8415_v9, %v4992_v21  ;;  %v5062_v55 = vmax.f32 %v5030_v62, 0.0 }
 0x2e2   : > { %v6566_v2 = vpop.f32.mrb[128].mxu1  ;;  %v6648_v26 = vpop.f32.mrb[128].mxu0  ;;  %v5060_v27 = vmax.f32 %v5028_v30, 0.0 }
 0x2e3   : > { %v5029_v56 = vadd.f32 %v8415_v9, %v4990_v28  ;;  %v6567_v18 = vpop.f32.mrb[129].mxu1  ;;  %v5063_v10 = vmax.f32 %v5031_v43, 0.0  ;;  %v4916_v25 = vadd.f32 %v6648_v26, %v8425_v0  ;;  %v4907_v48 = vpop.f32.mrb[129].mxu0 }
 0x2e4   : > { %v6568_v32 = vadd.f32 %v6567_v18, %v6566_v2  ;;  %v6569_v4 = vpop.f32.mrb[130].mxu1  ;;  %v4908_v44 = vadd.f32 %v4907_v48, %v8395_v17  ;;  %v6649_v41 = vpop.f32.mrb[130].mxu0 }
 0x2e5   : > { %v5061_v29 = vmax.f32 %v5029_v56, 0.0  ;;  %v6570_v16 = vpop.f32.mrb[131].mxu1  ;;  %v6085_v8 = vpack.c.bf16 %v5063_v10, %v5062_v55  ;;  %v4995_v5 = vmul.f32 %v8409_v35, %v4916_v25  ;;  %v4919_v47 = vadd.f32 %v6649_v41, %v8431_v39  ;;  %v4910_v58 = vpop.f32.mrb[131].mxu0 }
 0x2e6   : > { %v6571_v11 = vadd.f32 %v6570_v16, %v6569_v4  ;;  %v4993_v0 = vmul.f32 %v8409_v35, %v4908_v44  ;;  %v4911_v59 = vadd.f32 %v4910_v58, %v8401_v3  ;;  %v4779_v42 = vadd.f32 %v6568_v32, %v8350_v46 }
 0x2e7   : > { %v6080_v34 = vpack.c.bf16 %v5061_v29, %v5060_v27  ;;  %6133 = vst [vmem:[%s8442_s21 + $0x38] sm:$0xff] %v6085_v8   ;;  %v5034_v17 = vadd.f32 %v8415_v9, %v4995_v5  ;;  %v4996_v19 = vmul.f32 %v8409_v35, %v4919_v47 }
 0x2e8   : > { %v4782_v52 = vadd.f32 %v6571_v11, %v8356_v40  ;;  %v5032_v23 = vadd.f32 %v8415_v9, %v4993_v0  ;;  %v4994_v39 = vmul.f32 %v8409_v35, %v4911_v59 }
 0x2e9   : > { %6132 = vst [vmem:[%s8442_s21 + $0x30] sm:$0xff] %v6080_v34   ;;  %v5035_v31 = vadd.f32 %v8415_v9, %v4996_v19  ;;  %v5066_v3 = vmax.f32 %v5034_v17, 0.0 }
 0x2ea   : > { %v5033_v57 = vadd.f32 %v8415_v9, %v4994_v39  ;;  %v6652_v13 = vpop.f32.mrb[132].mxu0  ;;  %v6572_v37 = vpop.f32.mrb[132].mxu1  ;;  %v5064_v20 = vmax.f32 %v5032_v23, 0.0 }
 0x2eb   : > { %v5067_v14 = vmax.f32 %v5035_v31, 0.0  ;;  %v4932_v46 = vadd.f32 %v6652_v13, %v4771_v60  ;;  %v4923_v38 = vpop.f32.mrb[133].mxu0  ;;  %v6573_v45 = vpop.f32.mrb[133].mxu1 }
 0x2ec   : > { %v5065_v12 = vmax.f32 %v5033_v57, 0.0  ;;  %v4924_v40 = vadd.f32 %v4923_v38, %v8453_v6  ;;  %v6653_v53 = vpop.f32.mrb[134].mxu0  ;;  %v6574_v24 = vadd.f32 %v6573_v45, %v6572_v37  ;;  %v6575_v62 = vpop.f32.mrb[134].mxu1 }
 0x2ed   : > { %v6095_v7 = vpack.c.bf16 %v5067_v14, %v5066_v3  ;;  %v4999_v54 = vmul.f32 %v8409_v35, %v4932_v46  ;;  %v4935_v36 = vadd.f32 %v6653_v53, %v4774_v22  ;;  %v4926_v61 = vpop.f32.mrb[135].mxu0  ;;  %v6576_v28 = vpop.f32.mrb[135].mxu1 }
 0x2ee   : > { %v6090_v21 = vpack.c.bf16 %v5065_v12, %v5064_v20  ;;  %v4997_v60 = vmul.f32 %v8409_v35, %v4924_v40  ;;  %v4927_v30 = vadd.f32 %v4926_v61, %v8458_v49  ;;  %v6577_v2 = vadd.f32 %v6576_v28, %v6575_v62 }
 0x2ef   : > { %6135 = vst [vmem:[%s8442_s21 + $0x48] sm:$0xff] %v6095_v7   ;;  %v5038_v43 = vadd.f32 %v8415_v9, %v4999_v54  ;;  %v5000_v6 = vmul.f32 %v8409_v35, %v4935_v36  ;;  %v4787_v56 = vadd.f32 %v6574_v24, %v8365_v1 }
 0x2f0   : > { %6134 = vst [vmem:[%s8442_s21 + $0x40] sm:$0xff] %v6090_v21   ;;  %v5036_v22 = vadd.f32 %v8415_v9, %v4997_v60  ;;  %v4998_v26 = vmul.f32 %v8409_v35, %v4927_v30  ;;  %v4790_v55 = vadd.f32 %v6577_v2, %v8368_v51 }
 0x2f1   : > { %v5039_v18 = vadd.f32 %v8415_v9, %v5000_v6  ;;  %v5070_v25 = vmax.f32 %v5038_v43, 0.0 }
 0x2f2   : > { %v5037_v49 = vadd.f32 %v8415_v9, %v4998_v26  ;;  %v6656_v10 = vpop.f32.mrb[136].mxu0  ;;  %v5068_v27 = vmax.f32 %v5036_v22, 0.0  ;;  %v6578_v44 = vpop.f32.mrb[136].mxu1 }
 0x2f3   : > { %v5071_v48 = vmax.f32 %v5039_v18, 0.0  ;;  %v4948_v32 = vadd.f32 %v6656_v10, %v4787_v56  ;;  %v4939_v4 = vpop.f32.mrb[137].mxu0  ;;  %v6579_v47 = vpop.f32.mrb[137].mxu1 }
 0x2f4   : > { %v5069_v29 = vmax.f32 %v5037_v49, 0.0  ;;  %v4940_v1 = vadd.f32 %v4939_v4, %v4779_v42  ;;  %v6657_v41 = vpop.f32.mrb[138].mxu0  ;;  %v6580_v34 = vadd.f32 %v6579_v47, %v6578_v44  ;;  %v6581_v59 = vpop.f32.mrb[138].mxu1 }
 0x2f5   : > { %v6105_v16 = vpack.c.bf16 %v5071_v48, %v5070_v25  ;;  %v5003_v8 = vmul.f32 %v8409_v35, %v4948_v32  ;;  %v4951_v5 = vadd.f32 %v6657_v41, %v4790_v55  ;;  %v4942_v51 = vpop.f32.mrb[139].mxu0  ;;  %v6582_v19 = vpop.f32.mrb[139].mxu1 }
 0x2f6   : > { %v6100_v58 = vpack.c.bf16 %v5069_v29, %v5068_v27  ;;  %v5001_v11 = vmul.f32 %v8409_v35, %v4940_v1  ;;  %v4943_v0 = vadd.f32 %v4942_v51, %v4782_v52  ;;  %v6583_v31 = vadd.f32 %v6582_v19, %v6581_v59 }
 0x2f7   : > { %6137 = vst [vmem:[%s8442_s21 + $0x58] sm:$0xff] %v6105_v16   ;;  %v5042_v17 = vadd.f32 %v8415_v9, %v5003_v8  ;;  %v5004_v42 = vmul.f32 %v8409_v35, %v4951_v5  ;;  %v4795_v57 = vadd.f32 %v6580_v34, %v8377_v15 }
 0x2f8   : > { %6136 = vst [vmem:[%s8442_s21 + $0x50] sm:$0xff] %v6100_v58   ;;  %v5040_v23 = vadd.f32 %v8415_v9, %v5001_v11  ;;  %v5002_v39 = vmul.f32 %v8409_v35, %v4943_v0  ;;  %v4798_v3 = vadd.f32 %v6583_v31, %v8380_v33 }
 0x2f9   : > { %v5043_v13 = vadd.f32 %v8415_v9, %v5004_v42  ;;  %v5074_v14 = vmax.f32 %v5042_v17, 0.0 }
 0x2fa   : > { %v5041_v52 = vadd.f32 %v8415_v9, %v5002_v39  ;;  %v5072_v38 = vmax.f32 %v5040_v23, 0.0  ;;  %v6660_v40 = vpop.f32.mrb[140].mxu0 }
 0x2fb   : > { %v5075_v46 = vmax.f32 %v5043_v13, 0.0  ;;  %v4955_v53 = vpop.f32.mrb[141].mxu0 }
 0x2fc   : > { %v5073_v37 = vmax.f32 %v5041_v52, 0.0  ;;  %v4956_v45 = vadd.f32 %v4955_v53, %v4795_v57  ;;  %v6661_v7 = vpop.f32.mrb[142].mxu0  ;;  %v6584_v61 = vpop.f32.mrb[140].mxu1 }
 0x2fd   : > { %v6115_v20 = vpack.c.bf16 %v5075_v46, %v5074_v14  ;;  %v4958_v54 = vpop.f32.mrb[143].mxu0  ;;  %v6585_v62 = vpop.f32.mrb[141].mxu1 }
 0x2fe   : > { %v6110_v12 = vpack.c.bf16 %v5073_v37, %v5072_v38  ;;  %v5005_v15 = vmul.f32 %v8409_v35, %v4956_v45  ;;  %v4959_v36 = vadd.f32 %v4958_v54, %v4798_v3  ;;  %v6586_v60 = vadd.f32 %v6585_v62, %v6584_v61  ;;  %v6587_v30 = vpop.f32.mrb[142].mxu1 }
 0x2ff   : > { %6139 = vst [vmem:[%s8442_s21 + $0x68] sm:$0xff] %v6115_v20   ;;  %v6588_v6 = vpop.f32.mrb[143].mxu1 }
 0x300   : > { %6138 = vst [vmem:[%s8442_s21 + $0x60] sm:$0xff] %v6110_v12   ;;  %v5044_v24 = vadd.f32 %v8415_v9, %v5005_v15  ;;  %v5006_v33 = vmul.f32 %v8409_v35, %v4959_v36  ;;  %v4803_v2 = vadd.f32 %v6586_v60, %v8398_v50  ;;  %v6589_v56 = vadd.f32 %v6588_v6, %v6587_v30 }
 0x302   : > { %v5045_v21 = vadd.f32 %v8415_v9, %v5006_v33  ;;  %v5076_v28 = vmax.f32 %v5044_v24, 0.0  ;;  %v4964_v26 = vadd.f32 %v6660_v40, %v4803_v2  ;;  %v4806_v18 = vadd.f32 %v6589_v56, %v8404_v63 }
 0x304   : > { %v5077_v43 = vmax.f32 %v5045_v21, 0.0  ;;  %v5007_v55 = vmul.f32 %v8409_v35, %v4964_v26  ;;  %v4967_v49 = vadd.f32 %v6661_v7, %v4806_v18 }
 0x306   : > { %v6120_v22 = vpack.c.bf16 %v5077_v43, %v5076_v28  ;;  %v5046_v10 = vadd.f32 %v8415_v9, %v5007_v55  ;;  %v5008_v25 = vmul.f32 %v8409_v35, %v4967_v49 }
 0x308   : > { %6140 = vst [vmem:[%s8442_s21 + $0x70] sm:$0xff] %v6120_v22   ;;  %v5047_v48 = vadd.f32 %v8415_v9, %v5008_v25  ;;  %v5078_v50 = vmax.f32 %v5046_v10, 0.0 }
 0x30a   : > { %v5079_v32 = vmax.f32 %v5047_v48, 0.0 }
 0x30c   : > { %v6125_v63 = vpack.c.bf16 %v5079_v32, %v5078_v50 }
 0x30e   : > { %6141 = vst [vmem:[%s8442_s21 + $0x78] sm:$0xff] %v6125_v63  }
 0x30f   : > { %7139 = shalt.err (!%p7136_p5)
}
 0x310   : > { %s7140_s8 = scalar_lea.hbm %s8548_s9, 2048  ;;  %s7144_s27 = scalar_lea.hbm %s8604_s4, 4096 }
 0x311   : > { %p7141_p9 = scmp.ne.s32.totalorder %s8548_s9, %s7140_s8  ;;  %p7145_p3 = scmp.lt.u32.totalorder %s8548_s9, %s8604_s4 }
 0x312   : > { %p7146_p7 = scmp.lt.u32.totalorder %s7144_s27, %s7140_s8  ;;  %p7148_p4 = scmp.lt.u32.totalorder %s7140_s8, %s8548_s9 }
 0x313   : > { %p7142_p1 = pnand %p7141_p9, %p7346_p10 }
 0x314   : > { %p7147_p13 = por %p7146_p7, %p7145_p3 }
 0x315   : > { %p7143_p2 = pneg %p7142_p1 }
 0x316   : > { %p7149_p6 = por %p7148_p4, %p7147_p13 }
 0x318   : > { %p7150_p8 = pnand %p7149_p6, %p7143_p2 }
 0x31a   : > { %7153 = shalt.err (!%p7150_p8)
}
 0x31b   : > { %s7220_s22 = smov 64   ;;  %s7221_s6 = smov 4  }
 0x31c   : > { %6684 = dma.vmem_to_hbm [thread:$0]  (%p7346_p10), %s8550_s28, 2048, %s8548_s9, %s5241_s11, %s7220_s22, %s7220_s22, %s7221_s6  }
 0x31d PF: > { %s5273_s29 = sand.u32 1, %s7192_s15   ;;  %p8630_p12 = scmp.ne.s32.totalorder %s8612_s26, 0 }
 0x31e   : > { %p8631_p11 = scmp.ge.s32.totalorder %s7212_s20, 2  ;;  %s5274_s13 = scalar_lea.sflag [#allocation6], %s5273_s29 }
 0x320   : > { %p6695_p0 = pnand %p8631_p11, %p8630_p12 }
 0x322   : > { %7187 = dma.done.wait (!%p6695_p0), %s5274_s13, 2048  }
 0x323   : > { %7189 = vsyncadd (!%p6695_p0), %s5274_s13, 4294965248  ;;  %s21_s20 = sadd.s32 1, %s7212_s20   ;;  %s8632_s15 = smov %s7196_s16 }
 0x324   : > { %p18_p5 = scmp.ge.s32.totalorder %s21_s20, 4   ;;  %s8633_s16 = smov %s7200_s17 }
 0x325   : > { %s8634_s17 = smov %s7355_s10  ;;  %s8635_s18 = smov %s7208_s19 }
 0x326   : > { %s8636_s19 = smov %s8638_s5  ;;  %20 = sbr.rel (!%p18_p5) target bundleno = 7 (0x7), region = 101 }
 0x32d   :  { %5279 = vsyncpa [#allocation5], 1 }
 0x32e   :  { %5281 = vsyncpa [#allocation5 + $0x1], 1 }
 0x32f   :  { %5282 = vsyncpa [#allocation8], 1 }
 0x330   :  { %5283 = vsyncpa [#allocation6], 1 }
 0x331   :  { %5285 = vsyncpa [#allocation6 + $0x1], 1 }

</bundles_post_ra>
